<compile_context>
chip_gen: v7x
topology: tpu7x:2x2x1
jax: 0.10.0
libtpu: 0.0.40
codegen_flags: <defaults>
</compile_context>

<pallas_src>
import math

import jax
import jax.numpy as jnp
from jax.experimental import pallas as pl
from jax.experimental.pallas import tpu as pltpu

IN_DIM = 5000
PAD_IN = 5120          # 40 * 128  (zero-padded I/O width)
H1, H2, H3 = 512, 128, 64
H3_PAD = 128           # bottleneck 64 -> 128 (zero padded, exact)
TK = 1280              # K tile for layer 1 weight stream (5120 / 1280 = 4)
TN = 1280              # N tile for layer 6 weight stream (5120 / 1280 = 4)
VMEM_LIMIT = 32 << 20  # fits every generation (v7x physical VMEM = 64 MiB)

LAYER_DIMS = [(5000, 512), (512, 128), (128, 64), (64, 128), (128, 512), (512, 5000)]


def _encoder_kernel(x_ref, w1_ref, b1_ref, w2_ref, b2_ref, w3_ref, b3_ref,
                    w4_ref, b4_ref, w5_ref, b5_ref, h_ref, acc_ref):
    """Layers 1-5 fused. Layer 1 accumulates over K tiles; layers 2-5 run in
    the epilogue of the last K step with their weights VMEM-resident."""
    k = pl.program_id(0)

    @pl.when(k == 0)
    def _():
        acc_ref[...] = jnp.zeros_like(acc_ref)

    acc_ref[...] += jnp.dot(x_ref[...].astype(jnp.bfloat16), w1_ref[...],
                            preferred_element_type=jnp.float32)

    @pl.when(k == pl.num_programs(0) - 1)
    def _():
        def dense_relu(h, w_ref, b_ref):
            y = jnp.dot(h.astype(jnp.bfloat16), w_ref[...],
                        preferred_element_type=jnp.float32) + b_ref[...]
            return jnp.maximum(y, 0.0)

        h = jnp.maximum(acc_ref[...] + b1_ref[...], 0.0)   # (B, 512)
        h = dense_relu(h, w2_ref, b2_ref)                  # (B, 128)
        h = dense_relu(h, w3_ref, b3_ref)                  # (B, 128) [64 + zero pad]
        h = dense_relu(h, w4_ref, b4_ref)                  # (B, 128)
        h = dense_relu(h, w5_ref, b5_ref)                  # (B, 512)
        h_ref[...] = h.astype(h_ref.dtype)


def _decoder_out_kernel(h_ref, w6_ref, b6_ref, o_ref):
    """Layer 6 (512 -> padded 5120) tiled over N, fused sigmoid."""
    y = jnp.dot(h_ref[...].astype(jnp.bfloat16), w6_ref[...],
                preferred_element_type=jnp.float32) + b6_ref[...]
    # sigmoid via EUP exp + approximate reciprocal (stays off the VALU slot)
    o_ref[...] = pl.reciprocal(1.0 + jnp.exp(-y), approx=True).astype(o_ref.dtype)


def autoencoder_forward(x, params):
    (w1, b1), (w2, b2), (w3, b3), (w4, b4), (w5, b5), (w6, b6) = params
    B = x.shape[0]
    xp = jnp.pad(x, ((0, 0), (0, PAD_IN - IN_DIM)))

    kt = PAD_IN // TK
    h5 = pl.pallas_call(
        _encoder_kernel,
        out_shape=jax.ShapeDtypeStruct((B, H1), jnp.float32),
        grid=(kt,),
        in_specs=[
            pl.BlockSpec((B, TK), lambda k: (0, k)),        # x  (streamed over K)
            pl.BlockSpec((TK, H1), lambda k: (k, 0)),       # w1 (streamed over K)
            pl.BlockSpec((1, H1), lambda k: (0, 0)),        # b1
            pl.BlockSpec((H1, H2), lambda k: (0, 0)),       # w2 (resident)
            pl.BlockSpec((1, H2), lambda k: (0, 0)),        # b2
            pl.BlockSpec((H2, H3_PAD), lambda k: (0, 0)),   # w3 (resident)
            pl.BlockSpec((1, H3_PAD), lambda k: (0, 0)),    # b3
            pl.BlockSpec((H3_PAD, H2), lambda k: (0, 0)),   # w4 (resident)
            pl.BlockSpec((1, H2), lambda k: (0, 0)),        # b4
            pl.BlockSpec((H2, H1), lambda k: (0, 0)),       # w5 (resident)
            pl.BlockSpec((1, H1), lambda k: (0, 0)),        # b5
        ],
        out_specs=pl.BlockSpec((B, H1), lambda k: (0, 0)),
        scratch_shapes=[pltpu.VMEM((B, H1), jnp.float32)],
        compiler_params=pltpu.CompilerParams(
            dimension_semantics=("arbitrary",),
            vmem_limit_bytes=VMEM_LIMIT),
    )(xp, w1, b1, w2, b2, w3, b3, w4, b4, w5, b5)

    nt = PAD_IN // TN
    out_p = pl.pallas_call(
        _decoder_out_kernel,
        out_shape=jax.ShapeDtypeStruct((B, PAD_IN), jnp.float32),
        grid=(nt,),
        in_specs=[
            pl.BlockSpec((B, H1), lambda j: (0, 0)),        # h5 (resident)
            pl.BlockSpec((H1, TN), lambda j: (0, j)),       # w6 (streamed over N)
            pl.BlockSpec((1, TN), lambda j: (0, j)),        # b6
        ],
        out_specs=pl.BlockSpec((B, TN), lambda j: (0, j)),
        compiler_params=pltpu.CompilerParams(
            dimension_semantics=("parallel",),              # both TCs on v7x
            vmem_limit_bytes=VMEM_LIMIT),
    )(h5, w6, b6)

    return out_p[:, :IN_DIM]


# ---------------------------------------------------------------------------
# Parameter construction (PyTorch-default-style uniform init), then zero-pad
# ragged dims and cast weights to bf16 (f32 accumulation kept in the kernels).
# ---------------------------------------------------------------------------
def init_params(key):
    raw = []
    for fan_in, fan_out in LAYER_DIMS:
        key, kw, kb = jax.random.split(key, 3)
        bound = 1.0 / math.sqrt(fan_in)
        w = jax.random.uniform(kw, (fan_in, fan_out), jnp.float32, -bound, bound)
        b = jax.random.uniform(kb, (1, fan_out), jnp.float32, -bound, bound)
        raw.append((w, b))

    def pad_to(a, shape):
        return jnp.pad(a, [(0, t - s) for s, t in zip(a.shape, shape)])

    (w1, b1), (w2, b2), (w3, b3), (w4, b4), (w5, b5), (w6, b6) = raw
    w1 = pad_to(w1, (PAD_IN, H1))
    w3 = pad_to(w3, (H2, H3_PAD))
    b3 = pad_to(b3, (1, H3_PAD))
    w4 = pad_to(w4, (H3_PAD, H2))
    w6 = pad_to(w6, (H1, PAD_IN))
    b6 = pad_to(b6, (1, PAD_IN))
    padded = [(w1, b1), (w2, b2), (w3, b3), (w4, b4), (w5, b5), (w6, b6)]
    return [(w.astype(jnp.bfloat16), b) for w, b in padded]


if __name__ == "__main__":
    key = jax.random.PRNGKey(0)
    key, kx = jax.random.split(key)
    batch = 8
    x = jax.random.uniform(kx, (batch, IN_DIM), jnp.float32)
    params = init_params(key)

    fwd = jax.jit(autoencoder_forward)
    out = jax.block_until_ready(fwd(x, params))
    assert out.shape == (batch, IN_DIM), out.shape

    # Pure-JAX reference with matching numerics (bf16 matmul operands,
    # f32 accumulation, zero-padded ragged dims).
    h = jnp.pad(x, ((0, 0), (0, PAD_IN - IN_DIM)))
    acts = ["relu"] * 5 + ["sigmoid"]
    for (w, b), act in zip(params, acts):
        y = jnp.dot(h.astype(jnp.bfloat16), w,
                    preferred_element_type=jnp.float32) + b
        h = jnp.maximum(y, 0.0) if act == "relu" else jax.nn.sigmoid(y)
    ref = h[:, :IN_DIM]

    err = float(jnp.max(jnp.abs(out - ref)))
    # tolerance covers the approx-reciprocal sigmoid and K-tiled f32 reassociation
    assert err < 5e-3, err

    print("KERNEL_OK")
</pallas_src>

<mosaic_0001>
module attributes {stable_mosaic.version = 11 : i64} {
  func.func @_encoder_kernel(%arg0: i32, %arg1: memref<8x1280xf32, #tpu.memory_space<vmem>>, %arg2: memref<1280x512xbf16, #tpu.memory_space<vmem>>, %arg3: memref<1x512xf32, #tpu.memory_space<vmem>>, %arg4: memref<512x128xbf16, #tpu.memory_space<vmem>>, %arg5: memref<1x128xf32, #tpu.memory_space<vmem>>, %arg6: memref<128x128xbf16, #tpu.memory_space<vmem>>, %arg7: memref<1x128xf32, #tpu.memory_space<vmem>>, %arg8: memref<128x128xbf16, #tpu.memory_space<vmem>>, %arg9: memref<1x128xf32, #tpu.memory_space<vmem>>, %arg10: memref<128x512xbf16, #tpu.memory_space<vmem>>, %arg11: memref<1x512xf32, #tpu.memory_space<vmem>>, %arg12: memref<8x512xf32, #tpu.memory_space<vmem>>, %arg13: memref<8x512xf32, #tpu.memory_space<vmem>>) attributes {dimension_semantics = [#tpu.dimension_semantics<arbitrary>], iteration_bounds = array<i64: 4>, scalar_prefetch = 0 : i64, scratch_operands = 1 : i64, tpu.core_type = #tpu.core_type<tc>, window_params = [{transform_indices = @transform_0, window_bounds = array<i64: 8, 1280>}, {transform_indices = @transform_1, window_bounds = array<i64: 1280, 512>}, {pipeline_mode = #tpu.pipeline_mode<synchronous>, transform_indices = @transform_2, window_bounds = array<i64: 1, 512>}, {pipeline_mode = #tpu.pipeline_mode<synchronous>, transform_indices = @transform_3, window_bounds = array<i64: 512, 128>}, {pipeline_mode = #tpu.pipeline_mode<synchronous>, transform_indices = @transform_4, window_bounds = array<i64: 1, 128>}, {pipeline_mode = #tpu.pipeline_mode<synchronous>, transform_indices = @transform_5, window_bounds = array<i64: 128, 128>}, {pipeline_mode = #tpu.pipeline_mode<synchronous>, transform_indices = @transform_6, window_bounds = array<i64: 1, 128>}, {pipeline_mode = #tpu.pipeline_mode<synchronous>, transform_indices = @transform_7, window_bounds = array<i64: 128, 128>}, {pipeline_mode = #tpu.pipeline_mode<synchronous>, transform_indices = @transform_8, window_bounds = array<i64: 1, 128>}, {pipeline_mode = #tpu.pipeline_mode<synchronous>, transform_indices = @transform_9, window_bounds = array<i64: 128, 512>}, {pipeline_mode = #tpu.pipeline_mode<synchronous>, transform_indices = @transform_10, window_bounds = array<i64: 1, 512>}, {pipeline_mode = #tpu.pipeline_mode<synchronous>, transform_indices = @transform_11, window_bounds = array<i64: 8, 512>}]} {
    %c0_i32 = arith.constant 0 : i32
    %0 = arith.cmpi eq, %arg0, %c0_i32 : i32
    %1 = arith.extui %0 : i1 to i32
    %c0_i32_0 = arith.constant 0 : i32
    %2 = arith.cmpi ne, %1, %c0_i32_0 : i32
    scf.if %2 {
      %cst_9 = arith.constant 0.000000e+00 : f32
      %13 = vector.broadcast %cst_9 : f32 to vector<8x512xf32>
      %c0_10 = arith.constant 0 : index
      %c0_11 = arith.constant 0 : index
      %14 = vector.load %arg13[%c0_10, %c0_11] : memref<8x512xf32, #tpu.memory_space<vmem>>, vector<8x512xf32>
      tpu.vector_store %arg13[%c0_10, %c0_11], %13 {strides = array<i32>} : memref<8x512xf32, #tpu.memory_space<vmem>>, vector<8x512xf32>,
    } else {
    }
    %c0 = arith.constant 0 : index
    %c0_1 = arith.constant 0 : index
    %3 = vector.load %arg13[%c0, %c0_1] : memref<8x512xf32, #tpu.memory_space<vmem>>, vector<8x512xf32>
    %c0_2 = arith.constant 0 : index
    %c0_3 = arith.constant 0 : index
    %4 = vector.load %arg1[%c0_2, %c0_3] : memref<8x1280xf32, #tpu.memory_space<vmem>>, vector<8x1280xf32>
    %5 = arith.truncf %4 : vector<8x1280xf32> to vector<8x1280xbf16>
    %c0_4 = arith.constant 0 : index
    %c0_5 = arith.constant 0 : index
    %6 = vector.load %arg2[%c0_4, %c0_5] : memref<1280x512xbf16, #tpu.memory_space<vmem>>, vector<1280x512xbf16>
    %cst = arith.constant dense<0.000000e+00> : vector<8x512xf32>
    %7 = tpu.matmul %5, %6, %cst {dimension_numbers = #tpu.dot_dimension_numbers<[1], [0], [0], [1], [0, 0, 1, 1], [], []>} : vector<8x1280xbf16>, vector<1280x512xbf16>, vector<8x512xf32> -> vector<8x512xf32>
    %8 = arith.addf %3, %7 : vector<8x512xf32>
    %c0_6 = arith.constant 0 : index
    %c0_7 = arith.constant 0 : index
    %9 = vector.load %arg13[%c0_6, %c0_7] : memref<8x512xf32, #tpu.memory_space<vmem>>, vector<8x512xf32>
    tpu.vector_store %arg13[%c0_6, %c0_7], %8 {strides = array<i32>} : memref<8x512xf32, #tpu.memory_space<vmem>>, vector<8x512xf32>,
    %c3_i32 = arith.constant 3 : i32
    %10 = arith.cmpi eq, %arg0, %c3_i32 : i32
    %11 = arith.extui %10 : i1 to i32
    %c0_i32_8 = arith.constant 0 : i32
    %12 = arith.cmpi ne, %11, %c0_i32_8 : i32
    scf.if %12 {
      %c0_9 = arith.constant 0 : index
      %c0_10 = arith.constant 0 : index
      %13 = vector.load %arg13[%c0_9, %c0_10] : memref<8x512xf32, #tpu.memory_space<vmem>>, vector<8x512xf32>
      %c0_11 = arith.constant 0 : index
      %c0_12 = arith.constant 0 : index
      %14 = vector.load %arg3[%c0_11, %c0_12] : memref<1x512xf32, #tpu.memory_space<vmem>>, vector<1x512xf32>
      %15 = vector.broadcast %14 : vector<1x512xf32> to vector<8x512xf32>
      %16 = arith.addf %13, %15 : vector<8x512xf32>
      %cst_13 = arith.constant 0.000000e+00 : f32
      %17 = vector.broadcast %cst_13 : f32 to vector<8x512xf32>
      %18 = arith.maximumf %16, %17 : vector<8x512xf32>
      %19 = arith.truncf %18 : vector<8x512xf32> to vector<8x512xbf16>
      %c0_14 = arith.constant 0 : index
      %c0_15 = arith.constant 0 : index
      %20 = vector.load %arg4[%c0_14, %c0_15] : memref<512x128xbf16, #tpu.memory_space<vmem>>, vector<512x128xbf16>
      %cst_16 = arith.constant dense<0.000000e+00> : vector<8x128xf32>
      %21 = tpu.matmul %19, %20, %cst_16 {dimension_numbers = #tpu.dot_dimension_numbers<[1], [0], [0], [1], [0, 0, 1, 1], [], []>} : vector<8x512xbf16>, vector<512x128xbf16>, vector<8x128xf32> -> vector<8x128xf32>
      %c0_17 = arith.constant 0 : index
      %c0_18 = arith.constant 0 : index
      %22 = vector.load %arg5[%c0_17, %c0_18] : memref<1x128xf32, #tpu.memory_space<vmem>>, vector<1x128xf32>
      %23 = vector.broadcast %22 : vector<1x128xf32> to vector<8x128xf32>
      %24 = arith.addf %21, %23 : vector<8x128xf32>
      %cst_19 = arith.constant 0.000000e+00 : f32
      %25 = vector.broadcast %cst_19 : f32 to vector<8x128xf32>
      %26 = arith.maximumf %24, %25 : vector<8x128xf32>
      %27 = arith.truncf %26 : vector<8x128xf32> to vector<8x128xbf16>
      %c0_20 = arith.constant 0 : index
      %c0_21 = arith.constant 0 : index
      %28 = vector.load %arg6[%c0_20, %c0_21] : memref<128x128xbf16, #tpu.memory_space<vmem>>, vector<128x128xbf16>
      %cst_22 = arith.constant dense<0.000000e+00> : vector<8x128xf32>
      %29 = tpu.matmul %27, %28, %cst_22 {dimension_numbers = #tpu.dot_dimension_numbers<[1], [0], [0], [1], [0, 0, 1, 1], [], []>} : vector<8x128xbf16>, vector<128x128xbf16>, vector<8x128xf32> -> vector<8x128xf32>
      %c0_23 = arith.constant 0 : index
      %c0_24 = arith.constant 0 : index
      %30 = vector.load %arg7[%c0_23, %c0_24] : memref<1x128xf32, #tpu.memory_space<vmem>>, vector<1x128xf32>
      %31 = vector.broadcast %30 : vector<1x128xf32> to vector<8x128xf32>
      %32 = arith.addf %29, %31 : vector<8x128xf32>
      %cst_25 = arith.constant 0.000000e+00 : f32
      %33 = vector.broadcast %cst_25 : f32 to vector<8x128xf32>
      %34 = arith.maximumf %32, %33 : vector<8x128xf32>
      %35 = arith.truncf %34 : vector<8x128xf32> to vector<8x128xbf16>
      %c0_26 = arith.constant 0 : index
      %c0_27 = arith.constant 0 : index
      %36 = vector.load %arg8[%c0_26, %c0_27] : memref<128x128xbf16, #tpu.memory_space<vmem>>, vector<128x128xbf16>
      %cst_28 = arith.constant dense<0.000000e+00> : vector<8x128xf32>
      %37 = tpu.matmul %35, %36, %cst_28 {dimension_numbers = #tpu.dot_dimension_numbers<[1], [0], [0], [1], [0, 0, 1, 1], [], []>} : vector<8x128xbf16>, vector<128x128xbf16>, vector<8x128xf32> -> vector<8x128xf32>
      %c0_29 = arith.constant 0 : index
      %c0_30 = arith.constant 0 : index
      %38 = vector.load %arg9[%c0_29, %c0_30] : memref<1x128xf32, #tpu.memory_space<vmem>>, vector<1x128xf32>
      %39 = vector.broadcast %38 : vector<1x128xf32> to vector<8x128xf32>
      %40 = arith.addf %37, %39 : vector<8x128xf32>
      %cst_31 = arith.constant 0.000000e+00 : f32
      %41 = vector.broadcast %cst_31 : f32 to vector<8x128xf32>
      %42 = arith.maximumf %40, %41 : vector<8x128xf32>
      %43 = arith.truncf %42 : vector<8x128xf32> to vector<8x128xbf16>
      %c0_32 = arith.constant 0 : index
      %c0_33 = arith.constant 0 : index
      %44 = vector.load %arg10[%c0_32, %c0_33] : memref<128x512xbf16, #tpu.memory_space<vmem>>, vector<128x512xbf16>
      %cst_34 = arith.constant dense<0.000000e+00> : vector<8x512xf32>
      %45 = tpu.matmul %43, %44, %cst_34 {dimension_numbers = #tpu.dot_dimension_numbers<[1], [0], [0], [1], [0, 0, 1, 1], [], []>} : vector<8x128xbf16>, vector<128x512xbf16>, vector<8x512xf32> -> vector<8x512xf32>
      %c0_35 = arith.constant 0 : index
      %c0_36 = arith.constant 0 : index
      %46 = vector.load %arg11[%c0_35, %c0_36] : memref<1x512xf32, #tpu.memory_space<vmem>>, vector<1x512xf32>
      %47 = vector.broadcast %46 : vector<1x512xf32> to vector<8x512xf32>
      %48 = arith.addf %45, %47 : vector<8x512xf32>
      %cst_37 = arith.constant 0.000000e+00 : f32
      %49 = vector.broadcast %cst_37 : f32 to vector<8x512xf32>
      %50 = arith.maximumf %48, %49 : vector<8x512xf32>
      %c0_38 = arith.constant 0 : index
      %c0_39 = arith.constant 0 : index
      %51 = vector.load %arg12[%c0_38, %c0_39] : memref<8x512xf32, #tpu.memory_space<vmem>>, vector<8x512xf32>
      tpu.vector_store %arg12[%c0_38, %c0_39], %50 {strides = array<i32>} : memref<8x512xf32, #tpu.memory_space<vmem>>, vector<8x512xf32>,
    } else {
    }
    return
  }
  func.func @transform_0(%arg0: i32) -> (i32, i32) {
    %c0_i32 = arith.constant 0 : i32
    %c0_i32_0 = arith.constant 0 : i32
    return %c0_i32, %arg0 : i32, i32
  }
  func.func @transform_1(%arg0: i32) -> (i32, i32) {
    %c0_i32 = arith.constant 0 : i32
    %c0_i32_0 = arith.constant 0 : i32
    return %arg0, %c0_i32 : i32, i32
  }
  func.func @transform_2(%arg0: i32) -> (i32, i32) {
    %c0_i32 = arith.constant 0 : i32
    %c0_i32_0 = arith.constant 0 : i32
    %c0_i32_1 = arith.constant 0 : i32
    return %c0_i32, %c0_i32_0 : i32, i32
  }
  func.func @transform_3(%arg0: i32) -> (i32, i32) {
    %c0_i32 = arith.constant 0 : i32
    %c0_i32_0 = arith.constant 0 : i32
    %c0_i32_1 = arith.constant 0 : i32
    return %c0_i32, %c0_i32_0 : i32, i32
  }
  func.func @transform_4(%arg0: i32) -> (i32, i32) {
    %c0_i32 = arith.constant 0 : i32
    %c0_i32_0 = arith.constant 0 : i32
    %c0_i32_1 = arith.constant 0 : i32
    return %c0_i32, %c0_i32_0 : i32, i32
  }
  func.func @transform_5(%arg0: i32) -> (i32, i32) {
    %c0_i32 = arith.constant 0 : i32
    %c0_i32_0 = arith.constant 0 : i32
    %c0_i32_1 = arith.constant 0 : i32
    return %c0_i32, %c0_i32_0 : i32, i32
  }
  func.func @transform_6(%arg0: i32) -> (i32, i32) {
    %c0_i32 = arith.constant 0 : i32
    %c0_i32_0 = arith.constant 0 : i32
    %c0_i32_1 = arith.constant 0 : i32
    return %c0_i32, %c0_i32_0 : i32, i32
  }
  func.func @transform_7(%arg0: i32) -> (i32, i32) {
    %c0_i32 = arith.constant 0 : i32
    %c0_i32_0 = arith.constant 0 : i32
    %c0_i32_1 = arith.constant 0 : i32
    return %c0_i32, %c0_i32_0 : i32, i32
  }
  func.func @transform_8(%arg0: i32) -> (i32, i32) {
    %c0_i32 = arith.constant 0 : i32
    %c0_i32_0 = arith.constant 0 : i32
    %c0_i32_1 = arith.constant 0 : i32
    return %c0_i32, %c0_i32_0 : i32, i32
  }
  func.func @transform_9(%arg0: i32) -> (i32, i32) {
    %c0_i32 = arith.constant 0 : i32
    %c0_i32_0 = arith.constant 0 : i32
    %c0_i32_1 = arith.constant 0 : i32
    return %c0_i32, %c0_i32_0 : i32, i32
  }
  func.func @transform_10(%arg0: i32) -> (i32, i32) {
    %c0_i32 = arith.constant 0 : i32
    %c0_i32_0 = arith.constant 0 : i32
    %c0_i32_1 = arith.constant 0 : i32
    return %c0_i32, %c0_i32_0 : i32, i32
  }
  func.func @transform_11(%arg0: i32) -> (i32, i32) {
    %c0_i32 = arith.constant 0 : i32
    %c0_i32_0 = arith.constant 0 : i32
    %c0_i32_1 = arith.constant 0 : i32
    return %c0_i32, %c0_i32_0 : i32, i32
  }
}

module attributes {stable_mosaic.version = 11 : i64} {
  func.func @_decoder_out_kernel(%arg0: i32, %arg1: memref<8x512xf32, #tpu.memory_space<vmem>>, %arg2: memref<512x1280xbf16, #tpu.memory_space<vmem>>, %arg3: memref<1x1280xf32, #tpu.memory_space<vmem>>, %arg4: memref<8x1280xf32, #tpu.memory_space<vmem>>) attributes {dimension_semantics = [#tpu.dimension_semantics<parallel>], iteration_bounds = array<i64: 4>, scalar_prefetch = 0 : i64, scratch_operands = 0 : i64, tpu.core_type = #tpu.core_type<tc>, window_params = [{pipeline_mode = #tpu.pipeline_mode<synchronous>, transform_indices = @transform_0, window_bounds = array<i64: 8, 512>}, {transform_indices = @transform_1, window_bounds = array<i64: 512, 1280>}, {transform_indices = @transform_2, window_bounds = array<i64: 1, 1280>}, {transform_indices = @transform_3, window_bounds = array<i64: 8, 1280>}]} {
    %c0 = arith.constant 0 : index
    %c0_0 = arith.constant 0 : index
    %0 = vector.load %arg1[%c0, %c0_0] : memref<8x512xf32, #tpu.memory_space<vmem>>, vector<8x512xf32>
    %1 = arith.truncf %0 : vector<8x512xf32> to vector<8x512xbf16>
    %c0_1 = arith.constant 0 : index
    %c0_2 = arith.constant 0 : index
    %2 = vector.load %arg2[%c0_1, %c0_2] : memref<512x1280xbf16, #tpu.memory_space<vmem>>, vector<512x1280xbf16>
    %cst = arith.constant dense<0.000000e+00> : vector<8x1280xf32>
    %3 = tpu.matmul %1, %2, %cst {dimension_numbers = #tpu.dot_dimension_numbers<[1], [0], [0], [1], [0, 0, 1, 1], [], []>} : vector<8x512xbf16>, vector<512x1280xbf16>, vector<8x1280xf32> -> vector<8x1280xf32>
    %c0_3 = arith.constant 0 : index
    %c0_4 = arith.constant 0 : index
    %4 = vector.load %arg3[%c0_3, %c0_4] : memref<1x1280xf32, #tpu.memory_space<vmem>>, vector<1x1280xf32>
    %5 = vector.broadcast %4 : vector<1x1280xf32> to vector<8x1280xf32>
    %6 = arith.addf %3, %5 : vector<8x1280xf32>
    %cst_5 = arith.constant 0.000000e+00 : f32
    %7 = vector.broadcast %cst_5 : f32 to vector<8x1280xf32>
    %8 = arith.subf %7, %6 : vector<8x1280xf32>
    %9 = math.exp %8 : vector<8x1280xf32>
    %cst_6 = arith.constant 1.000000e+00 : f32
    %10 = vector.broadcast %cst_6 : f32 to vector<8x1280xf32>
    %11 = arith.addf %10, %9 : vector<8x1280xf32>
    %12 = tpu.reciprocal %11 {approx = true} : vector<8x1280xf32> -> vector<8x1280xf32>
    %c0_7 = arith.constant 0 : index
    %c0_8 = arith.constant 0 : index
    %13 = vector.load %arg4[%c0_7, %c0_8] : memref<8x1280xf32, #tpu.memory_space<vmem>>, vector<8x1280xf32>
    tpu.vector_store %arg4[%c0_7, %c0_8], %12 {strides = array<i32>} : memref<8x1280xf32, #tpu.memory_space<vmem>>, vector<8x1280xf32>,
    return
  }
  func.func @transform_0(%arg0: i32) -> (i32, i32) {
    %c0_i32 = arith.constant 0 : i32
    %c0_i32_0 = arith.constant 0 : i32
    %c0_i32_1 = arith.constant 0 : i32
    return %c0_i32, %c0_i32_0 : i32, i32
  }
  func.func @transform_1(%arg0: i32) -> (i32, i32) {
    %c0_i32 = arith.constant 0 : i32
    %c0_i32_0 = arith.constant 0 : i32
    return %c0_i32, %arg0 : i32, i32
  }
  func.func @transform_2(%arg0: i32) -> (i32, i32) {
    %c0_i32 = arith.constant 0 : i32
    %c0_i32_0 = arith.constant 0 : i32
    return %c0_i32, %arg0 : i32, i32
  }
  func.func @transform_3(%arg0: i32) -> (i32, i32) {
    %c0_i32 = arith.constant 0 : i32
    %c0_i32_0 = arith.constant 0 : i32
    return %c0_i32, %arg0 : i32, i32
  }
}

</mosaic_0001>

<bundles_post_ra>
// kernel: autoencoder_forward.3
= control target key start
LH: loop header
LB: loop body
LE: loop exit
PB: predicated region body
PF: predicated region fallthrough
CT: control target
= control target key end

     0   :  { %8 = vsyncpa [#allocation4], 0  ;;  %s5556_s0 = inlined_call_operand.vmem [shape: f32[8,512], index: 0, kind: input, shape index: {}]   ;;  %s5557_s1 = inlined_call_operand.vmem [shape: bf16[512,5120], index: 1, kind: input, shape index: {}]   ;;  %s5558_s2 = inlined_call_operand.vmem [shape: f32[1,5120], index: 2, kind: input, shape index: {}]   ;;  %s5559_s3 = inlined_call_operand.hbm [shape: f32[8,5120], index: 3, kind: output, shape index: {}]  }
   0x1   :  { %10 = vsyncpa [#allocation4 + $0x1], 0  ;;  %s4394_s12 = smov 0   ;;  %s4396_s13 = smov 0  }
   0x2   :  { %s4398_s14 = smov 0   ;;  %s4400_s15 = smov 0  }
   0x3 LB: > { %s4415_s16 = sadd.s32 4294967295, %s4371_s15   ;;  %s3389_s17 = sadd.s32 4294967294, %s4371_s15   ;;  %s4371_s15 = sphi %s4400_s15, %s5565_s15   ;;  %s4367_s14 = sphi %s4398_s14, %s5564_s14   ;;  %s4363_s13 = sphi %s4396_s13, %s5563_s13   ;;  %s4359_s12 = sphi %s4394_s12, %s5562_s12  }
   0x4   : > { %s4419_s18 = sadd.s32 1, %s4371_s15   ;;  %s44_s19 = sadd.s32 1, %s4367_s14 }
   0x5   : > { %s41_s20 = ssub.s32 %s4371_s15, %s4419_s18  ;;  %p51_p0 = scmp.ne.s32.totalorder %s4367_s14, %s4363_s13 }
   0x6   : > { %p42_p1 = scmp.eq.s32.totalorder %s41_s20, 0  ;;  %p52_p2 = scmp.eq.s32.totalorder %s4371_s15, 0 }
   0x7   : > { %p107_p3 = scmp.eq.s32.totalorder %s4415_s16, 3  ;;  %p112_p4 = scmp.ne.s32.totalorder %s4363_s13, %s4359_s12 }
   0x8   : > { %s4431_s21 = scalar_select %p42_p1, %s4367_s14, %s44_s19  }
   0x9   : > { %p53_p5 = por %p52_p2, %p51_p0  ;;  %p4433_p6 = por %p107_p3, %p51_p0 }
   0xa   : > { %p113_p7 = scmp.eq.s32.totalorder %s3389_s17, 3  ;;  %p3391_p9 = scmp.ge.s32.totalorder %s4371_s15, 4 }
   0xc   : > { %p4437_p8 = por %p113_p7, %p112_p4  ;;  %132 = sbr.rel (%p3391_p9) target bundleno = 184 (0xb8), region = 20 }
  0x13   : > { %135 = sbr.rel (!%p53_p5) target bundleno = 184 (0xb8), region = 24  ;;  %s137_s24 = sand.u32 (%p53_p5), 1, %s4367_s14  }
  0x14   : > { %s3717_s25 = smul.u32 (%p53_p5), 40, %s4371_s15 }
  0x15   : > { %s3747_s26 = smul.u32 (%p53_p5), 2560, %s137_s24 }
  0x16   : > { %s4447_s29 = scalar_lea.vmem (%p53_p5), %s5557_s1, %s3717_s25 }
  0x17   : > { %v155_v0 = vld [vmem:[%s4447_s29] sm:$0xff] (%p53_p5)  ;;  %v157_v1 = vld [vmem:[%s4447_s29 + $0x8] sm:$0xff] (%p53_p5)  ;;  %v159_v2 = vld [vmem:[%s4447_s29 + $0x10] sm:$0xff] (%p53_p5)  ;;  %s4452_s30 = scalar_lea.vmem (%p53_p5), [#allocation2], %s3747_s26 }
  0x18   : > { %156 = vst [vmem:[%s4452_s30] sm:$0xff] (%p53_p5), %v155_v0  ;;  %158 = vst [vmem:[%s4452_s30 + $0x8] sm:$0xff] (%p53_p5), %v157_v1  ;;  %v161_v3 = vld [vmem:[%s4447_s29 + $0x18] sm:$0xff] (%p53_p5)  ;;  %v163_v4 = vld [vmem:[%s4447_s29 + $0x20] sm:$0xff] (%p53_p5) }
  0x19   : > { %160 = vst [vmem:[%s4452_s30 + $0x10] sm:$0xff] (%p53_p5), %v159_v2  ;;  %v165_v5 = vld [vmem:[%s4447_s29 + $0xa0] sm:$0xff] (%p53_p5)  ;;  %162 = vst [vmem:[%s4452_s30 + $0x18] sm:$0xff] (%p53_p5), %v161_v3  ;;  %v167_v6 = vld [vmem:[%s4447_s29 + $0xa8] sm:$0xff] (%p53_p5) }
  0x1a   : > { %164 = vst [vmem:[%s4452_s30 + $0x20] sm:$0xff] %v163_v4  ;;  %166 = vst [vmem:[%s4452_s30 + $0x28] sm:$0xff] %v165_v5  ;;  %v169_v7 = vld [vmem:[%s4447_s29 + $0xb0] sm:$0xff]  ;;  %v171_v8 = vld [vmem:[%s4447_s29 + $0xb8] sm:$0xff] }
  0x1b   : > { %168 = vst [vmem:[%s4452_s30 + $0x30] sm:$0xff] %v167_v6  ;;  %170 = vst [vmem:[%s4452_s30 + $0x38] sm:$0xff] %v169_v7  ;;  %v173_v9 = vld [vmem:[%s4447_s29 + $0xc0] sm:$0xff]  ;;  %v177_v11 = vld [vmem:[%s4447_s29 + $0x148] sm:$0xff] }
  0x1c   : > { %172 = vst [vmem:[%s4452_s30 + $0x40] sm:$0xff] %v171_v8  ;;  %v175_v10 = vld [vmem:[%s4447_s29 + $0x140] sm:$0xff]  ;;  %174 = vst [vmem:[%s4452_s30 + $0x48] sm:$0xff] %v173_v9  ;;  %v179_v12 = vld [vmem:[%s4447_s29 + $0x150] sm:$0xff] }
  0x1d   : > { %176 = vst [vmem:[%s4452_s30 + $0x50] sm:$0xff] %v175_v10  ;;  %178 = vst [vmem:[%s4452_s30 + $0x58] sm:$0xff] %v177_v11  ;;  %v181_v13 = vld [vmem:[%s4447_s29 + $0x158] sm:$0xff]  ;;  %v183_v14 = vld [vmem:[%s4447_s29 + $0x160] sm:$0xff] }
  0x1e   : > { %180 = vst [vmem:[%s4452_s30 + $0x60] sm:$0xff] %v179_v12  ;;  %182 = vst [vmem:[%s4452_s30 + $0x68] sm:$0xff] %v181_v13  ;;  %v185_v15 = vld [vmem:[%s4447_s29 + $0x1e0] sm:$0xff]  ;;  %v187_v16 = vld [vmem:[%s4447_s29 + $0x1e8] sm:$0xff] }
  0x1f   : > { %184 = vst [vmem:[%s4452_s30 + $0x70] sm:$0xff] %v183_v14  ;;  %v189_v17 = vld [vmem:[%s4447_s29 + $0x1f0] sm:$0xff]  ;;  %186 = vst [vmem:[%s4452_s30 + $0x78] sm:$0xff] %v185_v15  ;;  %v191_v18 = vld [vmem:[%s4447_s29 + $0x1f8] sm:$0xff] }
  0x20   : > { %188 = vst [vmem:[%s4452_s30 + $0x80] sm:$0xff] %v187_v16  ;;  %190 = vst [vmem:[%s4452_s30 + $0x88] sm:$0xff] %v189_v17  ;;  %v193_v19 = vld [vmem:[%s4447_s29 + $0x200] sm:$0xff]  ;;  %v197_v21 = vld [vmem:[%s4447_s29 + $0x288] sm:$0xff] }
  0x21   : > { %v195_v20 = vld [vmem:[%s4447_s29 + $0x280] sm:$0xff]  ;;  %192 = vst [vmem:[%s4452_s30 + $0x90] sm:$0xff] %v191_v18  ;;  %194 = vst [vmem:[%s4452_s30 + $0x98] sm:$0xff] %v193_v19  ;;  %v199_v22 = vld [vmem:[%s4447_s29 + $0x290] sm:$0xff] }
  0x22   : > { %196 = vst [vmem:[%s4452_s30 + $0xa0] sm:$0xff] %v195_v20  ;;  %v201_v23 = vld [vmem:[%s4447_s29 + $0x298] sm:$0xff]  ;;  %198 = vst [vmem:[%s4452_s30 + $0xa8] sm:$0xff] %v197_v21  ;;  %v203_v24 = vld [vmem:[%s4447_s29 + $0x2a0] sm:$0xff] }
  0x23   : > { %200 = vst [vmem:[%s4452_s30 + $0xb0] sm:$0xff] %v199_v22  ;;  %202 = vst [vmem:[%s4452_s30 + $0xb8] sm:$0xff] %v201_v23  ;;  %v205_v25 = vld [vmem:[%s4447_s29 + $0x320] sm:$0xff]  ;;  %v207_v26 = vld [vmem:[%s4447_s29 + $0x328] sm:$0xff] }
  0x24   : > { %204 = vst [vmem:[%s4452_s30 + $0xc0] sm:$0xff] %v203_v24  ;;  %206 = vst [vmem:[%s4452_s30 + $0xc8] sm:$0xff] %v205_v25  ;;  %v209_v27 = vld [vmem:[%s4447_s29 + $0x330] sm:$0xff]  ;;  %v211_v28 = vld [vmem:[%s4447_s29 + $0x338] sm:$0xff] }
  0x25   : > { %208 = vst [vmem:[%s4452_s30 + $0xd0] sm:$0xff] %v207_v26  ;;  %v213_v29 = vld [vmem:[%s4447_s29 + $0x340] sm:$0xff]  ;;  %210 = vst [vmem:[%s4452_s30 + $0xd8] sm:$0xff] %v209_v27  ;;  %v217_v31 = vld [vmem:[%s4447_s29 + $0x3c8] sm:$0xff] }
  0x26   : > { %212 = vst [vmem:[%s4452_s30 + $0xe0] sm:$0xff] %v211_v28  ;;  %214 = vst [vmem:[%s4452_s30 + $0xe8] sm:$0xff] %v213_v29  ;;  %v215_v30 = vld [vmem:[%s4447_s29 + $0x3c0] sm:$0xff]  ;;  %v219_v32 = vld [vmem:[%s4447_s29 + $0x3d0] sm:$0xff] }
  0x27   : > { %216 = vst [vmem:[%s4452_s30 + $0xf0] sm:$0xff] %v215_v30  ;;  %218 = vst [vmem:[%s4452_s30 + $0xf8] sm:$0xff] %v217_v31  ;;  %v221_v33 = vld [vmem:[%s4447_s29 + $0x3d8] sm:$0xff]  ;;  %v223_v34 = vld [vmem:[%s4447_s29 + $0x3e0] sm:$0xff] }
  0x28   : > { %220 = vst [vmem:[%s4452_s30 + $0x100] sm:$0xff] %v219_v32  ;;  %v225_v35 = vld [vmem:[%s4447_s29 + $0x460] sm:$0xff]  ;;  %222 = vst [vmem:[%s4452_s30 + $0x108] sm:$0xff] %v221_v33  ;;  %v227_v36 = vld [vmem:[%s4447_s29 + $0x468] sm:$0xff] }
  0x29   : > { %224 = vst [vmem:[%s4452_s30 + $0x110] sm:$0xff] %v223_v34  ;;  %226 = vst [vmem:[%s4452_s30 + $0x118] sm:$0xff] %v225_v35  ;;  %v229_v37 = vld [vmem:[%s4447_s29 + $0x470] sm:$0xff]  ;;  %v231_v38 = vld [vmem:[%s4447_s29 + $0x478] sm:$0xff] }
  0x2a   : > { %228 = vst [vmem:[%s4452_s30 + $0x120] sm:$0xff] %v227_v36  ;;  %230 = vst [vmem:[%s4452_s30 + $0x128] sm:$0xff] %v229_v37  ;;  %v233_v39 = vld [vmem:[%s4447_s29 + $0x480] sm:$0xff]  ;;  %v237_v41 = vld [vmem:[%s4447_s29 + $0x508] sm:$0xff] }
  0x2b   : > { %232 = vst [vmem:[%s4452_s30 + $0x130] sm:$0xff] %v231_v38  ;;  %v235_v40 = vld [vmem:[%s4447_s29 + $0x500] sm:$0xff]  ;;  %234 = vst [vmem:[%s4452_s30 + $0x138] sm:$0xff] %v233_v39  ;;  %v239_v42 = vld [vmem:[%s4447_s29 + $0x510] sm:$0xff] }
  0x2c   : > { %236 = vst [vmem:[%s4452_s30 + $0x140] sm:$0xff] %v235_v40  ;;  %238 = vst [vmem:[%s4452_s30 + $0x148] sm:$0xff] %v237_v41  ;;  %v241_v43 = vld [vmem:[%s4447_s29 + $0x518] sm:$0xff]  ;;  %v243_v44 = vld [vmem:[%s4447_s29 + $0x520] sm:$0xff] }
  0x2d   : > { %240 = vst [vmem:[%s4452_s30 + $0x150] sm:$0xff] %v239_v42  ;;  %242 = vst [vmem:[%s4452_s30 + $0x158] sm:$0xff] %v241_v43  ;;  %v245_v45 = vld [vmem:[%s4447_s29 + $0x5a0] sm:$0xff]  ;;  %v247_v46 = vld [vmem:[%s4447_s29 + $0x5a8] sm:$0xff] }
  0x2e   : > { %244 = vst [vmem:[%s4452_s30 + $0x160] sm:$0xff] %v243_v44  ;;  %v249_v47 = vld [vmem:[%s4447_s29 + $0x5b0] sm:$0xff]  ;;  %246 = vst [vmem:[%s4452_s30 + $0x168] sm:$0xff] %v245_v45  ;;  %v251_v48 = vld [vmem:[%s4447_s29 + $0x5b8] sm:$0xff] }
  0x2f   : > { %248 = vst [vmem:[%s4452_s30 + $0x170] sm:$0xff] %v247_v46  ;;  %250 = vst [vmem:[%s4452_s30 + $0x178] sm:$0xff] %v249_v47  ;;  %v253_v49 = vld [vmem:[%s4447_s29 + $0x5c0] sm:$0xff]  ;;  %v257_v51 = vld [vmem:[%s4447_s29 + $0x648] sm:$0xff] }
  0x30   : > { %v255_v50 = vld [vmem:[%s4447_s29 + $0x640] sm:$0xff]  ;;  %252 = vst [vmem:[%s4452_s30 + $0x180] sm:$0xff] %v251_v48  ;;  %254 = vst [vmem:[%s4452_s30 + $0x188] sm:$0xff] %v253_v49  ;;  %v259_v52 = vld [vmem:[%s4447_s29 + $0x650] sm:$0xff] }
  0x31   : > { %256 = vst [vmem:[%s4452_s30 + $0x190] sm:$0xff] %v255_v50  ;;  %v261_v53 = vld [vmem:[%s4447_s29 + $0x658] sm:$0xff]  ;;  %258 = vst [vmem:[%s4452_s30 + $0x198] sm:$0xff] %v257_v51  ;;  %v263_v54 = vld [vmem:[%s4447_s29 + $0x660] sm:$0xff] }
  0x32   : > { %260 = vst [vmem:[%s4452_s30 + $0x1a0] sm:$0xff] %v259_v52  ;;  %262 = vst [vmem:[%s4452_s30 + $0x1a8] sm:$0xff] %v261_v53  ;;  %v265_v55 = vld [vmem:[%s4447_s29 + $0x6e0] sm:$0xff]  ;;  %v267_v56 = vld [vmem:[%s4447_s29 + $0x6e8] sm:$0xff] }
  0x33   : > { %264 = vst [vmem:[%s4452_s30 + $0x1b0] sm:$0xff] %v263_v54  ;;  %266 = vst [vmem:[%s4452_s30 + $0x1b8] sm:$0xff] %v265_v55  ;;  %v269_v57 = vld [vmem:[%s4447_s29 + $0x6f0] sm:$0xff]  ;;  %v271_v58 = vld [vmem:[%s4447_s29 + $0x6f8] sm:$0xff] }
  0x34   : > { %268 = vst [vmem:[%s4452_s30 + $0x1c0] sm:$0xff] %v267_v56  ;;  %v273_v59 = vld [vmem:[%s4447_s29 + $0x700] sm:$0xff]  ;;  %270 = vst [vmem:[%s4452_s30 + $0x1c8] sm:$0xff] %v269_v57  ;;  %v277_v61 = vld [vmem:[%s4447_s29 + $0x788] sm:$0xff] }
  0x35   : > { %272 = vst [vmem:[%s4452_s30 + $0x1d0] sm:$0xff] %v271_v58  ;;  %274 = vst [vmem:[%s4452_s30 + $0x1d8] sm:$0xff] %v273_v59  ;;  %v275_v60 = vld [vmem:[%s4447_s29 + $0x780] sm:$0xff]  ;;  %v279_v62 = vld [vmem:[%s4447_s29 + $0x790] sm:$0xff] }
  0x36   : > { %276 = vst [vmem:[%s4452_s30 + $0x1e0] sm:$0xff] %v275_v60  ;;  %278 = vst [vmem:[%s4452_s30 + $0x1e8] sm:$0xff] %v277_v61  ;;  %v281_v63 = vld [vmem:[%s4447_s29 + $0x798] sm:$0xff]  ;;  %v283_v0 = vld [vmem:[%s4447_s29 + $0x7a0] sm:$0xff] }
  0x37   : > { %280 = vst [vmem:[%s4452_s30 + $0x1f0] sm:$0xff] %v279_v62  ;;  %v285_v1 = vld [vmem:[%s4447_s29 + $0x820] sm:$0xff]  ;;  %282 = vst [vmem:[%s4452_s30 + $0x1f8] sm:$0xff] %v281_v63  ;;  %v287_v2 = vld [vmem:[%s4447_s29 + $0x828] sm:$0xff] }
  0x38   : > { %284 = vst [vmem:[%s4452_s30 + $0x200] sm:$0xff] %v283_v0  ;;  %286 = vst [vmem:[%s4452_s30 + $0x208] sm:$0xff] %v285_v1  ;;  %v289_v3 = vld [vmem:[%s4447_s29 + $0x830] sm:$0xff]  ;;  %v291_v4 = vld [vmem:[%s4447_s29 + $0x838] sm:$0xff] }
  0x39   : > { %288 = vst [vmem:[%s4452_s30 + $0x210] sm:$0xff] %v287_v2  ;;  %290 = vst [vmem:[%s4452_s30 + $0x218] sm:$0xff] %v289_v3  ;;  %v293_v5 = vld [vmem:[%s4447_s29 + $0x840] sm:$0xff]  ;;  %v297_v7 = vld [vmem:[%s4447_s29 + $0x8c8] sm:$0xff] }
  0x3a   : > { %292 = vst [vmem:[%s4452_s30 + $0x220] sm:$0xff] %v291_v4  ;;  %v295_v6 = vld [vmem:[%s4447_s29 + $0x8c0] sm:$0xff]  ;;  %294 = vst [vmem:[%s4452_s30 + $0x228] sm:$0xff] %v293_v5  ;;  %v299_v8 = vld [vmem:[%s4447_s29 + $0x8d0] sm:$0xff] }
  0x3b   : > { %296 = vst [vmem:[%s4452_s30 + $0x230] sm:$0xff] %v295_v6  ;;  %298 = vst [vmem:[%s4452_s30 + $0x238] sm:$0xff] %v297_v7  ;;  %v301_v9 = vld [vmem:[%s4447_s29 + $0x8d8] sm:$0xff]  ;;  %v303_v10 = vld [vmem:[%s4447_s29 + $0x8e0] sm:$0xff] }
  0x3c   : > { %300 = vst [vmem:[%s4452_s30 + $0x240] sm:$0xff] %v299_v8  ;;  %302 = vst [vmem:[%s4452_s30 + $0x248] sm:$0xff] %v301_v9  ;;  %v305_v11 = vld [vmem:[%s4447_s29 + $0x960] sm:$0xff]  ;;  %v307_v12 = vld [vmem:[%s4447_s29 + $0x968] sm:$0xff] }
  0x3d   : > { %304 = vst [vmem:[%s4452_s30 + $0x250] sm:$0xff] %v303_v10  ;;  %v309_v13 = vld [vmem:[%s4447_s29 + $0x970] sm:$0xff]  ;;  %306 = vst [vmem:[%s4452_s30 + $0x258] sm:$0xff] %v305_v11  ;;  %v311_v14 = vld [vmem:[%s4447_s29 + $0x978] sm:$0xff] }
  0x3e   : > { %308 = vst [vmem:[%s4452_s30 + $0x260] sm:$0xff] %v307_v12  ;;  %310 = vst [vmem:[%s4452_s30 + $0x268] sm:$0xff] %v309_v13  ;;  %v313_v15 = vld [vmem:[%s4447_s29 + $0x980] sm:$0xff]  ;;  %v317_v17 = vld [vmem:[%s4447_s29 + $0xa08] sm:$0xff] }
  0x3f   : > { %v315_v16 = vld [vmem:[%s4447_s29 + $0xa00] sm:$0xff]  ;;  %312 = vst [vmem:[%s4452_s30 + $0x270] sm:$0xff] %v311_v14  ;;  %314 = vst [vmem:[%s4452_s30 + $0x278] sm:$0xff] %v313_v15  ;;  %v319_v18 = vld [vmem:[%s4447_s29 + $0xa10] sm:$0xff] }
  0x40   : > { %316 = vst [vmem:[%s4452_s30 + $0x280] sm:$0xff] %v315_v16  ;;  %v321_v19 = vld [vmem:[%s4447_s29 + $0xa18] sm:$0xff]  ;;  %318 = vst [vmem:[%s4452_s30 + $0x288] sm:$0xff] %v317_v17  ;;  %v323_v20 = vld [vmem:[%s4447_s29 + $0xa20] sm:$0xff] }
  0x41   : > { %320 = vst [vmem:[%s4452_s30 + $0x290] sm:$0xff] %v319_v18  ;;  %322 = vst [vmem:[%s4452_s30 + $0x298] sm:$0xff] %v321_v19  ;;  %v325_v21 = vld [vmem:[%s4447_s29 + $0xaa0] sm:$0xff]  ;;  %v327_v22 = vld [vmem:[%s4447_s29 + $0xaa8] sm:$0xff] }
  0x42   : > { %324 = vst [vmem:[%s4452_s30 + $0x2a0] sm:$0xff] %v323_v20  ;;  %326 = vst [vmem:[%s4452_s30 + $0x2a8] sm:$0xff] %v325_v21  ;;  %v329_v23 = vld [vmem:[%s4447_s29 + $0xab0] sm:$0xff]  ;;  %v331_v24 = vld [vmem:[%s4447_s29 + $0xab8] sm:$0xff] }
  0x43   : > { %328 = vst [vmem:[%s4452_s30 + $0x2b0] sm:$0xff] %v327_v22  ;;  %v333_v25 = vld [vmem:[%s4447_s29 + $0xac0] sm:$0xff]  ;;  %330 = vst [vmem:[%s4452_s30 + $0x2b8] sm:$0xff] %v329_v23  ;;  %v337_v27 = vld [vmem:[%s4447_s29 + $0xb48] sm:$0xff] }
  0x44   : > { %332 = vst [vmem:[%s4452_s30 + $0x2c0] sm:$0xff] %v331_v24  ;;  %334 = vst [vmem:[%s4452_s30 + $0x2c8] sm:$0xff] %v333_v25  ;;  %v335_v26 = vld [vmem:[%s4447_s29 + $0xb40] sm:$0xff]  ;;  %v339_v28 = vld [vmem:[%s4447_s29 + $0xb50] sm:$0xff] }
  0x45   : > { %336 = vst [vmem:[%s4452_s30 + $0x2d0] sm:$0xff] %v335_v26  ;;  %338 = vst [vmem:[%s4452_s30 + $0x2d8] sm:$0xff] %v337_v27  ;;  %v341_v29 = vld [vmem:[%s4447_s29 + $0xb58] sm:$0xff]  ;;  %v343_v30 = vld [vmem:[%s4447_s29 + $0xb60] sm:$0xff] }
  0x46   : > { %340 = vst [vmem:[%s4452_s30 + $0x2e0] sm:$0xff] %v339_v28  ;;  %v345_v31 = vld [vmem:[%s4447_s29 + $0xbe0] sm:$0xff]  ;;  %342 = vst [vmem:[%s4452_s30 + $0x2e8] sm:$0xff] %v341_v29  ;;  %v347_v32 = vld [vmem:[%s4447_s29 + $0xbe8] sm:$0xff] }
  0x47   : > { %344 = vst [vmem:[%s4452_s30 + $0x2f0] sm:$0xff] %v343_v30  ;;  %346 = vst [vmem:[%s4452_s30 + $0x2f8] sm:$0xff] %v345_v31  ;;  %v349_v33 = vld [vmem:[%s4447_s29 + $0xbf0] sm:$0xff]  ;;  %v351_v34 = vld [vmem:[%s4447_s29 + $0xbf8] sm:$0xff] }
  0x48   : > { %348 = vst [vmem:[%s4452_s30 + $0x300] sm:$0xff] %v347_v32  ;;  %350 = vst [vmem:[%s4452_s30 + $0x308] sm:$0xff] %v349_v33  ;;  %v353_v35 = vld [vmem:[%s4447_s29 + $0xc00] sm:$0xff]  ;;  %v357_v37 = vld [vmem:[%s4447_s29 + $0xc88] sm:$0xff] }
  0x49   : > { %352 = vst [vmem:[%s4452_s30 + $0x310] sm:$0xff] %v351_v34  ;;  %v355_v36 = vld [vmem:[%s4447_s29 + $0xc80] sm:$0xff]  ;;  %354 = vst [vmem:[%s4452_s30 + $0x318] sm:$0xff] %v353_v35  ;;  %v359_v38 = vld [vmem:[%s4447_s29 + $0xc90] sm:$0xff] }
  0x4a   : > { %356 = vst [vmem:[%s4452_s30 + $0x320] sm:$0xff] %v355_v36  ;;  %358 = vst [vmem:[%s4452_s30 + $0x328] sm:$0xff] %v357_v37  ;;  %v361_v39 = vld [vmem:[%s4447_s29 + $0xc98] sm:$0xff]  ;;  %v363_v40 = vld [vmem:[%s4447_s29 + $0xca0] sm:$0xff] }
  0x4b   : > { %360 = vst [vmem:[%s4452_s30 + $0x330] sm:$0xff] %v359_v38  ;;  %362 = vst [vmem:[%s4452_s30 + $0x338] sm:$0xff] %v361_v39  ;;  %v365_v41 = vld [vmem:[%s4447_s29 + $0xd20] sm:$0xff]  ;;  %v367_v42 = vld [vmem:[%s4447_s29 + $0xd28] sm:$0xff] }
  0x4c   : > { %364 = vst [vmem:[%s4452_s30 + $0x340] sm:$0xff] %v363_v40  ;;  %v369_v43 = vld [vmem:[%s4447_s29 + $0xd30] sm:$0xff]  ;;  %366 = vst [vmem:[%s4452_s30 + $0x348] sm:$0xff] %v365_v41  ;;  %v371_v44 = vld [vmem:[%s4447_s29 + $0xd38] sm:$0xff] }
  0x4d   : > { %368 = vst [vmem:[%s4452_s30 + $0x350] sm:$0xff] %v367_v42  ;;  %370 = vst [vmem:[%s4452_s30 + $0x358] sm:$0xff] %v369_v43  ;;  %v373_v45 = vld [vmem:[%s4447_s29 + $0xd40] sm:$0xff]  ;;  %v377_v47 = vld [vmem:[%s4447_s29 + $0xdc8] sm:$0xff] }
  0x4e   : > { %v375_v46 = vld [vmem:[%s4447_s29 + $0xdc0] sm:$0xff]  ;;  %372 = vst [vmem:[%s4452_s30 + $0x360] sm:$0xff] %v371_v44  ;;  %374 = vst [vmem:[%s4452_s30 + $0x368] sm:$0xff] %v373_v45  ;;  %v379_v48 = vld [vmem:[%s4447_s29 + $0xdd0] sm:$0xff] }
  0x4f   : > { %376 = vst [vmem:[%s4452_s30 + $0x370] sm:$0xff] %v375_v46  ;;  %v381_v49 = vld [vmem:[%s4447_s29 + $0xdd8] sm:$0xff]  ;;  %378 = vst [vmem:[%s4452_s30 + $0x378] sm:$0xff] %v377_v47  ;;  %v383_v50 = vld [vmem:[%s4447_s29 + $0xde0] sm:$0xff] }
  0x50   : > { %380 = vst [vmem:[%s4452_s30 + $0x380] sm:$0xff] %v379_v48  ;;  %382 = vst [vmem:[%s4452_s30 + $0x388] sm:$0xff] %v381_v49  ;;  %v385_v51 = vld [vmem:[%s4447_s29 + $0xe60] sm:$0xff]  ;;  %v387_v52 = vld [vmem:[%s4447_s29 + $0xe68] sm:$0xff] }
  0x51   : > { %384 = vst [vmem:[%s4452_s30 + $0x390] sm:$0xff] %v383_v50  ;;  %386 = vst [vmem:[%s4452_s30 + $0x398] sm:$0xff] %v385_v51  ;;  %v389_v53 = vld [vmem:[%s4447_s29 + $0xe70] sm:$0xff]  ;;  %v391_v54 = vld [vmem:[%s4447_s29 + $0xe78] sm:$0xff] }
  0x52   : > { %388 = vst [vmem:[%s4452_s30 + $0x3a0] sm:$0xff] %v387_v52  ;;  %v393_v55 = vld [vmem:[%s4447_s29 + $0xe80] sm:$0xff]  ;;  %390 = vst [vmem:[%s4452_s30 + $0x3a8] sm:$0xff] %v389_v53  ;;  %v397_v57 = vld [vmem:[%s4447_s29 + $0xf08] sm:$0xff] }
  0x53   : > { %392 = vst [vmem:[%s4452_s30 + $0x3b0] sm:$0xff] %v391_v54  ;;  %394 = vst [vmem:[%s4452_s30 + $0x3b8] sm:$0xff] %v393_v55  ;;  %v395_v56 = vld [vmem:[%s4447_s29 + $0xf00] sm:$0xff]  ;;  %v399_v58 = vld [vmem:[%s4447_s29 + $0xf10] sm:$0xff] }
  0x54   : > { %396 = vst [vmem:[%s4452_s30 + $0x3c0] sm:$0xff] %v395_v56  ;;  %398 = vst [vmem:[%s4452_s30 + $0x3c8] sm:$0xff] %v397_v57  ;;  %v401_v59 = vld [vmem:[%s4447_s29 + $0xf18] sm:$0xff]  ;;  %v403_v60 = vld [vmem:[%s4447_s29 + $0xf20] sm:$0xff] }
  0x55   : > { %400 = vst [vmem:[%s4452_s30 + $0x3d0] sm:$0xff] %v399_v58  ;;  %v405_v61 = vld [vmem:[%s4447_s29 + $0xfa0] sm:$0xff]  ;;  %402 = vst [vmem:[%s4452_s30 + $0x3d8] sm:$0xff] %v401_v59  ;;  %v407_v62 = vld [vmem:[%s4447_s29 + $0xfa8] sm:$0xff] }
  0x56   : > { %404 = vst [vmem:[%s4452_s30 + $0x3e0] sm:$0xff] %v403_v60  ;;  %406 = vst [vmem:[%s4452_s30 + $0x3e8] sm:$0xff] %v405_v61  ;;  %v409_v63 = vld [vmem:[%s4447_s29 + $0xfb0] sm:$0xff]  ;;  %v411_v0 = vld [vmem:[%s4447_s29 + $0xfb8] sm:$0xff] }
  0x57   : > { %408 = vst [vmem:[%s4452_s30 + $0x3f0] sm:$0xff] %v407_v62  ;;  %410 = vst [vmem:[%s4452_s30 + $0x3f8] sm:$0xff] %v409_v63  ;;  %v413_v1 = vld [vmem:[%s4447_s29 + $0xfc0] sm:$0xff]  ;;  %v417_v3 = vld [vmem:[%s4447_s29 + $0x1048] sm:$0xff] }
  0x58   : > { %412 = vst [vmem:[%s4452_s30 + $0x400] sm:$0xff] %v411_v0  ;;  %v415_v2 = vld [vmem:[%s4447_s29 + $0x1040] sm:$0xff]  ;;  %414 = vst [vmem:[%s4452_s30 + $0x408] sm:$0xff] %v413_v1  ;;  %v419_v4 = vld [vmem:[%s4447_s29 + $0x1050] sm:$0xff] }
  0x59   : > { %416 = vst [vmem:[%s4452_s30 + $0x410] sm:$0xff] %v415_v2  ;;  %418 = vst [vmem:[%s4452_s30 + $0x418] sm:$0xff] %v417_v3  ;;  %v421_v5 = vld [vmem:[%s4447_s29 + $0x1058] sm:$0xff]  ;;  %v423_v6 = vld [vmem:[%s4447_s29 + $0x1060] sm:$0xff] }
  0x5a   : > { %420 = vst [vmem:[%s4452_s30 + $0x420] sm:$0xff] %v419_v4  ;;  %422 = vst [vmem:[%s4452_s30 + $0x428] sm:$0xff] %v421_v5  ;;  %v425_v7 = vld [vmem:[%s4447_s29 + $0x10e0] sm:$0xff]  ;;  %v427_v8 = vld [vmem:[%s4447_s29 + $0x10e8] sm:$0xff] }
  0x5b   : > { %424 = vst [vmem:[%s4452_s30 + $0x430] sm:$0xff] %v423_v6  ;;  %v429_v9 = vld [vmem:[%s4447_s29 + $0x10f0] sm:$0xff]  ;;  %426 = vst [vmem:[%s4452_s30 + $0x438] sm:$0xff] %v425_v7  ;;  %v431_v10 = vld [vmem:[%s4447_s29 + $0x10f8] sm:$0xff] }
  0x5c   : > { %428 = vst [vmem:[%s4452_s30 + $0x440] sm:$0xff] %v427_v8  ;;  %430 = vst [vmem:[%s4452_s30 + $0x448] sm:$0xff] %v429_v9  ;;  %v433_v11 = vld [vmem:[%s4447_s29 + $0x1100] sm:$0xff]  ;;  %v437_v13 = vld [vmem:[%s4447_s29 + $0x1188] sm:$0xff] }
  0x5d   : > { %v435_v12 = vld [vmem:[%s4447_s29 + $0x1180] sm:$0xff]  ;;  %432 = vst [vmem:[%s4452_s30 + $0x450] sm:$0xff] %v431_v10  ;;  %434 = vst [vmem:[%s4452_s30 + $0x458] sm:$0xff] %v433_v11  ;;  %v439_v14 = vld [vmem:[%s4447_s29 + $0x1190] sm:$0xff] }
  0x5e   : > { %436 = vst [vmem:[%s4452_s30 + $0x460] sm:$0xff] %v435_v12  ;;  %v441_v15 = vld [vmem:[%s4447_s29 + $0x1198] sm:$0xff]  ;;  %438 = vst [vmem:[%s4452_s30 + $0x468] sm:$0xff] %v437_v13  ;;  %v443_v16 = vld [vmem:[%s4447_s29 + $0x11a0] sm:$0xff] }
  0x5f   : > { %440 = vst [vmem:[%s4452_s30 + $0x470] sm:$0xff] %v439_v14  ;;  %442 = vst [vmem:[%s4452_s30 + $0x478] sm:$0xff] %v441_v15  ;;  %v445_v17 = vld [vmem:[%s4447_s29 + $0x1220] sm:$0xff]  ;;  %v447_v18 = vld [vmem:[%s4447_s29 + $0x1228] sm:$0xff] }
  0x60   : > { %444 = vst [vmem:[%s4452_s30 + $0x480] sm:$0xff] %v443_v16  ;;  %446 = vst [vmem:[%s4452_s30 + $0x488] sm:$0xff] %v445_v17  ;;  %v449_v19 = vld [vmem:[%s4447_s29 + $0x1230] sm:$0xff]  ;;  %v451_v20 = vld [vmem:[%s4447_s29 + $0x1238] sm:$0xff] }
  0x61   : > { %448 = vst [vmem:[%s4452_s30 + $0x490] sm:$0xff] %v447_v18  ;;  %v453_v21 = vld [vmem:[%s4447_s29 + $0x1240] sm:$0xff]  ;;  %450 = vst [vmem:[%s4452_s30 + $0x498] sm:$0xff] %v449_v19  ;;  %v457_v23 = vld [vmem:[%s4447_s29 + $0x12c8] sm:$0xff] }
  0x62   : > { %452 = vst [vmem:[%s4452_s30 + $0x4a0] sm:$0xff] %v451_v20  ;;  %454 = vst [vmem:[%s4452_s30 + $0x4a8] sm:$0xff] %v453_v21  ;;  %v455_v22 = vld [vmem:[%s4447_s29 + $0x12c0] sm:$0xff]  ;;  %v459_v24 = vld [vmem:[%s4447_s29 + $0x12d0] sm:$0xff] }
  0x63   : > { %456 = vst [vmem:[%s4452_s30 + $0x4b0] sm:$0xff] %v455_v22  ;;  %458 = vst [vmem:[%s4452_s30 + $0x4b8] sm:$0xff] %v457_v23  ;;  %v461_v25 = vld [vmem:[%s4447_s29 + $0x12d8] sm:$0xff]  ;;  %v463_v26 = vld [vmem:[%s4447_s29 + $0x12e0] sm:$0xff] }
  0x64   : > { %460 = vst [vmem:[%s4452_s30 + $0x4c0] sm:$0xff] %v459_v24  ;;  %v465_v27 = vld [vmem:[%s4447_s29 + $0x1360] sm:$0xff]  ;;  %462 = vst [vmem:[%s4452_s30 + $0x4c8] sm:$0xff] %v461_v25  ;;  %v467_v28 = vld [vmem:[%s4447_s29 + $0x1368] sm:$0xff] }
  0x65   : > { %464 = vst [vmem:[%s4452_s30 + $0x4d0] sm:$0xff] %v463_v26  ;;  %466 = vst [vmem:[%s4452_s30 + $0x4d8] sm:$0xff] %v465_v27  ;;  %v469_v29 = vld [vmem:[%s4447_s29 + $0x1370] sm:$0xff]  ;;  %v471_v30 = vld [vmem:[%s4447_s29 + $0x1378] sm:$0xff] }
  0x66   : > { %468 = vst [vmem:[%s4452_s30 + $0x4e0] sm:$0xff] %v467_v28  ;;  %470 = vst [vmem:[%s4452_s30 + $0x4e8] sm:$0xff] %v469_v29  ;;  %v473_v31 = vld [vmem:[%s4447_s29 + $0x1380] sm:$0xff]  ;;  %v477_v33 = vld [vmem:[%s4447_s29 + $0x1408] sm:$0xff] }
  0x67   : > { %472 = vst [vmem:[%s4452_s30 + $0x4f0] sm:$0xff] %v471_v30  ;;  %v475_v32 = vld [vmem:[%s4447_s29 + $0x1400] sm:$0xff]  ;;  %474 = vst [vmem:[%s4452_s30 + $0x4f8] sm:$0xff] %v473_v31  ;;  %v479_v34 = vld [vmem:[%s4447_s29 + $0x1410] sm:$0xff] }
  0x68   : > { %476 = vst [vmem:[%s4452_s30 + $0x500] sm:$0xff] %v475_v32  ;;  %478 = vst [vmem:[%s4452_s30 + $0x508] sm:$0xff] %v477_v33  ;;  %v481_v35 = vld [vmem:[%s4447_s29 + $0x1418] sm:$0xff]  ;;  %v483_v36 = vld [vmem:[%s4447_s29 + $0x1420] sm:$0xff] }
  0x69   : > { %480 = vst [vmem:[%s4452_s30 + $0x510] sm:$0xff] %v479_v34  ;;  %482 = vst [vmem:[%s4452_s30 + $0x518] sm:$0xff] %v481_v35  ;;  %v485_v37 = vld [vmem:[%s4447_s29 + $0x14a0] sm:$0xff]  ;;  %v487_v38 = vld [vmem:[%s4447_s29 + $0x14a8] sm:$0xff] }
  0x6a   : > { %484 = vst [vmem:[%s4452_s30 + $0x520] sm:$0xff] %v483_v36  ;;  %v489_v39 = vld [vmem:[%s4447_s29 + $0x14b0] sm:$0xff]  ;;  %486 = vst [vmem:[%s4452_s30 + $0x528] sm:$0xff] %v485_v37  ;;  %v491_v40 = vld [vmem:[%s4447_s29 + $0x14b8] sm:$0xff] }
  0x6b   : > { %488 = vst [vmem:[%s4452_s30 + $0x530] sm:$0xff] %v487_v38  ;;  %490 = vst [vmem:[%s4452_s30 + $0x538] sm:$0xff] %v489_v39  ;;  %v493_v41 = vld [vmem:[%s4447_s29 + $0x14c0] sm:$0xff]  ;;  %v497_v43 = vld [vmem:[%s4447_s29 + $0x1548] sm:$0xff] }
  0x6c   : > { %v495_v42 = vld [vmem:[%s4447_s29 + $0x1540] sm:$0xff]  ;;  %492 = vst [vmem:[%s4452_s30 + $0x540] sm:$0xff] %v491_v40  ;;  %494 = vst [vmem:[%s4452_s30 + $0x548] sm:$0xff] %v493_v41  ;;  %v499_v44 = vld [vmem:[%s4447_s29 + $0x1550] sm:$0xff] }
  0x6d   : > { %496 = vst [vmem:[%s4452_s30 + $0x550] sm:$0xff] %v495_v42  ;;  %v501_v45 = vld [vmem:[%s4447_s29 + $0x1558] sm:$0xff]  ;;  %498 = vst [vmem:[%s4452_s30 + $0x558] sm:$0xff] %v497_v43  ;;  %v503_v46 = vld [vmem:[%s4447_s29 + $0x1560] sm:$0xff] }
  0x6e   : > { %500 = vst [vmem:[%s4452_s30 + $0x560] sm:$0xff] %v499_v44  ;;  %502 = vst [vmem:[%s4452_s30 + $0x568] sm:$0xff] %v501_v45  ;;  %v505_v47 = vld [vmem:[%s4447_s29 + $0x15e0] sm:$0xff]  ;;  %v507_v48 = vld [vmem:[%s4447_s29 + $0x15e8] sm:$0xff] }
  0x6f   : > { %504 = vst [vmem:[%s4452_s30 + $0x570] sm:$0xff] %v503_v46  ;;  %506 = vst [vmem:[%s4452_s30 + $0x578] sm:$0xff] %v505_v47  ;;  %v509_v49 = vld [vmem:[%s4447_s29 + $0x15f0] sm:$0xff]  ;;  %v511_v50 = vld [vmem:[%s4447_s29 + $0x15f8] sm:$0xff] }
  0x70   : > { %508 = vst [vmem:[%s4452_s30 + $0x580] sm:$0xff] %v507_v48  ;;  %v513_v51 = vld [vmem:[%s4447_s29 + $0x1600] sm:$0xff]  ;;  %510 = vst [vmem:[%s4452_s30 + $0x588] sm:$0xff] %v509_v49  ;;  %v517_v53 = vld [vmem:[%s4447_s29 + $0x1688] sm:$0xff] }
  0x71   : > { %512 = vst [vmem:[%s4452_s30 + $0x590] sm:$0xff] %v511_v50  ;;  %514 = vst [vmem:[%s4452_s30 + $0x598] sm:$0xff] %v513_v51  ;;  %v515_v52 = vld [vmem:[%s4447_s29 + $0x1680] sm:$0xff]  ;;  %v519_v54 = vld [vmem:[%s4447_s29 + $0x1690] sm:$0xff] }
  0x72   : > { %516 = vst [vmem:[%s4452_s30 + $0x5a0] sm:$0xff] %v515_v52  ;;  %518 = vst [vmem:[%s4452_s30 + $0x5a8] sm:$0xff] %v517_v53  ;;  %v521_v55 = vld [vmem:[%s4447_s29 + $0x1698] sm:$0xff]  ;;  %v523_v56 = vld [vmem:[%s4447_s29 + $0x16a0] sm:$0xff] }
  0x73   : > { %520 = vst [vmem:[%s4452_s30 + $0x5b0] sm:$0xff] %v519_v54  ;;  %v525_v57 = vld [vmem:[%s4447_s29 + $0x1720] sm:$0xff]  ;;  %522 = vst [vmem:[%s4452_s30 + $0x5b8] sm:$0xff] %v521_v55  ;;  %v527_v58 = vld [vmem:[%s4447_s29 + $0x1728] sm:$0xff] }
  0x74   : > { %524 = vst [vmem:[%s4452_s30 + $0x5c0] sm:$0xff] %v523_v56  ;;  %526 = vst [vmem:[%s4452_s30 + $0x5c8] sm:$0xff] %v525_v57  ;;  %v529_v59 = vld [vmem:[%s4447_s29 + $0x1730] sm:$0xff]  ;;  %v531_v60 = vld [vmem:[%s4447_s29 + $0x1738] sm:$0xff] }
  0x75   : > { %528 = vst [vmem:[%s4452_s30 + $0x5d0] sm:$0xff] %v527_v58  ;;  %530 = vst [vmem:[%s4452_s30 + $0x5d8] sm:$0xff] %v529_v59  ;;  %v533_v61 = vld [vmem:[%s4447_s29 + $0x1740] sm:$0xff]  ;;  %v537_v63 = vld [vmem:[%s4447_s29 + $0x17c8] sm:$0xff] }
  0x76   : > { %532 = vst [vmem:[%s4452_s30 + $0x5e0] sm:$0xff] %v531_v60  ;;  %v535_v62 = vld [vmem:[%s4447_s29 + $0x17c0] sm:$0xff]  ;;  %534 = vst [vmem:[%s4452_s30 + $0x5e8] sm:$0xff] %v533_v61  ;;  %v539_v0 = vld [vmem:[%s4447_s29 + $0x17d0] sm:$0xff] }
  0x77   : > { %536 = vst [vmem:[%s4452_s30 + $0x5f0] sm:$0xff] %v535_v62  ;;  %538 = vst [vmem:[%s4452_s30 + $0x5f8] sm:$0xff] %v537_v63  ;;  %v541_v1 = vld [vmem:[%s4447_s29 + $0x17d8] sm:$0xff]  ;;  %v543_v2 = vld [vmem:[%s4447_s29 + $0x17e0] sm:$0xff] }
  0x78   : > { %540 = vst [vmem:[%s4452_s30 + $0x600] sm:$0xff] %v539_v0  ;;  %542 = vst [vmem:[%s4452_s30 + $0x608] sm:$0xff] %v541_v1  ;;  %v545_v3 = vld [vmem:[%s4447_s29 + $0x1860] sm:$0xff]  ;;  %v547_v4 = vld [vmem:[%s4447_s29 + $0x1868] sm:$0xff] }
  0x79   : > { %544 = vst [vmem:[%s4452_s30 + $0x610] sm:$0xff] %v543_v2  ;;  %v549_v5 = vld [vmem:[%s4447_s29 + $0x1870] sm:$0xff]  ;;  %546 = vst [vmem:[%s4452_s30 + $0x618] sm:$0xff] %v545_v3  ;;  %v551_v6 = vld [vmem:[%s4447_s29 + $0x1878] sm:$0xff] }
  0x7a   : > { %548 = vst [vmem:[%s4452_s30 + $0x620] sm:$0xff] %v547_v4  ;;  %550 = vst [vmem:[%s4452_s30 + $0x628] sm:$0xff] %v549_v5  ;;  %v553_v7 = vld [vmem:[%s4447_s29 + $0x1880] sm:$0xff]  ;;  %v557_v9 = vld [vmem:[%s4447_s29 + $0x1908] sm:$0xff] }
  0x7b   : > { %v555_v8 = vld [vmem:[%s4447_s29 + $0x1900] sm:$0xff]  ;;  %552 = vst [vmem:[%s4452_s30 + $0x630] sm:$0xff] %v551_v6  ;;  %554 = vst [vmem:[%s4452_s30 + $0x638] sm:$0xff] %v553_v7  ;;  %v559_v10 = vld [vmem:[%s4447_s29 + $0x1910] sm:$0xff] }
  0x7c   : > { %556 = vst [vmem:[%s4452_s30 + $0x640] sm:$0xff] %v555_v8  ;;  %v561_v11 = vld [vmem:[%s4447_s29 + $0x1918] sm:$0xff]  ;;  %558 = vst [vmem:[%s4452_s30 + $0x648] sm:$0xff] %v557_v9  ;;  %v563_v12 = vld [vmem:[%s4447_s29 + $0x1920] sm:$0xff] }
  0x7d   : > { %560 = vst [vmem:[%s4452_s30 + $0x650] sm:$0xff] %v559_v10  ;;  %562 = vst [vmem:[%s4452_s30 + $0x658] sm:$0xff] %v561_v11  ;;  %v565_v13 = vld [vmem:[%s4447_s29 + $0x19a0] sm:$0xff]  ;;  %v567_v14 = vld [vmem:[%s4447_s29 + $0x19a8] sm:$0xff] }
  0x7e   : > { %564 = vst [vmem:[%s4452_s30 + $0x660] sm:$0xff] %v563_v12  ;;  %566 = vst [vmem:[%s4452_s30 + $0x668] sm:$0xff] %v565_v13  ;;  %v569_v15 = vld [vmem:[%s4447_s29 + $0x19b0] sm:$0xff]  ;;  %v571_v16 = vld [vmem:[%s4447_s29 + $0x19b8] sm:$0xff] }
  0x7f   : > { %568 = vst [vmem:[%s4452_s30 + $0x670] sm:$0xff] %v567_v14  ;;  %v573_v17 = vld [vmem:[%s4447_s29 + $0x19c0] sm:$0xff]  ;;  %570 = vst [vmem:[%s4452_s30 + $0x678] sm:$0xff] %v569_v15  ;;  %v577_v19 = vld [vmem:[%s4447_s29 + $0x1a48] sm:$0xff] }
  0x80   : > { %572 = vst [vmem:[%s4452_s30 + $0x680] sm:$0xff] %v571_v16  ;;  %574 = vst [vmem:[%s4452_s30 + $0x688] sm:$0xff] %v573_v17  ;;  %v575_v18 = vld [vmem:[%s4447_s29 + $0x1a40] sm:$0xff]  ;;  %v579_v20 = vld [vmem:[%s4447_s29 + $0x1a50] sm:$0xff] }
  0x81   : > { %576 = vst [vmem:[%s4452_s30 + $0x690] sm:$0xff] %v575_v18  ;;  %578 = vst [vmem:[%s4452_s30 + $0x698] sm:$0xff] %v577_v19  ;;  %v581_v21 = vld [vmem:[%s4447_s29 + $0x1a58] sm:$0xff]  ;;  %v583_v22 = vld [vmem:[%s4447_s29 + $0x1a60] sm:$0xff] }
  0x82   : > { %580 = vst [vmem:[%s4452_s30 + $0x6a0] sm:$0xff] %v579_v20  ;;  %v585_v23 = vld [vmem:[%s4447_s29 + $0x1ae0] sm:$0xff]  ;;  %582 = vst [vmem:[%s4452_s30 + $0x6a8] sm:$0xff] %v581_v21  ;;  %v587_v24 = vld [vmem:[%s4447_s29 + $0x1ae8] sm:$0xff] }
  0x83   : > { %584 = vst [vmem:[%s4452_s30 + $0x6b0] sm:$0xff] %v583_v22  ;;  %586 = vst [vmem:[%s4452_s30 + $0x6b8] sm:$0xff] %v585_v23  ;;  %v589_v25 = vld [vmem:[%s4447_s29 + $0x1af0] sm:$0xff]  ;;  %v591_v26 = vld [vmem:[%s4447_s29 + $0x1af8] sm:$0xff] }
  0x84   : > { %588 = vst [vmem:[%s4452_s30 + $0x6c0] sm:$0xff] %v587_v24  ;;  %590 = vst [vmem:[%s4452_s30 + $0x6c8] sm:$0xff] %v589_v25  ;;  %v593_v27 = vld [vmem:[%s4447_s29 + $0x1b00] sm:$0xff]  ;;  %v597_v29 = vld [vmem:[%s4447_s29 + $0x1b88] sm:$0xff] }
  0x85   : > { %592 = vst [vmem:[%s4452_s30 + $0x6d0] sm:$0xff] %v591_v26  ;;  %v595_v28 = vld [vmem:[%s4447_s29 + $0x1b80] sm:$0xff]  ;;  %594 = vst [vmem:[%s4452_s30 + $0x6d8] sm:$0xff] %v593_v27  ;;  %v599_v30 = vld [vmem:[%s4447_s29 + $0x1b90] sm:$0xff] }
  0x86   : > { %596 = vst [vmem:[%s4452_s30 + $0x6e0] sm:$0xff] %v595_v28  ;;  %598 = vst [vmem:[%s4452_s30 + $0x6e8] sm:$0xff] %v597_v29  ;;  %v601_v31 = vld [vmem:[%s4447_s29 + $0x1b98] sm:$0xff]  ;;  %v603_v32 = vld [vmem:[%s4447_s29 + $0x1ba0] sm:$0xff] }
  0x87   : > { %600 = vst [vmem:[%s4452_s30 + $0x6f0] sm:$0xff] %v599_v30  ;;  %602 = vst [vmem:[%s4452_s30 + $0x6f8] sm:$0xff] %v601_v31  ;;  %v605_v33 = vld [vmem:[%s4447_s29 + $0x1c20] sm:$0xff]  ;;  %v607_v34 = vld [vmem:[%s4447_s29 + $0x1c28] sm:$0xff] }
  0x88   : > { %604 = vst [vmem:[%s4452_s30 + $0x700] sm:$0xff] %v603_v32  ;;  %v609_v35 = vld [vmem:[%s4447_s29 + $0x1c30] sm:$0xff]  ;;  %606 = vst [vmem:[%s4452_s30 + $0x708] sm:$0xff] %v605_v33  ;;  %v611_v36 = vld [vmem:[%s4447_s29 + $0x1c38] sm:$0xff] }
  0x89   : > { %608 = vst [vmem:[%s4452_s30 + $0x710] sm:$0xff] %v607_v34  ;;  %610 = vst [vmem:[%s4452_s30 + $0x718] sm:$0xff] %v609_v35  ;;  %v613_v37 = vld [vmem:[%s4447_s29 + $0x1c40] sm:$0xff]  ;;  %v617_v39 = vld [vmem:[%s4447_s29 + $0x1cc8] sm:$0xff] }
  0x8a   : > { %v615_v38 = vld [vmem:[%s4447_s29 + $0x1cc0] sm:$0xff]  ;;  %612 = vst [vmem:[%s4452_s30 + $0x720] sm:$0xff] %v611_v36  ;;  %614 = vst [vmem:[%s4452_s30 + $0x728] sm:$0xff] %v613_v37  ;;  %v619_v40 = vld [vmem:[%s4447_s29 + $0x1cd0] sm:$0xff] }
  0x8b   : > { %616 = vst [vmem:[%s4452_s30 + $0x730] sm:$0xff] %v615_v38  ;;  %v621_v41 = vld [vmem:[%s4447_s29 + $0x1cd8] sm:$0xff]  ;;  %618 = vst [vmem:[%s4452_s30 + $0x738] sm:$0xff] %v617_v39  ;;  %v623_v42 = vld [vmem:[%s4447_s29 + $0x1ce0] sm:$0xff] }
  0x8c   : > { %620 = vst [vmem:[%s4452_s30 + $0x740] sm:$0xff] %v619_v40  ;;  %622 = vst [vmem:[%s4452_s30 + $0x748] sm:$0xff] %v621_v41  ;;  %v625_v43 = vld [vmem:[%s4447_s29 + $0x1d60] sm:$0xff]  ;;  %v627_v44 = vld [vmem:[%s4447_s29 + $0x1d68] sm:$0xff] }
  0x8d   : > { %624 = vst [vmem:[%s4452_s30 + $0x750] sm:$0xff] %v623_v42  ;;  %626 = vst [vmem:[%s4452_s30 + $0x758] sm:$0xff] %v625_v43  ;;  %v629_v45 = vld [vmem:[%s4447_s29 + $0x1d70] sm:$0xff]  ;;  %v631_v46 = vld [vmem:[%s4447_s29 + $0x1d78] sm:$0xff] }
  0x8e   : > { %628 = vst [vmem:[%s4452_s30 + $0x760] sm:$0xff] %v627_v44  ;;  %v633_v47 = vld [vmem:[%s4447_s29 + $0x1d80] sm:$0xff]  ;;  %630 = vst [vmem:[%s4452_s30 + $0x768] sm:$0xff] %v629_v45  ;;  %v637_v49 = vld [vmem:[%s4447_s29 + $0x1e08] sm:$0xff] }
  0x8f   : > { %632 = vst [vmem:[%s4452_s30 + $0x770] sm:$0xff] %v631_v46  ;;  %634 = vst [vmem:[%s4452_s30 + $0x778] sm:$0xff] %v633_v47  ;;  %v635_v48 = vld [vmem:[%s4447_s29 + $0x1e00] sm:$0xff]  ;;  %v639_v50 = vld [vmem:[%s4447_s29 + $0x1e10] sm:$0xff] }
  0x90   : > { %636 = vst [vmem:[%s4452_s30 + $0x780] sm:$0xff] %v635_v48  ;;  %638 = vst [vmem:[%s4452_s30 + $0x788] sm:$0xff] %v637_v49  ;;  %v641_v51 = vld [vmem:[%s4447_s29 + $0x1e18] sm:$0xff]  ;;  %v643_v52 = vld [vmem:[%s4447_s29 + $0x1e20] sm:$0xff] }
  0x91   : > { %640 = vst [vmem:[%s4452_s30 + $0x790] sm:$0xff] %v639_v50  ;;  %v645_v53 = vld [vmem:[%s4447_s29 + $0x1ea0] sm:$0xff]  ;;  %642 = vst [vmem:[%s4452_s30 + $0x798] sm:$0xff] %v641_v51  ;;  %v647_v54 = vld [vmem:[%s4447_s29 + $0x1ea8] sm:$0xff] }
  0x92   : > { %644 = vst [vmem:[%s4452_s30 + $0x7a0] sm:$0xff] %v643_v52  ;;  %646 = vst [vmem:[%s4452_s30 + $0x7a8] sm:$0xff] %v645_v53  ;;  %v649_v55 = vld [vmem:[%s4447_s29 + $0x1eb0] sm:$0xff]  ;;  %v651_v56 = vld [vmem:[%s4447_s29 + $0x1eb8] sm:$0xff] }
  0x93   : > { %648 = vst [vmem:[%s4452_s30 + $0x7b0] sm:$0xff] %v647_v54  ;;  %650 = vst [vmem:[%s4452_s30 + $0x7b8] sm:$0xff] %v649_v55  ;;  %v653_v57 = vld [vmem:[%s4447_s29 + $0x1ec0] sm:$0xff]  ;;  %v657_v59 = vld [vmem:[%s4447_s29 + $0x1f48] sm:$0xff] }
  0x94   : > { %652 = vst [vmem:[%s4452_s30 + $0x7c0] sm:$0xff] %v651_v56  ;;  %v655_v58 = vld [vmem:[%s4447_s29 + $0x1f40] sm:$0xff]  ;;  %654 = vst [vmem:[%s4452_s30 + $0x7c8] sm:$0xff] %v653_v57  ;;  %v659_v60 = vld [vmem:[%s4447_s29 + $0x1f50] sm:$0xff] }
  0x95   : > { %656 = vst [vmem:[%s4452_s30 + $0x7d0] sm:$0xff] %v655_v58  ;;  %658 = vst [vmem:[%s4452_s30 + $0x7d8] sm:$0xff] %v657_v59  ;;  %v661_v61 = vld [vmem:[%s4447_s29 + $0x1f58] sm:$0xff]  ;;  %v663_v62 = vld [vmem:[%s4447_s29 + $0x1f60] sm:$0xff] }
  0x96   : > { %660 = vst [vmem:[%s4452_s30 + $0x7e0] sm:$0xff] %v659_v60  ;;  %662 = vst [vmem:[%s4452_s30 + $0x7e8] sm:$0xff] %v661_v61  ;;  %v665_v63 = vld [vmem:[%s4447_s29 + $0x1fe0] sm:$0xff]  ;;  %v667_v0 = vld [vmem:[%s4447_s29 + $0x1fe8] sm:$0xff] }
  0x97   : > { %664 = vst [vmem:[%s4452_s30 + $0x7f0] sm:$0xff] %v663_v62  ;;  %v669_v1 = vld [vmem:[%s4447_s29 + $0x1ff0] sm:$0xff]  ;;  %666 = vst [vmem:[%s4452_s30 + $0x7f8] sm:$0xff] %v665_v63  ;;  %v671_v2 = vld [vmem:[%s4447_s29 + $0x1ff8] sm:$0xff] }
  0x98   : > { %668 = vst [vmem:[%s4452_s30 + $0x800] sm:$0xff] %v667_v0  ;;  %670 = vst [vmem:[%s4452_s30 + $0x808] sm:$0xff] %v669_v1  ;;  %v673_v3 = vld [vmem:[%s4447_s29 + $0x2000] sm:$0xff]  ;;  %v677_v5 = vld [vmem:[%s4447_s29 + $0x2088] sm:$0xff] }
  0x99   : > { %v675_v4 = vld [vmem:[%s4447_s29 + $0x2080] sm:$0xff]  ;;  %672 = vst [vmem:[%s4452_s30 + $0x810] sm:$0xff] %v671_v2  ;;  %674 = vst [vmem:[%s4452_s30 + $0x818] sm:$0xff] %v673_v3  ;;  %v679_v6 = vld [vmem:[%s4447_s29 + $0x2090] sm:$0xff] }
  0x9a   : > { %676 = vst [vmem:[%s4452_s30 + $0x820] sm:$0xff] %v675_v4  ;;  %v681_v7 = vld [vmem:[%s4447_s29 + $0x2098] sm:$0xff]  ;;  %678 = vst [vmem:[%s4452_s30 + $0x828] sm:$0xff] %v677_v5  ;;  %v683_v8 = vld [vmem:[%s4447_s29 + $0x20a0] sm:$0xff] }
  0x9b   : > { %680 = vst [vmem:[%s4452_s30 + $0x830] sm:$0xff] %v679_v6  ;;  %682 = vst [vmem:[%s4452_s30 + $0x838] sm:$0xff] %v681_v7  ;;  %v685_v9 = vld [vmem:[%s4447_s29 + $0x2120] sm:$0xff]  ;;  %v687_v10 = vld [vmem:[%s4447_s29 + $0x2128] sm:$0xff] }
  0x9c   : > { %684 = vst [vmem:[%s4452_s30 + $0x840] sm:$0xff] %v683_v8  ;;  %686 = vst [vmem:[%s4452_s30 + $0x848] sm:$0xff] %v685_v9  ;;  %v689_v11 = vld [vmem:[%s4447_s29 + $0x2130] sm:$0xff]  ;;  %v691_v12 = vld [vmem:[%s4447_s29 + $0x2138] sm:$0xff] }
  0x9d   : > { %688 = vst [vmem:[%s4452_s30 + $0x850] sm:$0xff] %v687_v10  ;;  %v693_v13 = vld [vmem:[%s4447_s29 + $0x2140] sm:$0xff]  ;;  %690 = vst [vmem:[%s4452_s30 + $0x858] sm:$0xff] %v689_v11  ;;  %v697_v15 = vld [vmem:[%s4447_s29 + $0x21c8] sm:$0xff] }
  0x9e   : > { %692 = vst [vmem:[%s4452_s30 + $0x860] sm:$0xff] %v691_v12  ;;  %694 = vst [vmem:[%s4452_s30 + $0x868] sm:$0xff] %v693_v13  ;;  %v695_v14 = vld [vmem:[%s4447_s29 + $0x21c0] sm:$0xff]  ;;  %v699_v16 = vld [vmem:[%s4447_s29 + $0x21d0] sm:$0xff] }
  0x9f   : > { %696 = vst [vmem:[%s4452_s30 + $0x870] sm:$0xff] %v695_v14  ;;  %698 = vst [vmem:[%s4452_s30 + $0x878] sm:$0xff] %v697_v15  ;;  %v701_v17 = vld [vmem:[%s4447_s29 + $0x21d8] sm:$0xff]  ;;  %v703_v18 = vld [vmem:[%s4447_s29 + $0x21e0] sm:$0xff] }
  0xa0   : > { %700 = vst [vmem:[%s4452_s30 + $0x880] sm:$0xff] %v699_v16  ;;  %v705_v19 = vld [vmem:[%s4447_s29 + $0x2260] sm:$0xff]  ;;  %702 = vst [vmem:[%s4452_s30 + $0x888] sm:$0xff] %v701_v17  ;;  %v707_v20 = vld [vmem:[%s4447_s29 + $0x2268] sm:$0xff] }
  0xa1   : > { %704 = vst [vmem:[%s4452_s30 + $0x890] sm:$0xff] %v703_v18  ;;  %706 = vst [vmem:[%s4452_s30 + $0x898] sm:$0xff] %v705_v19  ;;  %v709_v21 = vld [vmem:[%s4447_s29 + $0x2270] sm:$0xff]  ;;  %v711_v22 = vld [vmem:[%s4447_s29 + $0x2278] sm:$0xff] }
  0xa2   : > { %708 = vst [vmem:[%s4452_s30 + $0x8a0] sm:$0xff] %v707_v20  ;;  %710 = vst [vmem:[%s4452_s30 + $0x8a8] sm:$0xff] %v709_v21  ;;  %v713_v23 = vld [vmem:[%s4447_s29 + $0x2280] sm:$0xff]  ;;  %v717_v25 = vld [vmem:[%s4447_s29 + $0x2308] sm:$0xff] }
  0xa3   : > { %712 = vst [vmem:[%s4452_s30 + $0x8b0] sm:$0xff] %v711_v22  ;;  %v715_v24 = vld [vmem:[%s4447_s29 + $0x2300] sm:$0xff]  ;;  %714 = vst [vmem:[%s4452_s30 + $0x8b8] sm:$0xff] %v713_v23  ;;  %v719_v26 = vld [vmem:[%s4447_s29 + $0x2310] sm:$0xff] }
  0xa4   : > { %716 = vst [vmem:[%s4452_s30 + $0x8c0] sm:$0xff] %v715_v24  ;;  %718 = vst [vmem:[%s4452_s30 + $0x8c8] sm:$0xff] %v717_v25  ;;  %v721_v27 = vld [vmem:[%s4447_s29 + $0x2318] sm:$0xff]  ;;  %v723_v28 = vld [vmem:[%s4447_s29 + $0x2320] sm:$0xff] }
  0xa5   : > { %720 = vst [vmem:[%s4452_s30 + $0x8d0] sm:$0xff] %v719_v26  ;;  %722 = vst [vmem:[%s4452_s30 + $0x8d8] sm:$0xff] %v721_v27  ;;  %v725_v29 = vld [vmem:[%s4447_s29 + $0x23a0] sm:$0xff]  ;;  %v727_v30 = vld [vmem:[%s4447_s29 + $0x23a8] sm:$0xff] }
  0xa6   : > { %724 = vst [vmem:[%s4452_s30 + $0x8e0] sm:$0xff] %v723_v28  ;;  %v729_v31 = vld [vmem:[%s4447_s29 + $0x23b0] sm:$0xff]  ;;  %726 = vst [vmem:[%s4452_s30 + $0x8e8] sm:$0xff] %v725_v29  ;;  %v731_v32 = vld [vmem:[%s4447_s29 + $0x23b8] sm:$0xff] }
  0xa7   : > { %728 = vst [vmem:[%s4452_s30 + $0x8f0] sm:$0xff] %v727_v30  ;;  %730 = vst [vmem:[%s4452_s30 + $0x8f8] sm:$0xff] %v729_v31  ;;  %v733_v33 = vld [vmem:[%s4447_s29 + $0x23c0] sm:$0xff]  ;;  %v737_v35 = vld [vmem:[%s4447_s29 + $0x2448] sm:$0xff] }
  0xa8   : > { %v735_v34 = vld [vmem:[%s4447_s29 + $0x2440] sm:$0xff]  ;;  %732 = vst [vmem:[%s4452_s30 + $0x900] sm:$0xff] %v731_v32  ;;  %734 = vst [vmem:[%s4452_s30 + $0x908] sm:$0xff] %v733_v33  ;;  %v739_v36 = vld [vmem:[%s4447_s29 + $0x2450] sm:$0xff] }
  0xa9   : > { %736 = vst [vmem:[%s4452_s30 + $0x910] sm:$0xff] %v735_v34  ;;  %v741_v37 = vld [vmem:[%s4447_s29 + $0x2458] sm:$0xff]  ;;  %738 = vst [vmem:[%s4452_s30 + $0x918] sm:$0xff] %v737_v35  ;;  %v743_v38 = vld [vmem:[%s4447_s29 + $0x2460] sm:$0xff] }
  0xaa   : > { %740 = vst [vmem:[%s4452_s30 + $0x920] sm:$0xff] %v739_v36  ;;  %742 = vst [vmem:[%s4452_s30 + $0x928] sm:$0xff] %v741_v37  ;;  %v745_v39 = vld [vmem:[%s4447_s29 + $0x24e0] sm:$0xff]  ;;  %v747_v40 = vld [vmem:[%s4447_s29 + $0x24e8] sm:$0xff] }
  0xab   : > { %744 = vst [vmem:[%s4452_s30 + $0x930] sm:$0xff] %v743_v38  ;;  %746 = vst [vmem:[%s4452_s30 + $0x938] sm:$0xff] %v745_v39  ;;  %v749_v41 = vld [vmem:[%s4447_s29 + $0x24f0] sm:$0xff]  ;;  %v751_v42 = vld [vmem:[%s4447_s29 + $0x24f8] sm:$0xff] }
  0xac   : > { %748 = vst [vmem:[%s4452_s30 + $0x940] sm:$0xff] %v747_v40  ;;  %v753_v43 = vld [vmem:[%s4447_s29 + $0x2500] sm:$0xff]  ;;  %750 = vst [vmem:[%s4452_s30 + $0x948] sm:$0xff] %v749_v41  ;;  %v757_v45 = vld [vmem:[%s4447_s29 + $0x2588] sm:$0xff] }
  0xad   : > { %752 = vst [vmem:[%s4452_s30 + $0x950] sm:$0xff] %v751_v42  ;;  %754 = vst [vmem:[%s4452_s30 + $0x958] sm:$0xff] %v753_v43  ;;  %v755_v44 = vld [vmem:[%s4447_s29 + $0x2580] sm:$0xff]  ;;  %v759_v46 = vld [vmem:[%s4447_s29 + $0x2590] sm:$0xff] }
  0xae   : > { %756 = vst [vmem:[%s4452_s30 + $0x960] sm:$0xff] %v755_v44  ;;  %758 = vst [vmem:[%s4452_s30 + $0x968] sm:$0xff] %v757_v45  ;;  %v761_v47 = vld [vmem:[%s4447_s29 + $0x2598] sm:$0xff]  ;;  %v763_v48 = vld [vmem:[%s4447_s29 + $0x25a0] sm:$0xff] }
  0xaf   : > { %760 = vst [vmem:[%s4452_s30 + $0x970] sm:$0xff] %v759_v46  ;;  %v765_v49 = vld [vmem:[%s4447_s29 + $0x2620] sm:$0xff]  ;;  %762 = vst [vmem:[%s4452_s30 + $0x978] sm:$0xff] %v761_v47  ;;  %v767_v50 = vld [vmem:[%s4447_s29 + $0x2628] sm:$0xff] }
  0xb0   : > { %764 = vst [vmem:[%s4452_s30 + $0x980] sm:$0xff] %v763_v48  ;;  %766 = vst [vmem:[%s4452_s30 + $0x988] sm:$0xff] %v765_v49  ;;  %v769_v51 = vld [vmem:[%s4447_s29 + $0x2630] sm:$0xff]  ;;  %v771_v52 = vld [vmem:[%s4447_s29 + $0x2638] sm:$0xff] }
  0xb1   : > { %768 = vst [vmem:[%s4452_s30 + $0x990] sm:$0xff] %v767_v50  ;;  %770 = vst [vmem:[%s4452_s30 + $0x998] sm:$0xff] %v769_v51  ;;  %v773_v53 = vld [vmem:[%s4447_s29 + $0x2640] sm:$0xff]  ;;  %v777_v55 = vld [vmem:[%s4447_s29 + $0x26c8] sm:$0xff] }
  0xb2   : > { %772 = vst [vmem:[%s4452_s30 + $0x9a0] sm:$0xff] %v771_v52  ;;  %v775_v54 = vld [vmem:[%s4447_s29 + $0x26c0] sm:$0xff]  ;;  %774 = vst [vmem:[%s4452_s30 + $0x9a8] sm:$0xff] %v773_v53  ;;  %v779_v56 = vld [vmem:[%s4447_s29 + $0x26d0] sm:$0xff] }
  0xb3   : > { %776 = vst [vmem:[%s4452_s30 + $0x9b0] sm:$0xff] %v775_v54  ;;  %778 = vst [vmem:[%s4452_s30 + $0x9b8] sm:$0xff] %v777_v55  ;;  %v781_v57 = vld [vmem:[%s4447_s29 + $0x26d8] sm:$0xff]  ;;  %v783_v58 = vld [vmem:[%s4447_s29 + $0x26e0] sm:$0xff] }
  0xb4   : > { %780 = vst [vmem:[%s4452_s30 + $0x9c0] sm:$0xff] %v779_v56  ;;  %782 = vst [vmem:[%s4452_s30 + $0x9c8] sm:$0xff] %v781_v57  ;;  %v785_v59 = vld [vmem:[%s4447_s29 + $0x2760] sm:$0xff]  ;;  %v787_v60 = vld [vmem:[%s4447_s29 + $0x2768] sm:$0xff] }
  0xb5   : > { %784 = vst [vmem:[%s4452_s30 + $0x9d0] sm:$0xff] %v783_v58  ;;  %v789_v61 = vld [vmem:[%s4447_s29 + $0x2770] sm:$0xff]  ;;  %786 = vst [vmem:[%s4452_s30 + $0x9d8] sm:$0xff] %v785_v59  ;;  %v791_v62 = vld [vmem:[%s4447_s29 + $0x2778] sm:$0xff] }
  0xb6   : > { %788 = vst [vmem:[%s4452_s30 + $0x9e0] sm:$0xff] %v787_v60  ;;  %790 = vst [vmem:[%s4452_s30 + $0x9e8] sm:$0xff] %v789_v61  ;;  %v793_v63 = vld [vmem:[%s4447_s29 + $0x2780] sm:$0xff] }
  0xb7   : > { %792 = vst [vmem:[%s4452_s30 + $0x9f0] sm:$0xff] %v791_v62  ;;  %794 = vst [vmem:[%s4452_s30 + $0x9f8] sm:$0xff] %v793_v63 }
  0xb8 PF: > { %p3393_p10 = scmp.ge.s32.totalorder %s4371_s15, 1  ;;  %p807_p11 = scmp.lt.s32.totalorder %s4371_s15, 5 }
  0xba   : > { %p808_p12 = pnand %p3393_p10, %p807_p11 }
  0xbb   : > { %s5094_s4 = sand.u32 (!%p808_p12), 1, %s4363_s13   ;;  %v849_v0 = vld [vmem:[%s5556_s0 + $0x8] sm:$0xff] (!%p808_p12)  ;;  %v851_v1 = vld [vmem:[%s5556_s0 + $0x18] sm:$0xff] (!%p808_p12)  ;;  %s842_s24 = smul.u32 (!%p808_p12), 10, %s4415_s16 }
  0xbc   : > { %811 = sbr.rel (%p808_p12) target bundleno = 772 (0x304), region = 51  ;;  %v5103_v2 = vpack.c.bf16 (!%p808_p12), %v849_v0, %v849_v0  ;;  %v5105_v3 = vpack.c.bf16 (!%p808_p12), %v851_v1, %v851_v1 }
  0xbd   : > { %s3748_s9 = smul.u32 (!%p808_p12), 2560, %s5094_s4  ;;  %p843_p13 = scmp.lt.s32.totalorder (!%p808_p12), %s842_s24, 39 }
  0xbe   : > { %2862 = vmatprep.mubr.bf16.mxu1 (!%p808_p12), %v5103_v2  ;;  %2903 = vmatprep.mubr.bf16.mxu0 (!%p808_p12), %v5105_v3  ;;  %s3749_s28 = smul.u32 (!%p808_p12), 80, %s5094_s4 }
  0xbf   : > { %s5109_s10 = scalar_lea.vmem (!%p808_p12), [#allocation2], %s3748_s9  ;;  %s3718_s30 = smul.u32 (!%p808_p12), 1280, %s4415_s16 }
  0xc0   : > { %v3789_v4 = vld [vmem:[%s5109_s10 + $0x4] ss:$40 sps:$4 sm:$0xff] (!%p808_p12)   ;;  %v3793_v6 = vld [vmem:[%s5109_s10] ss:$40 sps:$4 sm:$0xff] (!%p808_p12)   ;;  %v3795_v8 = vld [vmem:[%s5109_s10 + $0x54] ss:$40 sps:$4 sm:$0xff] (!%p808_p12)  }
  0xc1   : > { %v3791_v5 = vld [vmem:[%s5109_s10 + $0x504] ss:$40 sps:$4 sm:$0xff] (!%p808_p12)   ;;  %2830 = vmatprep.subr.bf16.mxu1 (!%p808_p12), %v3789_v4  ;;  %v3794_v7 = vld [vmem:[%s5109_s10 + $0x500] ss:$40 sps:$4 sm:$0xff] (!%p808_p12)   ;;  %v3797_v9 = vld [vmem:[%s5109_s10 + $0x554] ss:$40 sps:$4 sm:$0xff] (!%p808_p12)   ;;  %s5511_s8 = scalar_lea.hbm (!%p808_p12), %s5559_s3, %s3718_s30 }
  0xc2   : > { %2871 = vmatprep.subr.bf16.mxu0 (!%p808_p12), %v3791_v5  ;;  %2831 = vmatpush1.bf16.msra.mxu1 (!%p808_p12), %v3793_v6  ;;  %v3799_v10 = vld [vmem:[%s5109_s10 + $0x50] ss:$40 sps:$4 sm:$0xff] (!%p808_p12)   ;;  %v3801_v12 = vld [vmem:[%s5109_s10 + $0xa4] ss:$40 sps:$4 sm:$0xff] (!%p808_p12)   ;;  %v3805_v14 = vld [vmem:[%s5109_s10 + $0xa0] ss:$40 sps:$4 sm:$0xff] (!%p808_p12)  }
  0xc3   : > { %2872 = vmatpush1.bf16.msra.mxu0 %v3794_v7  ;;  %2832 = vmatprep.subr.bf16.mxu1 %v3795_v8  ;;  %v3800_v11 = vld [vmem:[%s5109_s10 + $0x550] ss:$40 sps:$4 sm:$0xff]   ;;  %v3803_v13 = vld [vmem:[%s5109_s10 + $0x5a4] ss:$40 sps:$4 sm:$0xff]   ;;  %v3806_v15 = vld [vmem:[%s5109_s10 + $0x5a0] ss:$40 sps:$4 sm:$0xff]  }
  0xc4   : > { %2873 = vmatprep.subr.bf16.mxu0 %v3797_v9  ;;  %v3807_v16 = vld [vmem:[%s5109_s10 + $0xf4] ss:$40 sps:$4 sm:$0xff]   ;;  %v3811_v18 = vld [vmem:[%s5109_s10 + $0xf0] ss:$40 sps:$4 sm:$0xff]   ;;  %v3813_v20 = vld [vmem:[%s5109_s10 + $0x144] ss:$40 sps:$4 sm:$0xff]  }
  0xc5   : > { %v3809_v17 = vld [vmem:[%s5109_s10 + $0x5f4] ss:$40 sps:$4 sm:$0xff]   ;;  %v3812_v19 = vld [vmem:[%s5109_s10 + $0x5f0] ss:$40 sps:$4 sm:$0xff]   ;;  %v3815_v21 = vld [vmem:[%s5109_s10 + $0x644] ss:$40 sps:$4 sm:$0xff]  }
  0xc6   : > { %2833 = vmatpush1.bf16.msra.mxu1 %v3799_v10  ;;  %v3817_v22 = vld [vmem:[%s5109_s10 + $0x140] ss:$40 sps:$4 sm:$0xff]   ;;  %v3819_v24 = vld [vmem:[%s5109_s10 + $0x194] ss:$40 sps:$4 sm:$0xff]   ;;  %v3823_v26 = vld [vmem:[%s5109_s10 + $0x190] ss:$40 sps:$4 sm:$0xff]  }
  0xc7   : > { %2874 = vmatpush1.bf16.msra.mxu0 %v3800_v11  ;;  %2834 = vmatprep.subr.bf16.mxu1 %v3801_v12  ;;  %v3818_v23 = vld [vmem:[%s5109_s10 + $0x640] ss:$40 sps:$4 sm:$0xff]   ;;  %v3821_v25 = vld [vmem:[%s5109_s10 + $0x694] ss:$40 sps:$4 sm:$0xff]   ;;  %v3824_v27 = vld [vmem:[%s5109_s10 + $0x690] ss:$40 sps:$4 sm:$0xff]  }
  0xc8   : > { %2875 = vmatprep.subr.bf16.mxu0 %v3803_v13  ;;  %v3825_v28 = vld [vmem:[%s5109_s10 + $0x1e4] ss:$40 sps:$4 sm:$0xff]   ;;  %v3829_v30 = vld [vmem:[%s5109_s10 + $0x1e0] ss:$40 sps:$4 sm:$0xff]   ;;  %v3831_v32 = vld [vmem:[%s5109_s10 + $0x234] ss:$40 sps:$4 sm:$0xff]  }
  0xc9   : > { %v3827_v29 = vld [vmem:[%s5109_s10 + $0x6e4] ss:$40 sps:$4 sm:$0xff]   ;;  %v3830_v31 = vld [vmem:[%s5109_s10 + $0x6e0] ss:$40 sps:$4 sm:$0xff]   ;;  %v3833_v33 = vld [vmem:[%s5109_s10 + $0x734] ss:$40 sps:$4 sm:$0xff]  }
  0xca   : > { %2835 = vmatpush1.bf16.msra.mxu1 %v3805_v14  ;;  %v3835_v34 = vld [vmem:[%s5109_s10 + $0x230] ss:$40 sps:$4 sm:$0xff]   ;;  %v3837_v36 = vld [vmem:[%s5109_s10 + $0x284] ss:$40 sps:$4 sm:$0xff]   ;;  %v3841_v38 = vld [vmem:[%s5109_s10 + $0x280] ss:$40 sps:$4 sm:$0xff]  }
  0xcb   : > { %2876 = vmatpush1.bf16.msra.mxu0 %v3806_v15  ;;  %2836 = vmatprep.subr.bf16.mxu1 %v3807_v16  ;;  %v3836_v35 = vld [vmem:[%s5109_s10 + $0x730] ss:$40 sps:$4 sm:$0xff]   ;;  %v3839_v37 = vld [vmem:[%s5109_s10 + $0x784] ss:$40 sps:$4 sm:$0xff]   ;;  %v3842_v39 = vld [vmem:[%s5109_s10 + $0x780] ss:$40 sps:$4 sm:$0xff]  }
  0xcc   : > { %2877 = vmatprep.subr.bf16.mxu0 %v3809_v17  ;;  %v3843_v40 = vld [vmem:[%s5109_s10 + $0x2d4] ss:$40 sps:$4 sm:$0xff]   ;;  %v3847_v42 = vld [vmem:[%s5109_s10 + $0x2d0] ss:$40 sps:$4 sm:$0xff]   ;;  %v3849_v44 = vld [vmem:[%s5109_s10 + $0x324] ss:$40 sps:$4 sm:$0xff]  }
  0xcd   : > { %v3845_v41 = vld [vmem:[%s5109_s10 + $0x7d4] ss:$40 sps:$4 sm:$0xff]   ;;  %v3848_v43 = vld [vmem:[%s5109_s10 + $0x7d0] ss:$40 sps:$4 sm:$0xff]   ;;  %v3851_v45 = vld [vmem:[%s5109_s10 + $0x824] ss:$40 sps:$4 sm:$0xff]  }
  0xce   : > { %2837 = vmatpush1.bf16.msra.mxu1 %v3811_v18  ;;  %v3853_v46 = vld [vmem:[%s5109_s10 + $0x320] ss:$40 sps:$4 sm:$0xff]   ;;  %v3855_v48 = vld [vmem:[%s5109_s10 + $0x374] ss:$40 sps:$4 sm:$0xff]   ;;  %v3859_v50 = vld [vmem:[%s5109_s10 + $0x370] ss:$40 sps:$4 sm:$0xff]  }
  0xcf   : > { %2878 = vmatpush1.bf16.msra.mxu0 %v3812_v19  ;;  %2838 = vmatprep.subr.bf16.mxu1 %v3813_v20  ;;  %v3854_v47 = vld [vmem:[%s5109_s10 + $0x820] ss:$40 sps:$4 sm:$0xff]   ;;  %v3857_v49 = vld [vmem:[%s5109_s10 + $0x874] ss:$40 sps:$4 sm:$0xff]   ;;  %v3860_v51 = vld [vmem:[%s5109_s10 + $0x870] ss:$40 sps:$4 sm:$0xff]  }
  0xd0   : > { %2879 = vmatprep.subr.bf16.mxu0 %v3815_v21  ;;  %v3861_v52 = vld [vmem:[%s5109_s10 + $0x3c4] ss:$40 sps:$4 sm:$0xff]   ;;  %v3865_v54 = vld [vmem:[%s5109_s10 + $0x3c0] ss:$40 sps:$4 sm:$0xff]   ;;  %v3867_v56 = vld [vmem:[%s5109_s10 + $0x414] ss:$40 sps:$4 sm:$0xff]  }
  0xd1   : > { %v3863_v53 = vld [vmem:[%s5109_s10 + $0x8c4] ss:$40 sps:$4 sm:$0xff]   ;;  %v3866_v55 = vld [vmem:[%s5109_s10 + $0x8c0] ss:$40 sps:$4 sm:$0xff]   ;;  %v3869_v57 = vld [vmem:[%s5109_s10 + $0x914] ss:$40 sps:$4 sm:$0xff]  }
  0xd2   : > { %2839 = vmatpush1.bf16.msra.mxu1 %v3817_v22  ;;  %v3871_v58 = vld [vmem:[%s5109_s10 + $0x410] ss:$40 sps:$4 sm:$0xff]   ;;  %v3873_v60 = vld [vmem:[%s5109_s10 + $0x464] ss:$40 sps:$4 sm:$0xff]   ;;  %v3877_v62 = vld [vmem:[%s5109_s10 + $0x460] ss:$40 sps:$4 sm:$0xff]  }
  0xd3   : > { %2880 = vmatpush1.bf16.msra.mxu0 %v3818_v23  ;;  %2840 = vmatprep.subr.bf16.mxu1 %v3819_v24  ;;  %v3872_v59 = vld [vmem:[%s5109_s10 + $0x910] ss:$40 sps:$4 sm:$0xff]   ;;  %v3875_v61 = vld [vmem:[%s5109_s10 + $0x964] ss:$40 sps:$4 sm:$0xff]   ;;  %v3878_v63 = vld [vmem:[%s5109_s10 + $0x960] ss:$40 sps:$4 sm:$0xff]  }
  0xd4   : > { %2881 = vmatprep.subr.bf16.mxu0 %v3821_v25  ;;  %v3879_v0 = vld [vmem:[%s5109_s10 + $0x4b4] ss:$40 sps:$4 sm:$0xff]   ;;  %v848_v4 = vld [vmem:[%s5556_s0] sm:$0xff]  ;;  %v3883_v6 = vld [vmem:[%s5109_s10 + $0x4b0] ss:$40 sps:$4 sm:$0xff]   ;;  %s5567_s24 = smov (!%p843_p13, %s842_s24), 39 }
  0xd5   : > { %v3881_v1 = vld [vmem:[%s5109_s10 + $0x9b4] ss:$40 sps:$4 sm:$0xff]   ;;  %v3884_v7 = vld [vmem:[%s5109_s10 + $0x9b0] ss:$40 sps:$4 sm:$0xff]   ;;  %v5183_v10 = vpack.c.bf16 %v848_v4, %v848_v4  ;;  %v3896_v15 = vld [vmem:[%s5109_s10 + $0x64] ss:$40 sps:$4 sm:$0xff]   ;;  %s5417_s27 = scalar_lea.vmem %s5558_s2, %s5567_s24 }
  0xd6   : > { %2841 = vmatpush1.bf16.msra.mxu1 %v3823_v26  ;;  %v850_v5 = vld [vmem:[%s5556_s0 + $0x10] sm:$0xff]  ;;  %v3893_v14 = vld [vmem:[%s5109_s10 + $0x5c] ss:$40 sps:$4 sm:$0xff]   ;;  %v3891_v16 = vld [vmem:[%s5109_s10 + $0x58] ss:$40 sps:$4 sm:$0xff]   ;;  %s5471_s29 = scalar_lea.vmem [#allocation3], %s3749_s28 }
  0xd7   : > { %2882 = vmatpush1.bf16.msra.mxu0 %v3824_v27  ;;  %2842 = vmatprep.subr.bf16.mxu1 %v3825_v28  ;;  %v3887_v8 = vld [vmem:[%s5109_s10 + $0xc] ss:$40 sps:$4 sm:$0xff]   ;;  %v5185_v11 = vpack.c.bf16 %v850_v5, %v850_v5  ;;  %v3885_v12 = vld [vmem:[%s5109_s10 + $0x8] ss:$40 sps:$4 sm:$0xff]   ;;  %v3905_v22 = vld [vmem:[%s5109_s10 + $0xfc] ss:$40 sps:$4 sm:$0xff]  }
  0xd8   : > { %2883 = vmatprep.subr.bf16.mxu0 %v3827_v29  ;;  %v3890_v9 = vld [vmem:[%s5109_s10 + $0x14] ss:$40 sps:$4 sm:$0xff]   ;;  %v3888_v13 = vld [vmem:[%s5109_s10 + $0x10] ss:$40 sps:$4 sm:$0xff]   ;;  %v3894_v17 = vld [vmem:[%s5109_s10 + $0x60] ss:$40 sps:$4 sm:$0xff]  }
  0xd9   : > { %v3899_v18 = vld [vmem:[%s5109_s10 + $0xac] ss:$40 sps:$4 sm:$0xff]   ;;  %v3897_v20 = vld [vmem:[%s5109_s10 + $0xa8] ss:$40 sps:$4 sm:$0xff]   ;;  %v3903_v24 = vld [vmem:[%s5109_s10 + $0xf8] ss:$40 sps:$4 sm:$0xff]  }
  0xda   : > { %2843 = vmatpush1.bf16.msra.mxu1 %v3829_v30  ;;  %v3902_v19 = vld [vmem:[%s5109_s10 + $0xb4] ss:$40 sps:$4 sm:$0xff]   ;;  %v3900_v21 = vld [vmem:[%s5109_s10 + $0xb0] ss:$40 sps:$4 sm:$0xff]   ;;  %v3908_v23 = vld [vmem:[%s5109_s10 + $0x104] ss:$40 sps:$4 sm:$0xff]  }
  0xdb   : > { %2884 = vmatpush1.bf16.msra.mxu0 %v3830_v31  ;;  %2844 = vmatprep.subr.bf16.mxu1 %v3831_v32  ;;  %v3906_v25 = vld [vmem:[%s5109_s10 + $0x100] ss:$40 sps:$4 sm:$0xff]   ;;  %v3911_v26 = vld [vmem:[%s5109_s10 + $0x14c] ss:$40 sps:$4 sm:$0xff]   ;;  %v3912_v29 = vld [vmem:[%s5109_s10 + $0x150] ss:$40 sps:$4 sm:$0xff]  }
  0xdc   : > { %2885 = vmatprep.subr.bf16.mxu0 %v3833_v33  ;;  %v3914_v27 = vld [vmem:[%s5109_s10 + $0x154] ss:$40 sps:$4 sm:$0xff]   ;;  %v3909_v28 = vld [vmem:[%s5109_s10 + $0x148] ss:$40 sps:$4 sm:$0xff]   ;;  %v3920_v31 = vld [vmem:[%s5109_s10 + $0x1a4] ss:$40 sps:$4 sm:$0xff]  }
  0xdd   : > { %v3917_v30 = vld [vmem:[%s5109_s10 + $0x19c] ss:$40 sps:$4 sm:$0xff]   ;;  %v3915_v32 = vld [vmem:[%s5109_s10 + $0x198] ss:$40 sps:$4 sm:$0xff]   ;;  %v3971_v4 = vld [vmem:[%s5109_s10 + $0x46c] ss:$40 sps:$4 sm:$0xff]  }
  0xde   : > { %2845 = vmatpush1.bf16.msra.mxu1 %v3835_v34  ;;  %v3918_v33 = vld [vmem:[%s5109_s10 + $0x1a0] ss:$40 sps:$4 sm:$0xff]   ;;  %v3923_v34 = vld [vmem:[%s5109_s10 + $0x1ec] ss:$40 sps:$4 sm:$0xff]   ;;  %s3315_s5 = sshll.u32 %s5471_s29, 4  ;;  %s3301_s16 = scalar_lea.sflag [#allocation4], %s5094_s4  ;;  %s5513_s5 = int_to_ptr.vmem [resolvable:$true] %s3315_s5 }
  0xdf   : > { %2886 = vmatpush1.bf16.msra.mxu0 %v3836_v35  ;;  %2846 = vmatprep.subr.bf16.mxu1 %v3837_v36  ;;  %v3926_v35 = vld [vmem:[%s5109_s10 + $0x1f4] ss:$40 sps:$4 sm:$0xff]   ;;  %v3921_v36 = vld [vmem:[%s5109_s10 + $0x1e8] ss:$40 sps:$4 sm:$0xff]   ;;  %s4309_s9 = scalar_lea.vmem %s5513_s5, 1280 }
  0xe0   : > { %2887 = vmatprep.subr.bf16.mxu0 %v3839_v37  ;;  %v3924_v37 = vld [vmem:[%s5109_s10 + $0x1f0] ss:$40 sps:$4 sm:$0xff]   ;;  %v3974_v5 = vld [vmem:[%s5109_s10 + $0x474] ss:$40 sps:$4 sm:$0xff]   ;;  %p4310_p0 = scmp.ne.s32.totalorder %s5513_s5, %s4309_s9 }
  0xe2   : > { %2847 = vmatpush1.bf16.msra.mxu1 %v3841_v38  ;;  %v3929_v38 = vld [vmem:[%s5109_s10 + $0x23c] ss:$40 sps:$4 sm:$0xff]   ;;  %p4311_p1 = pnand %p4310_p0, %p4433_p6 }
  0xe3   : > { %2888 = vmatpush1.bf16.msra.mxu0 %v3842_v39  ;;  %2848 = vmatprep.subr.bf16.mxu1 %v3843_v40  ;;  %v3932_v39 = vld [vmem:[%s5109_s10 + $0x244] ss:$40 sps:$4 sm:$0xff]   ;;  %v3927_v40 = vld [vmem:[%s5109_s10 + $0x238] ss:$40 sps:$4 sm:$0xff]  }
  0xe4   : > { %2889 = vmatprep.subr.bf16.mxu0 %v3845_v41  ;;  %v3930_v41 = vld [vmem:[%s5109_s10 + $0x240] ss:$40 sps:$4 sm:$0xff]   ;;  %p4312_p2 = pneg %p4311_p1 }
  0xe6   : > { %2849 = vmatpush1.bf16.msra.mxu1 %v3847_v42  ;;  %v3935_v42 = vld [vmem:[%s5109_s10 + $0x28c] ss:$40 sps:$4 sm:$0xff]  }
  0xe7   : > { %2890 = vmatpush1.bf16.msra.mxu0 %v3848_v43  ;;  %2850 = vmatprep.subr.bf16.mxu1 %v3849_v44  ;;  %v3938_v43 = vld [vmem:[%s5109_s10 + $0x294] ss:$40 sps:$4 sm:$0xff]   ;;  %v3933_v44 = vld [vmem:[%s5109_s10 + $0x288] ss:$40 sps:$4 sm:$0xff]  }
  0xe8   : > { %2891 = vmatprep.subr.bf16.mxu0 %v3851_v45  ;;  %v3936_v45 = vld [vmem:[%s5109_s10 + $0x290] ss:$40 sps:$4 sm:$0xff]  }
  0xea   : > { %2851 = vmatpush1.bf16.msra.mxu1 %v3853_v46  ;;  %v3941_v46 = vld [vmem:[%s5109_s10 + $0x2dc] ss:$40 sps:$4 sm:$0xff]  }
  0xeb   : > { %2892 = vmatpush1.bf16.msra.mxu0 %v3854_v47  ;;  %2852 = vmatprep.subr.bf16.mxu1 %v3855_v48  ;;  %v3944_v47 = vld [vmem:[%s5109_s10 + $0x2e4] ss:$40 sps:$4 sm:$0xff]   ;;  %v3939_v48 = vld [vmem:[%s5109_s10 + $0x2d8] ss:$40 sps:$4 sm:$0xff]  }
  0xec   : > { %2893 = vmatprep.subr.bf16.mxu0 %v3857_v49  ;;  %v3942_v49 = vld [vmem:[%s5109_s10 + $0x2e0] ss:$40 sps:$4 sm:$0xff]  }
  0xee   : > { %2853 = vmatpush1.bf16.msra.mxu1 %v3859_v50  ;;  %v3947_v50 = vld [vmem:[%s5109_s10 + $0x32c] ss:$40 sps:$4 sm:$0xff]  }
  0xef   : > { %2894 = vmatpush1.bf16.msra.mxu0 %v3860_v51  ;;  %2854 = vmatprep.subr.bf16.mxu1 %v3861_v52  ;;  %v3950_v51 = vld [vmem:[%s5109_s10 + $0x334] ss:$40 sps:$4 sm:$0xff]   ;;  %v3945_v52 = vld [vmem:[%s5109_s10 + $0x328] ss:$40 sps:$4 sm:$0xff]  }
  0xf0   : > { %2895 = vmatprep.subr.bf16.mxu0 %v3863_v53  ;;  %v3948_v53 = vld [vmem:[%s5109_s10 + $0x330] ss:$40 sps:$4 sm:$0xff]  }
  0xf2   : > { %2855 = vmatpush1.bf16.msra.mxu1 %v3865_v54  ;;  %v3953_v54 = vld [vmem:[%s5109_s10 + $0x37c] ss:$40 sps:$4 sm:$0xff]  }
  0xf3   : > { %2896 = vmatpush1.bf16.msra.mxu0 %v3866_v55  ;;  %2856 = vmatprep.subr.bf16.mxu1 %v3867_v56  ;;  %v3956_v55 = vld [vmem:[%s5109_s10 + $0x384] ss:$40 sps:$4 sm:$0xff]   ;;  %v3951_v56 = vld [vmem:[%s5109_s10 + $0x378] ss:$40 sps:$4 sm:$0xff]  }
  0xf4   : > { %2897 = vmatprep.subr.bf16.mxu0 %v3869_v57  ;;  %v3954_v57 = vld [vmem:[%s5109_s10 + $0x380] ss:$40 sps:$4 sm:$0xff]  }
  0xf6   : > { %2857 = vmatpush1.bf16.msra.mxu1 %v3871_v58  ;;  %v3959_v58 = vld [vmem:[%s5109_s10 + $0x3cc] ss:$40 sps:$4 sm:$0xff]  }
  0xf7   : > { %2898 = vmatpush1.bf16.msra.mxu0 %v3872_v59  ;;  %2858 = vmatprep.subr.bf16.mxu1 %v3873_v60  ;;  %v3962_v59 = vld [vmem:[%s5109_s10 + $0x3d4] ss:$40 sps:$4 sm:$0xff]   ;;  %v3957_v60 = vld [vmem:[%s5109_s10 + $0x3c8] ss:$40 sps:$4 sm:$0xff]  }
  0xf8   : > { %2899 = vmatprep.subr.bf16.mxu0 %v3875_v61  ;;  %v3960_v61 = vld [vmem:[%s5109_s10 + $0x3d0] ss:$40 sps:$4 sm:$0xff]  }
  0xfa   : > { %2859 = vmatpush1.bf16.msra.mxu1 %v3877_v62  ;;  %v3965_v62 = vld [vmem:[%s5109_s10 + $0x41c] ss:$40 sps:$4 sm:$0xff]  }
  0xfb   : > { %2900 = vmatpush1.bf16.msra.mxu0 %v3878_v63  ;;  %2860 = vmatprep.subr.bf16.mxu1 %v3879_v0  ;;  %v3968_v63 = vld [vmem:[%s5109_s10 + $0x424] ss:$40 sps:$4 sm:$0xff]   ;;  %v3963_v0 = vld [vmem:[%s5109_s10 + $0x418] ss:$40 sps:$4 sm:$0xff]  }
  0xfc   : > { %2901 = vmatprep.subr.bf16.mxu0 %v3881_v1  ;;  %v3966_v1 = vld [vmem:[%s5109_s10 + $0x420] ss:$40 sps:$4 sm:$0xff]  }
  0xfe   : > { %2861 = vmatpush1.bf16.msra.mxu1 %v3883_v6  ;;  %v3969_v6 = vld [vmem:[%s5109_s10 + $0x468] ss:$40 sps:$4 sm:$0xff]  }
  0xff   : > { %2902 = vmatpush1.bf16.msra.mxu0 %v3884_v7  ;;  %2912 = vmatprep.subr.bf16.mxu1 %v3887_v8  ;;  %v3972_v7 = vld [vmem:[%s5109_s10 + $0x470] ss:$40 sps:$4 sm:$0xff]   ;;  %v3977_v8 = vld [vmem:[%s5109_s10 + $0x4bc] ss:$40 sps:$4 sm:$0xff]  }
 0x100   : > { %2994 = vmatprep.subr.bf16.mxu0 %v3890_v9  ;;  %v3980_v9 = vld [vmem:[%s5109_s10 + $0x4c4] ss:$40 sps:$4 sm:$0xff]  }
 0x101   : > { %2863 = vmatmul.mubr.bf16.vlgmr.msra.gmra.mrb[0].mxu1 %v5183_v10 }
 0x102   : > { %2904 = vmatmul.mubr.bf16.vlgmr.msra.gmra.mrb[0].mxu0 %v5185_v11  ;;  %2913 = vmatpush1.bf16.msra.mxu1 %v3885_v12  ;;  %v3975_v12 = vld [vmem:[%s5109_s10 + $0x4b8] ss:$40 sps:$4 sm:$0xff]  }
 0x103   : > { %2995 = vmatpush1.bf16.msra.mxu0 %v3888_v13  ;;  %2914 = vmatprep.subr.bf16.mxu1 %v3893_v14  ;;  %v3978_v13 = vld [vmem:[%s5109_s10 + $0x4c0] ss:$40 sps:$4 sm:$0xff]   ;;  %v3983_v14 = vld [vmem:[%s5109_s10 + $0x50c] ss:$40 sps:$4 sm:$0xff]  }
 0x104   : > { %2996 = vmatprep.subr.bf16.mxu0 %v3896_v15  ;;  %2944 = vmatprep.mubr.bf16.mxu1 %v5103_v2  ;;  %v3986_v15 = vld [vmem:[%s5109_s10 + $0x514] ss:$40 sps:$4 sm:$0xff]  }
 0x105   : > { %3026 = vmatprep.mubr.bf16.mxu0 %v5103_v2 }
 0x106   : > { %2915 = vmatpush1.bf16.msra.mxu1 %v3891_v16  ;;  %v3981_v16 = vld [vmem:[%s5109_s10 + $0x508] ss:$40 sps:$4 sm:$0xff]  }
 0x107   : > { %2997 = vmatpush1.bf16.msra.mxu0 %v3894_v17  ;;  %2916 = vmatprep.subr.bf16.mxu1 %v3899_v18  ;;  %v3984_v17 = vld [vmem:[%s5109_s10 + $0x510] ss:$40 sps:$4 sm:$0xff]   ;;  %v3989_v18 = vld [vmem:[%s5109_s10 + $0x55c] ss:$40 sps:$4 sm:$0xff]  }
 0x108   : > { %2998 = vmatprep.subr.bf16.mxu0 %v3902_v19  ;;  %v3992_v19 = vld [vmem:[%s5109_s10 + $0x564] ss:$40 sps:$4 sm:$0xff]  }
 0x10a   : > { %2917 = vmatpush1.bf16.msra.mxu1 %v3897_v20  ;;  %v3987_v20 = vld [vmem:[%s5109_s10 + $0x558] ss:$40 sps:$4 sm:$0xff]  }
 0x10b   : > { %2999 = vmatpush1.bf16.msra.mxu0 %v3900_v21  ;;  %2918 = vmatprep.subr.bf16.mxu1 %v3905_v22  ;;  %v3990_v21 = vld [vmem:[%s5109_s10 + $0x560] ss:$40 sps:$4 sm:$0xff]   ;;  %v3995_v22 = vld [vmem:[%s5109_s10 + $0x5ac] ss:$40 sps:$4 sm:$0xff]  }
 0x10c   : > { %3000 = vmatprep.subr.bf16.mxu0 %v3908_v23  ;;  %v3998_v23 = vld [vmem:[%s5109_s10 + $0x5b4] ss:$40 sps:$4 sm:$0xff]  }
 0x10e   : > { %2919 = vmatpush1.bf16.msra.mxu1 %v3903_v24  ;;  %v3993_v24 = vld [vmem:[%s5109_s10 + $0x5a8] ss:$40 sps:$4 sm:$0xff]  }
 0x10f   : > { %3001 = vmatpush1.bf16.msra.mxu0 %v3906_v25  ;;  %2920 = vmatprep.subr.bf16.mxu1 %v3911_v26  ;;  %v3996_v25 = vld [vmem:[%s5109_s10 + $0x5b0] ss:$40 sps:$4 sm:$0xff]   ;;  %v4001_v26 = vld [vmem:[%s5109_s10 + $0x5fc] ss:$40 sps:$4 sm:$0xff]  }
 0x110   : > { %3002 = vmatprep.subr.bf16.mxu0 %v3914_v27  ;;  %v4004_v27 = vld [vmem:[%s5109_s10 + $0x604] ss:$40 sps:$4 sm:$0xff]  }
 0x112   : > { %2921 = vmatpush1.bf16.msra.mxu1 %v3909_v28  ;;  %v3999_v28 = vld [vmem:[%s5109_s10 + $0x5f8] ss:$40 sps:$4 sm:$0xff]  }
 0x113   : > { %3003 = vmatpush1.bf16.msra.mxu0 %v3912_v29  ;;  %2922 = vmatprep.subr.bf16.mxu1 %v3917_v30  ;;  %v4002_v29 = vld [vmem:[%s5109_s10 + $0x600] ss:$40 sps:$4 sm:$0xff]   ;;  %v4007_v30 = vld [vmem:[%s5109_s10 + $0x64c] ss:$40 sps:$4 sm:$0xff]  }
 0x114   : > { %3004 = vmatprep.subr.bf16.mxu0 %v3920_v31  ;;  %v4010_v31 = vld [vmem:[%s5109_s10 + $0x654] ss:$40 sps:$4 sm:$0xff]  }
 0x116   : > { %2923 = vmatpush1.bf16.msra.mxu1 %v3915_v32  ;;  %v4005_v32 = vld [vmem:[%s5109_s10 + $0x648] ss:$40 sps:$4 sm:$0xff]  }
 0x117   : > { %3005 = vmatpush1.bf16.msra.mxu0 %v3918_v33  ;;  %2924 = vmatprep.subr.bf16.mxu1 %v3923_v34  ;;  %v4008_v33 = vld [vmem:[%s5109_s10 + $0x650] ss:$40 sps:$4 sm:$0xff]   ;;  %v4013_v34 = vld [vmem:[%s5109_s10 + $0x69c] ss:$40 sps:$4 sm:$0xff]  }
 0x118   : > { %3006 = vmatprep.subr.bf16.mxu0 %v3926_v35  ;;  %v4016_v35 = vld [vmem:[%s5109_s10 + $0x6a4] ss:$40 sps:$4 sm:$0xff]  }
 0x11a   : > { %2925 = vmatpush1.bf16.msra.mxu1 %v3921_v36  ;;  %v4011_v36 = vld [vmem:[%s5109_s10 + $0x698] ss:$40 sps:$4 sm:$0xff]  }
 0x11b   : > { %3007 = vmatpush1.bf16.msra.mxu0 %v3924_v37  ;;  %2926 = vmatprep.subr.bf16.mxu1 %v3929_v38  ;;  %v4014_v37 = vld [vmem:[%s5109_s10 + $0x6a0] ss:$40 sps:$4 sm:$0xff]   ;;  %v4019_v38 = vld [vmem:[%s5109_s10 + $0x6ec] ss:$40 sps:$4 sm:$0xff]  }
 0x11c   : > { %3008 = vmatprep.subr.bf16.mxu0 %v3932_v39  ;;  %v4022_v39 = vld [vmem:[%s5109_s10 + $0x6f4] ss:$40 sps:$4 sm:$0xff]  }
 0x11e   : > { %2927 = vmatpush1.bf16.msra.mxu1 %v3927_v40  ;;  %v4017_v40 = vld [vmem:[%s5109_s10 + $0x6e8] ss:$40 sps:$4 sm:$0xff]  }
 0x11f   : > { %3009 = vmatpush1.bf16.msra.mxu0 %v3930_v41  ;;  %2928 = vmatprep.subr.bf16.mxu1 %v3935_v42  ;;  %v4020_v41 = vld [vmem:[%s5109_s10 + $0x6f0] ss:$40 sps:$4 sm:$0xff]   ;;  %v4025_v42 = vld [vmem:[%s5109_s10 + $0x73c] ss:$40 sps:$4 sm:$0xff]  }
 0x120   : > { %3010 = vmatprep.subr.bf16.mxu0 %v3938_v43  ;;  %v4028_v43 = vld [vmem:[%s5109_s10 + $0x744] ss:$40 sps:$4 sm:$0xff]  }
 0x122   : > { %2929 = vmatpush1.bf16.msra.mxu1 %v3933_v44  ;;  %v4023_v44 = vld [vmem:[%s5109_s10 + $0x738] ss:$40 sps:$4 sm:$0xff]  }
 0x123   : > { %3011 = vmatpush1.bf16.msra.mxu0 %v3936_v45  ;;  %2930 = vmatprep.subr.bf16.mxu1 %v3941_v46  ;;  %v4026_v45 = vld [vmem:[%s5109_s10 + $0x740] ss:$40 sps:$4 sm:$0xff]   ;;  %v4031_v46 = vld [vmem:[%s5109_s10 + $0x78c] ss:$40 sps:$4 sm:$0xff]  }
 0x124   : > { %3012 = vmatprep.subr.bf16.mxu0 %v3944_v47  ;;  %v4034_v47 = vld [vmem:[%s5109_s10 + $0x794] ss:$40 sps:$4 sm:$0xff]  }
 0x126   : > { %2931 = vmatpush1.bf16.msra.mxu1 %v3939_v48  ;;  %v4029_v48 = vld [vmem:[%s5109_s10 + $0x788] ss:$40 sps:$4 sm:$0xff]  }
 0x127   : > { %3013 = vmatpush1.bf16.msra.mxu0 %v3942_v49  ;;  %2932 = vmatprep.subr.bf16.mxu1 %v3947_v50  ;;  %v4032_v49 = vld [vmem:[%s5109_s10 + $0x790] ss:$40 sps:$4 sm:$0xff]   ;;  %v4037_v50 = vld [vmem:[%s5109_s10 + $0x7dc] ss:$40 sps:$4 sm:$0xff]  }
 0x128   : > { %3014 = vmatprep.subr.bf16.mxu0 %v3950_v51  ;;  %v4040_v51 = vld [vmem:[%s5109_s10 + $0x7e4] ss:$40 sps:$4 sm:$0xff]  }
 0x12a   : > { %2933 = vmatpush1.bf16.msra.mxu1 %v3945_v52  ;;  %v4035_v52 = vld [vmem:[%s5109_s10 + $0x7d8] ss:$40 sps:$4 sm:$0xff]  }
 0x12b   : > { %3015 = vmatpush1.bf16.msra.mxu0 %v3948_v53  ;;  %2934 = vmatprep.subr.bf16.mxu1 %v3953_v54  ;;  %v4038_v53 = vld [vmem:[%s5109_s10 + $0x7e0] ss:$40 sps:$4 sm:$0xff]   ;;  %v4043_v54 = vld [vmem:[%s5109_s10 + $0x82c] ss:$40 sps:$4 sm:$0xff]  }
 0x12c   : > { %3016 = vmatprep.subr.bf16.mxu0 %v3956_v55  ;;  %v4046_v55 = vld [vmem:[%s5109_s10 + $0x834] ss:$40 sps:$4 sm:$0xff]  }
 0x12e   : > { %2935 = vmatpush1.bf16.msra.mxu1 %v3951_v56  ;;  %v4041_v56 = vld [vmem:[%s5109_s10 + $0x828] ss:$40 sps:$4 sm:$0xff]  }
 0x12f   : > { %3017 = vmatpush1.bf16.msra.mxu0 %v3954_v57  ;;  %2936 = vmatprep.subr.bf16.mxu1 %v3959_v58  ;;  %v4044_v57 = vld [vmem:[%s5109_s10 + $0x830] ss:$40 sps:$4 sm:$0xff]   ;;  %v4049_v58 = vld [vmem:[%s5109_s10 + $0x87c] ss:$40 sps:$4 sm:$0xff]  }
 0x130   : > { %3018 = vmatprep.subr.bf16.mxu0 %v3962_v59  ;;  %v4052_v59 = vld [vmem:[%s5109_s10 + $0x884] ss:$40 sps:$4 sm:$0xff]  }
 0x132   : > { %2937 = vmatpush1.bf16.msra.mxu1 %v3957_v60  ;;  %v4047_v60 = vld [vmem:[%s5109_s10 + $0x878] ss:$40 sps:$4 sm:$0xff]  }
 0x133   : > { %3019 = vmatpush1.bf16.msra.mxu0 %v3960_v61  ;;  %2938 = vmatprep.subr.bf16.mxu1 %v3965_v62  ;;  %v4050_v61 = vld [vmem:[%s5109_s10 + $0x880] ss:$40 sps:$4 sm:$0xff]   ;;  %v4055_v62 = vld [vmem:[%s5109_s10 + $0x8cc] ss:$40 sps:$4 sm:$0xff]  }
 0x134   : > { %3020 = vmatprep.subr.bf16.mxu0 %v3968_v63  ;;  %v4058_v63 = vld [vmem:[%s5109_s10 + $0x8d4] ss:$40 sps:$4 sm:$0xff]  }
 0x136   : > { %2939 = vmatpush1.bf16.msra.mxu1 %v3963_v0  ;;  %v4053_v0 = vld [vmem:[%s5109_s10 + $0x8c8] ss:$40 sps:$4 sm:$0xff]  }
 0x137   : > { %3021 = vmatpush1.bf16.msra.mxu0 %v3966_v1  ;;  %2940 = vmatprep.subr.bf16.mxu1 %v3971_v4  ;;  %v4056_v1 = vld [vmem:[%s5109_s10 + $0x8d0] ss:$40 sps:$4 sm:$0xff]   ;;  %v4061_v4 = vld [vmem:[%s5109_s10 + $0x91c] ss:$40 sps:$4 sm:$0xff]  }
 0x138   : > { %3022 = vmatprep.subr.bf16.mxu0 %v3974_v5  ;;  %v4064_v5 = vld [vmem:[%s5109_s10 + $0x924] ss:$40 sps:$4 sm:$0xff]  }
 0x13a   : > { %2941 = vmatpush1.bf16.msra.mxu1 %v3969_v6  ;;  %v4059_v6 = vld [vmem:[%s5109_s10 + $0x918] ss:$40 sps:$4 sm:$0xff]  }
 0x13b   : > { %3023 = vmatpush1.bf16.msra.mxu0 %v3972_v7  ;;  %2942 = vmatprep.subr.bf16.mxu1 %v3977_v8  ;;  %v4062_v7 = vld [vmem:[%s5109_s10 + $0x920] ss:$40 sps:$4 sm:$0xff]   ;;  %v4067_v8 = vld [vmem:[%s5109_s10 + $0x96c] ss:$40 sps:$4 sm:$0xff]  }
 0x13c   : > { %3024 = vmatprep.subr.bf16.mxu0 %v3980_v9  ;;  %v4070_v9 = vld [vmem:[%s5109_s10 + $0x974] ss:$40 sps:$4 sm:$0xff]  }
 0x13e   : > { %2943 = vmatpush1.bf16.msra.mxu1 %v3975_v12  ;;  %v4065_v12 = vld [vmem:[%s5109_s10 + $0x968] ss:$40 sps:$4 sm:$0xff]  }
 0x13f   : > { %3025 = vmatpush1.bf16.msra.mxu0 %v3978_v13  ;;  %2953 = vmatprep.subr.bf16.mxu1 %v3983_v14  ;;  %v4068_v13 = vld [vmem:[%s5109_s10 + $0x970] ss:$40 sps:$4 sm:$0xff]   ;;  %v4073_v14 = vld [vmem:[%s5109_s10 + $0x9bc] ss:$40 sps:$4 sm:$0xff]  }
 0x140   : > { %3035 = vmatprep.subr.bf16.mxu0 %v3986_v15  ;;  %v4076_v15 = vld [vmem:[%s5109_s10 + $0x9c4] ss:$40 sps:$4 sm:$0xff]  }
 0x141   : > { %2945 = vmatmul.mubr.bf16.vlgmr.msra.gmra.mrb[4].mxu1 %v5183_v10 }
 0x142   : > { %3027 = vmatmul.mubr.bf16.vlgmr.msra.gmra.mrb[4].mxu0 %v5183_v10  ;;  %2954 = vmatpush1.bf16.msra.mxu1 %v3981_v16  ;;  %v4071_v16 = vld [vmem:[%s5109_s10 + $0x9b8] ss:$40 sps:$4 sm:$0xff]  }
 0x143   : > { %3036 = vmatpush1.bf16.msra.mxu0 %v3984_v17  ;;  %2955 = vmatprep.subr.bf16.mxu1 %v3989_v18  ;;  %v4074_v17 = vld [vmem:[%s5109_s10 + $0x9c0] ss:$40 sps:$4 sm:$0xff]   ;;  %v4079_v18 = vld [vmem:[%s5109_s10 + $0x1c] ss:$40 sps:$4 sm:$0xff]  }
 0x144   : > { %3037 = vmatprep.subr.bf16.mxu0 %v3992_v19  ;;  %2985 = vmatprep.mubr.bf16.mxu1 %v5105_v3  ;;  %v4082_v19 = vld [vmem:[%s5109_s10 + $0x24] ss:$40 sps:$4 sm:$0xff]  }
 0x145   : > { %3067 = vmatprep.mubr.bf16.mxu0 %v5105_v3 }
 0x146   : > { %2956 = vmatpush1.bf16.msra.mxu1 %v3987_v20  ;;  %v4077_v20 = vld [vmem:[%s5109_s10 + $0x18] ss:$40 sps:$4 sm:$0xff]  }
 0x147   : > { %3038 = vmatpush1.bf16.msra.mxu0 %v3990_v21  ;;  %2957 = vmatprep.subr.bf16.mxu1 %v3995_v22  ;;  %v4080_v21 = vld [vmem:[%s5109_s10 + $0x20] ss:$40 sps:$4 sm:$0xff]   ;;  %v4085_v22 = vld [vmem:[%s5109_s10 + $0x6c] ss:$40 sps:$4 sm:$0xff]  }
 0x148   : > { %3039 = vmatprep.subr.bf16.mxu0 %v3998_v23  ;;  %v4088_v23 = vld [vmem:[%s5109_s10 + $0x74] ss:$40 sps:$4 sm:$0xff]  }
 0x14a   : > { %2958 = vmatpush1.bf16.msra.mxu1 %v3993_v24  ;;  %v4083_v24 = vld [vmem:[%s5109_s10 + $0x68] ss:$40 sps:$4 sm:$0xff]  }
 0x14b   : > { %3040 = vmatpush1.bf16.msra.mxu0 %v3996_v25  ;;  %2959 = vmatprep.subr.bf16.mxu1 %v4001_v26  ;;  %v4086_v25 = vld [vmem:[%s5109_s10 + $0x70] ss:$40 sps:$4 sm:$0xff]   ;;  %v4091_v26 = vld [vmem:[%s5109_s10 + $0xbc] ss:$40 sps:$4 sm:$0xff]  }
 0x14c   : > { %3041 = vmatprep.subr.bf16.mxu0 %v4004_v27  ;;  %v4094_v27 = vld [vmem:[%s5109_s10 + $0xc4] ss:$40 sps:$4 sm:$0xff]  }
 0x14e   : > { %2960 = vmatpush1.bf16.msra.mxu1 %v3999_v28  ;;  %v4089_v28 = vld [vmem:[%s5109_s10 + $0xb8] ss:$40 sps:$4 sm:$0xff]  }
 0x14f   : > { %3042 = vmatpush1.bf16.msra.mxu0 %v4002_v29  ;;  %2961 = vmatprep.subr.bf16.mxu1 %v4007_v30  ;;  %v4092_v29 = vld [vmem:[%s5109_s10 + $0xc0] ss:$40 sps:$4 sm:$0xff]   ;;  %v4097_v30 = vld [vmem:[%s5109_s10 + $0x10c] ss:$40 sps:$4 sm:$0xff]  }
 0x150   : > { %3043 = vmatprep.subr.bf16.mxu0 %v4010_v31  ;;  %v4100_v31 = vld [vmem:[%s5109_s10 + $0x114] ss:$40 sps:$4 sm:$0xff]  }
 0x152   : > { %2962 = vmatpush1.bf16.msra.mxu1 %v4005_v32  ;;  %v4095_v32 = vld [vmem:[%s5109_s10 + $0x108] ss:$40 sps:$4 sm:$0xff]  }
 0x153   : > { %3044 = vmatpush1.bf16.msra.mxu0 %v4008_v33  ;;  %2963 = vmatprep.subr.bf16.mxu1 %v4013_v34  ;;  %v4098_v33 = vld [vmem:[%s5109_s10 + $0x110] ss:$40 sps:$4 sm:$0xff]   ;;  %v4106_v34 = vld [vmem:[%s5109_s10 + $0x164] ss:$40 sps:$4 sm:$0xff]  }
 0x154   : > { %3045 = vmatprep.subr.bf16.mxu0 %v4016_v35  ;;  %v4101_v35 = vld [vmem:[%s5109_s10 + $0x158] ss:$40 sps:$4 sm:$0xff]  }
 0x156   : > { %2964 = vmatpush1.bf16.msra.mxu1 %v4011_v36  ;;  %v4104_v36 = vld [vmem:[%s5109_s10 + $0x160] ss:$40 sps:$4 sm:$0xff]  }
 0x157   : > { %3046 = vmatpush1.bf16.msra.mxu0 %v4014_v37  ;;  %2965 = vmatprep.subr.bf16.mxu1 %v4019_v38  ;;  %v4109_v37 = vld [vmem:[%s5109_s10 + $0x1ac] ss:$40 sps:$4 sm:$0xff]  }
 0x158   : > { %3047 = vmatprep.subr.bf16.mxu0 %v4022_v39  ;;  %v4112_v38 = vld [vmem:[%s5109_s10 + $0x1b4] ss:$40 sps:$4 sm:$0xff]   ;;  %v4107_v39 = vld [vmem:[%s5109_s10 + $0x1a8] ss:$40 sps:$4 sm:$0xff]  }
 0x15a   : > { %2966 = vmatpush1.bf16.msra.mxu1 %v4017_v40  ;;  %v4110_v40 = vld [vmem:[%s5109_s10 + $0x1b0] ss:$40 sps:$4 sm:$0xff]  }
 0x15b   : > { %3048 = vmatpush1.bf16.msra.mxu0 %v4020_v41  ;;  %2967 = vmatprep.subr.bf16.mxu1 %v4025_v42  ;;  %v4115_v41 = vld [vmem:[%s5109_s10 + $0x1fc] ss:$40 sps:$4 sm:$0xff]  }
 0x15c   : > { %3049 = vmatprep.subr.bf16.mxu0 %v4028_v43  ;;  %v4118_v42 = vld [vmem:[%s5109_s10 + $0x204] ss:$40 sps:$4 sm:$0xff]   ;;  %v4113_v43 = vld [vmem:[%s5109_s10 + $0x1f8] ss:$40 sps:$4 sm:$0xff]  }
 0x15e   : > { %2968 = vmatpush1.bf16.msra.mxu1 %v4023_v44  ;;  %v4116_v44 = vld [vmem:[%s5109_s10 + $0x200] ss:$40 sps:$4 sm:$0xff]  }
 0x15f   : > { %3050 = vmatpush1.bf16.msra.mxu0 %v4026_v45  ;;  %2969 = vmatprep.subr.bf16.mxu1 %v4031_v46  ;;  %v4121_v45 = vld [vmem:[%s5109_s10 + $0x24c] ss:$40 sps:$4 sm:$0xff]  }
 0x160   : > { %3051 = vmatprep.subr.bf16.mxu0 %v4034_v47  ;;  %v4124_v46 = vld [vmem:[%s5109_s10 + $0x254] ss:$40 sps:$4 sm:$0xff]   ;;  %v4119_v47 = vld [vmem:[%s5109_s10 + $0x248] ss:$40 sps:$4 sm:$0xff]  }
 0x162   : > { %2970 = vmatpush1.bf16.msra.mxu1 %v4029_v48  ;;  %v4122_v48 = vld [vmem:[%s5109_s10 + $0x250] ss:$40 sps:$4 sm:$0xff]  }
 0x163   : > { %3052 = vmatpush1.bf16.msra.mxu0 %v4032_v49  ;;  %2971 = vmatprep.subr.bf16.mxu1 %v4037_v50  ;;  %v4127_v49 = vld [vmem:[%s5109_s10 + $0x29c] ss:$40 sps:$4 sm:$0xff]  }
 0x164   : > { %3053 = vmatprep.subr.bf16.mxu0 %v4040_v51  ;;  %v4130_v50 = vld [vmem:[%s5109_s10 + $0x2a4] ss:$40 sps:$4 sm:$0xff]   ;;  %v4125_v51 = vld [vmem:[%s5109_s10 + $0x298] ss:$40 sps:$4 sm:$0xff]  }
 0x166   : > { %2972 = vmatpush1.bf16.msra.mxu1 %v4035_v52  ;;  %v4128_v52 = vld [vmem:[%s5109_s10 + $0x2a0] ss:$40 sps:$4 sm:$0xff]  }
 0x167   : > { %3054 = vmatpush1.bf16.msra.mxu0 %v4038_v53  ;;  %2973 = vmatprep.subr.bf16.mxu1 %v4043_v54  ;;  %v4133_v53 = vld [vmem:[%s5109_s10 + $0x2ec] ss:$40 sps:$4 sm:$0xff]  }
 0x168   : > { %3055 = vmatprep.subr.bf16.mxu0 %v4046_v55  ;;  %v4136_v54 = vld [vmem:[%s5109_s10 + $0x2f4] ss:$40 sps:$4 sm:$0xff]   ;;  %v4131_v55 = vld [vmem:[%s5109_s10 + $0x2e8] ss:$40 sps:$4 sm:$0xff]  }
 0x16a   : > { %2974 = vmatpush1.bf16.msra.mxu1 %v4041_v56  ;;  %v4134_v56 = vld [vmem:[%s5109_s10 + $0x2f0] ss:$40 sps:$4 sm:$0xff]  }
 0x16b   : > { %3056 = vmatpush1.bf16.msra.mxu0 %v4044_v57  ;;  %2975 = vmatprep.subr.bf16.mxu1 %v4049_v58  ;;  %v4139_v57 = vld [vmem:[%s5109_s10 + $0x33c] ss:$40 sps:$4 sm:$0xff]  }
 0x16c   : > { %3057 = vmatprep.subr.bf16.mxu0 %v4052_v59  ;;  %v4142_v58 = vld [vmem:[%s5109_s10 + $0x344] ss:$40 sps:$4 sm:$0xff]   ;;  %v4137_v59 = vld [vmem:[%s5109_s10 + $0x338] ss:$40 sps:$4 sm:$0xff]  }
 0x16e   : > { %2976 = vmatpush1.bf16.msra.mxu1 %v4047_v60  ;;  %v4140_v60 = vld [vmem:[%s5109_s10 + $0x340] ss:$40 sps:$4 sm:$0xff]  }
 0x16f   : > { %3058 = vmatpush1.bf16.msra.mxu0 %v4050_v61  ;;  %2977 = vmatprep.subr.bf16.mxu1 %v4055_v62  ;;  %v4145_v61 = vld [vmem:[%s5109_s10 + $0x38c] ss:$40 sps:$4 sm:$0xff]  }
 0x170   : > { %3059 = vmatprep.subr.bf16.mxu0 %v4058_v63  ;;  %v4148_v62 = vld [vmem:[%s5109_s10 + $0x394] ss:$40 sps:$4 sm:$0xff]   ;;  %v4143_v63 = vld [vmem:[%s5109_s10 + $0x388] ss:$40 sps:$4 sm:$0xff]  }
 0x172   : > { %2978 = vmatpush1.bf16.msra.mxu1 %v4053_v0  ;;  %v4146_v0 = vld [vmem:[%s5109_s10 + $0x390] ss:$40 sps:$4 sm:$0xff]  }
 0x173   : > { %3060 = vmatpush1.bf16.msra.mxu0 %v4056_v1  ;;  %2979 = vmatprep.subr.bf16.mxu1 %v4061_v4  ;;  %v4151_v1 = vld [vmem:[%s5109_s10 + $0x3dc] ss:$40 sps:$4 sm:$0xff]  }
 0x174   : > { %3061 = vmatprep.subr.bf16.mxu0 %v4064_v5  ;;  %v4154_v4 = vld [vmem:[%s5109_s10 + $0x3e4] ss:$40 sps:$4 sm:$0xff]   ;;  %v4149_v5 = vld [vmem:[%s5109_s10 + $0x3d8] ss:$40 sps:$4 sm:$0xff]  }
 0x176   : > { %2980 = vmatpush1.bf16.msra.mxu1 %v4059_v6  ;;  %v4152_v6 = vld [vmem:[%s5109_s10 + $0x3e0] ss:$40 sps:$4 sm:$0xff]  }
 0x177   : > { %3062 = vmatpush1.bf16.msra.mxu0 %v4062_v7  ;;  %2981 = vmatprep.subr.bf16.mxu1 %v4067_v8  ;;  %v4157_v7 = vld [vmem:[%s5109_s10 + $0x42c] ss:$40 sps:$4 sm:$0xff]  }
 0x178   : > { %3063 = vmatprep.subr.bf16.mxu0 %v4070_v9  ;;  %v4160_v8 = vld [vmem:[%s5109_s10 + $0x434] ss:$40 sps:$4 sm:$0xff]   ;;  %v4155_v9 = vld [vmem:[%s5109_s10 + $0x428] ss:$40 sps:$4 sm:$0xff]  }
 0x17a   : > { %2982 = vmatpush1.bf16.msra.mxu1 %v4065_v12  ;;  %v4158_v12 = vld [vmem:[%s5109_s10 + $0x430] ss:$40 sps:$4 sm:$0xff]  }
 0x17b   : > { %3064 = vmatpush1.bf16.msra.mxu0 %v4068_v13  ;;  %2983 = vmatprep.subr.bf16.mxu1 %v4073_v14  ;;  %v4163_v13 = vld [vmem:[%s5109_s10 + $0x47c] ss:$40 sps:$4 sm:$0xff]  }
 0x17c   : > { %3065 = vmatprep.subr.bf16.mxu0 %v4076_v15  ;;  %v4166_v14 = vld [vmem:[%s5109_s10 + $0x484] ss:$40 sps:$4 sm:$0xff]   ;;  %v4161_v15 = vld [vmem:[%s5109_s10 + $0x478] ss:$40 sps:$4 sm:$0xff]  }
 0x17e   : > { %2984 = vmatpush1.bf16.msra.mxu1 %v4071_v16  ;;  %v4164_v16 = vld [vmem:[%s5109_s10 + $0x480] ss:$40 sps:$4 sm:$0xff]  }
 0x17f   : > { %3066 = vmatpush1.bf16.msra.mxu0 %v4074_v17  ;;  %3076 = vmatprep.subr.bf16.mxu1 %v4079_v18  ;;  %v4169_v17 = vld [vmem:[%s5109_s10 + $0x4cc] ss:$40 sps:$4 sm:$0xff]  }
 0x180   : > { %3158 = vmatprep.subr.bf16.mxu0 %v4082_v19  ;;  %v4172_v18 = vld [vmem:[%s5109_s10 + $0x4d4] ss:$40 sps:$4 sm:$0xff]   ;;  %v4167_v19 = vld [vmem:[%s5109_s10 + $0x4c8] ss:$40 sps:$4 sm:$0xff]  }
 0x181   : > { %2986 = vmatmul.mubr.bf16.vlgmr.msra.gmra.mrb[4].mxu1 %v5185_v11 }
 0x182   : > { %3068 = vmatmul.mubr.bf16.vlgmr.msra.gmra.mrb[4].mxu0 %v5185_v11  ;;  %3077 = vmatpush1.bf16.msra.mxu1 %v4077_v20  ;;  %v4170_v20 = vld [vmem:[%s5109_s10 + $0x4d0] ss:$40 sps:$4 sm:$0xff]  }
 0x183   : > { %3159 = vmatpush1.bf16.msra.mxu0 %v4080_v21  ;;  %3078 = vmatprep.subr.bf16.mxu1 %v4085_v22  ;;  %v4175_v21 = vld [vmem:[%s5109_s10 + $0x51c] ss:$40 sps:$4 sm:$0xff]  }
 0x184   : > { %3160 = vmatprep.subr.bf16.mxu0 %v4088_v23  ;;  %3108 = vmatprep.mubr.bf16.mxu1 %v5103_v2  ;;  %v4178_v22 = vld [vmem:[%s5109_s10 + $0x524] ss:$40 sps:$4 sm:$0xff]   ;;  %v4173_v23 = vld [vmem:[%s5109_s10 + $0x518] ss:$40 sps:$4 sm:$0xff]  }
 0x185   : > { %3190 = vmatprep.mubr.bf16.mxu0 %v5103_v2  ;;  %v4103_v2 = vld [vmem:[%s5109_s10 + $0x15c] ss:$40 sps:$4 sm:$0xff]  }
 0x186   : > { %3079 = vmatpush1.bf16.msra.mxu1 %v4083_v24  ;;  %v4176_v24 = vld [vmem:[%s5109_s10 + $0x520] ss:$40 sps:$4 sm:$0xff]  }
 0x187   : > { %3161 = vmatpush1.bf16.msra.mxu0 %v4086_v25  ;;  %3080 = vmatprep.subr.bf16.mxu1 %v4091_v26  ;;  %v4181_v25 = vld [vmem:[%s5109_s10 + $0x56c] ss:$40 sps:$4 sm:$0xff]  }
 0x188   : > { %3162 = vmatprep.subr.bf16.mxu0 %v4094_v27  ;;  %v4184_v26 = vld [vmem:[%s5109_s10 + $0x574] ss:$40 sps:$4 sm:$0xff]   ;;  %v4179_v27 = vld [vmem:[%s5109_s10 + $0x568] ss:$40 sps:$4 sm:$0xff]  }
 0x18a   : > { %3081 = vmatpush1.bf16.msra.mxu1 %v4089_v28  ;;  %v4182_v28 = vld [vmem:[%s5109_s10 + $0x570] ss:$40 sps:$4 sm:$0xff]  }
 0x18b   : > { %3163 = vmatpush1.bf16.msra.mxu0 %v4092_v29  ;;  %3082 = vmatprep.subr.bf16.mxu1 %v4097_v30  ;;  %v4187_v29 = vld [vmem:[%s5109_s10 + $0x5bc] ss:$40 sps:$4 sm:$0xff]  }
 0x18c   : > { %3164 = vmatprep.subr.bf16.mxu0 %v4100_v31  ;;  %v4190_v30 = vld [vmem:[%s5109_s10 + $0x5c4] ss:$40 sps:$4 sm:$0xff]   ;;  %v1180_v31 = vlaneseq }
 0x18e   : > { %3083 = vmatpush1.bf16.msra.mxu1 %v4095_v32  ;;  %v4188_v32 = vld [vmem:[%s5109_s10 + $0x5c0] ss:$40 sps:$4 sm:$0xff]  }
 0x18f   : > { %3165 = vmatpush1.bf16.msra.mxu0 %v4098_v33  ;;  %3084 = vmatprep.subr.bf16.mxu1 %v4103_v2  ;;  %v4193_v33 = vld [vmem:[%s5109_s10 + $0x60c] ss:$40 sps:$4 sm:$0xff]  }
 0x190   : > { %3166 = vmatprep.subr.bf16.mxu0 %v4106_v34  ;;  %v4196_v2 = vld [vmem:[%s5109_s10 + $0x614] ss:$40 sps:$4 sm:$0xff]   ;;  %v5408_v34 = vshrl.u32 %v1180_v31, 7  ;;  %v4239_v31 = vld [vmem:[%s5109_s10 + $0x888] ss:$40 sps:$4 sm:$0xff]  }
 0x192   : > { %3085 = vmatpush1.bf16.msra.mxu1 %v4101_v35  ;;  %v4191_v35 = vld [vmem:[%s5109_s10 + $0x608] ss:$40 sps:$4 sm:$0xff]  }
 0x193   : > { %3167 = vmatpush1.bf16.msra.mxu0 %v4104_v36  ;;  %3086 = vmatprep.subr.bf16.mxu1 %v4109_v37  ;;  %v4199_v36 = vld [vmem:[%s5109_s10 + $0x65c] ss:$40 sps:$4 sm:$0xff]  }
 0x194   : > { %3168 = vmatprep.subr.bf16.mxu0 %v4112_v38  ;;  %v4202_v37 = vld [vmem:[%s5109_s10 + $0x664] ss:$40 sps:$4 sm:$0xff]   ;;  %v1182_v38 = vsub.s32 0, %v5408_v34 }
 0x196   : > { %3087 = vmatpush1.bf16.msra.mxu1 %v4107_v39  ;;  %v4197_v39 = vld [vmem:[%s5109_s10 + $0x658] ss:$40 sps:$4 sm:$0xff]  }
 0x197   : > { %3169 = vmatpush1.bf16.msra.mxu0 %v4110_v40  ;;  %3088 = vmatprep.subr.bf16.mxu1 %v4115_v41  ;;  %v4200_v40 = vld [vmem:[%s5109_s10 + $0x660] ss:$40 sps:$4 sm:$0xff]  }
 0x198   : > { %3170 = vmatprep.subr.bf16.mxu0 %v4118_v42  ;;  %v5423_v41 = vld [vmem:[%s5417_s27] sm:$0xff]  ;;  %v1186_v42 = vsub.s32 1, %v5408_v34 }
 0x19a   : > { %3089 = vmatpush1.bf16.msra.mxu1 %v4113_v43  ;;  %v4205_v43 = vld [vmem:[%s5109_s10 + $0x6ac] ss:$40 sps:$4 sm:$0xff]  }
 0x19b   : > { %3171 = vmatpush1.bf16.msra.mxu0 %v4116_v44  ;;  %3090 = vmatprep.subr.bf16.mxu1 %v4121_v45  ;;  %v4208_v44 = vld [vmem:[%s5109_s10 + $0x6b4] ss:$40 sps:$4 sm:$0xff]   ;;  %v1183_v45 = vrot.slane %v5423_v41, %v1182_v38 }
 0x19c   : > { %3172 = vmatprep.subr.bf16.mxu0 %v4124_v46  ;;  %v1187_v46 = vrot.slane %v5423_v41, %v1186_v42 }
 0x19e   : > { %3091 = vmatpush1.bf16.msra.mxu1 %v4119_v47  ;;  %v4203_v47 = vld [vmem:[%s5109_s10 + $0x6a8] ss:$40 sps:$4 sm:$0xff]  }
 0x19f   : > { %3173 = vmatpush1.bf16.msra.mxu0 %v4122_v48  ;;  %3092 = vmatprep.subr.bf16.mxu1 %v4127_v49  ;;  %v4206_v48 = vld [vmem:[%s5109_s10 + $0x6b0] ss:$40 sps:$4 sm:$0xff]   ;;  %v4211_v49 = vld [vmem:[%s5109_s10 + $0x6fc] ss:$40 sps:$4 sm:$0xff]  }
 0x1a0   : > { %3174 = vmatprep.subr.bf16.mxu0 %v4130_v50  ;;  %v4214_v50 = vld [vmem:[%s5109_s10 + $0x704] ss:$40 sps:$4 sm:$0xff]  }
 0x1a2   : > { %3093 = vmatpush1.bf16.msra.mxu1 %v4125_v51 }
 0x1a3   : > { %3175 = vmatpush1.bf16.msra.mxu0 %v4128_v52  ;;  %3094 = vmatprep.subr.bf16.mxu1 %v4133_v53 }
 0x1a4   : > { %3176 = vmatprep.subr.bf16.mxu0 %v4136_v54 }
 0x1a6   : > { %3095 = vmatpush1.bf16.msra.mxu1 %v4131_v55 }
 0x1a7   : > { %3177 = vmatpush1.bf16.msra.mxu0 %v4134_v56  ;;  %3096 = vmatprep.subr.bf16.mxu1 %v4139_v57 }
 0x1a8   : > { %3178 = vmatprep.subr.bf16.mxu0 %v4142_v58 }
 0x1aa   : > { %3097 = vmatpush1.bf16.msra.mxu1 %v4137_v59  ;;  %v4209_v59 = vld [vmem:[%s5109_s10 + $0x6f8] ss:$40 sps:$4 sm:$0xff]  }
 0x1ab   : > { %3179 = vmatpush1.bf16.msra.mxu0 %v4140_v60  ;;  %3098 = vmatprep.subr.bf16.mxu1 %v4145_v61  ;;  %v4212_v60 = vld [vmem:[%s5109_s10 + $0x700] ss:$40 sps:$4 sm:$0xff]  }
 0x1ac   : > { %3180 = vmatprep.subr.bf16.mxu0 %v4148_v62 }
 0x1ae   : > { %3099 = vmatpush1.bf16.msra.mxu1 %v4143_v63 }
 0x1af   : > { %3181 = vmatpush1.bf16.msra.mxu0 %v4146_v0  ;;  %3100 = vmatprep.subr.bf16.mxu1 %v4151_v1  ;;  %v4217_v0 = vld [vmem:[%s5109_s10 + $0x74c] ss:$40 sps:$4 sm:$0xff]  }
 0x1b0   : > { %3182 = vmatprep.subr.bf16.mxu0 %v4154_v4  ;;  %v4220_v1 = vld [vmem:[%s5109_s10 + $0x754] ss:$40 sps:$4 sm:$0xff]  }
 0x1b2   : > { %3101 = vmatpush1.bf16.msra.mxu1 %v4149_v5 }
 0x1b3   : > { %3183 = vmatpush1.bf16.msra.mxu0 %v4152_v6  ;;  %3102 = vmatprep.subr.bf16.mxu1 %v4157_v7  ;;  %v4215_v7 = vld [vmem:[%s5109_s10 + $0x748] ss:$40 sps:$4 sm:$0xff]  }
 0x1b4   : > { %3184 = vmatprep.subr.bf16.mxu0 %v4160_v8  ;;  %v4218_v8 = vld [vmem:[%s5109_s10 + $0x750] ss:$40 sps:$4 sm:$0xff]  }
 0x1b6   : > { %3103 = vmatpush1.bf16.msra.mxu1 %v4155_v9 }
 0x1b7   : > { %3185 = vmatpush1.bf16.msra.mxu0 %v4158_v12  ;;  %3104 = vmatprep.subr.bf16.mxu1 %v4163_v13  ;;  %v4223_v12 = vld [vmem:[%s5109_s10 + $0x79c] ss:$40 sps:$4 sm:$0xff]  }
 0x1b8   : > { %3186 = vmatprep.subr.bf16.mxu0 %v4166_v14  ;;  %v4226_v13 = vld [vmem:[%s5109_s10 + $0x7a4] ss:$40 sps:$4 sm:$0xff]  }
 0x1ba   : > { %3105 = vmatpush1.bf16.msra.mxu1 %v4161_v15  ;;  %v4221_v15 = vld [vmem:[%s5109_s10 + $0x798] ss:$40 sps:$4 sm:$0xff]  }
 0x1bb   : > { %3187 = vmatpush1.bf16.msra.mxu0 %v4164_v16  ;;  %3106 = vmatprep.subr.bf16.mxu1 %v4169_v17  ;;  %v4224_v16 = vld [vmem:[%s5109_s10 + $0x7a0] ss:$40 sps:$4 sm:$0xff]   ;;  %v4229_v17 = vld [vmem:[%s5109_s10 + $0x7ec] ss:$40 sps:$4 sm:$0xff]  }
 0x1bc   : > { %3188 = vmatprep.subr.bf16.mxu0 %v4172_v18  ;;  %v4232_v18 = vld [vmem:[%s5109_s10 + $0x7f4] ss:$40 sps:$4 sm:$0xff]  }
 0x1be   : > { %3107 = vmatpush1.bf16.msra.mxu1 %v4167_v19  ;;  %v4227_v19 = vld [vmem:[%s5109_s10 + $0x7e8] ss:$40 sps:$4 sm:$0xff]  }
 0x1bf   : > { %3189 = vmatpush1.bf16.msra.mxu0 %v4170_v20  ;;  %3117 = vmatprep.subr.bf16.mxu1 %v4175_v21  ;;  %v4230_v20 = vld [vmem:[%s5109_s10 + $0x7f0] ss:$40 sps:$4 sm:$0xff]   ;;  %v4235_v21 = vld [vmem:[%s5109_s10 + $0x83c] ss:$40 sps:$4 sm:$0xff]  }
 0x1c0   : > { %3199 = vmatprep.subr.bf16.mxu0 %v4178_v22  ;;  %v4238_v22 = vld [vmem:[%s5109_s10 + $0x844] ss:$40 sps:$4 sm:$0xff]  }
 0x1c1   : > { %3109 = vmatmul.mubr.bf16.vlgmr.msra.gmra.mrb[8].mxu1 %v5183_v10 }
 0x1c2   : > { %3191 = vmatmul.mubr.bf16.vlgmr.msra.gmra.mrb[8].mxu0 %v5183_v10  ;;  %3118 = vmatpush1.bf16.msra.mxu1 %v4173_v23  ;;  %v4185_v10 = vld [vmem:[%s5109_s10 + $0x5b8] ss:$40 sps:$4 sm:$0xff]  }
 0x1c3   : > { %3200 = vmatpush1.bf16.msra.mxu0 %v4176_v24  ;;  %3119 = vmatprep.subr.bf16.mxu1 %v4181_v25  ;;  %v4233_v23 = vld [vmem:[%s5109_s10 + $0x838] ss:$40 sps:$4 sm:$0xff]  }
 0x1c4   : > { %3201 = vmatprep.subr.bf16.mxu0 %v4184_v26  ;;  %3149 = vmatprep.mubr.bf16.mxu1 %v5105_v3  ;;  %v4236_v24 = vld [vmem:[%s5109_s10 + $0x840] ss:$40 sps:$4 sm:$0xff]   ;;  %v4241_v26 = vld [vmem:[%s5109_s10 + $0x88c] ss:$40 sps:$4 sm:$0xff]  }
 0x1c5   : > { %3231 = vmatprep.mubr.bf16.mxu0 %v5105_v3  ;;  %v4194_v3 = vld [vmem:[%s5109_s10 + $0x610] ss:$40 sps:$4 sm:$0xff]  }
 0x1c6   : > { %3120 = vmatpush1.bf16.msra.mxu1 %v4179_v27  ;;  %v4244_v27 = vld [vmem:[%s5109_s10 + $0x894] ss:$40 sps:$4 sm:$0xff]  }
 0x1c7   : > { %3202 = vmatpush1.bf16.msra.mxu0 %v4182_v28  ;;  %3121 = vmatprep.subr.bf16.mxu1 %v4187_v29 }
 0x1c8   : > { %3203 = vmatprep.subr.bf16.mxu0 %v4190_v30 }
 0x1ca   : > { %3122 = vmatpush1.bf16.msra.mxu1 %v4185_v10  ;;  %v4242_v10 = vld [vmem:[%s5109_s10 + $0x890] ss:$40 sps:$4 sm:$0xff]  }
 0x1cb   : > { %3204 = vmatpush1.bf16.msra.mxu0 %v4188_v32  ;;  %3123 = vmatprep.subr.bf16.mxu1 %v4193_v33  ;;  %v4247_v32 = vld [vmem:[%s5109_s10 + $0x8dc] ss:$40 sps:$4 sm:$0xff]  }
 0x1cc   : > { %3205 = vmatprep.subr.bf16.mxu0 %v4196_v2  ;;  %v4250_v33 = vld [vmem:[%s5109_s10 + $0x8e4] ss:$40 sps:$4 sm:$0xff]   ;;  %v4245_v2 = vld [vmem:[%s5109_s10 + $0x8d8] ss:$40 sps:$4 sm:$0xff]  }
 0x1ce   : > { %3124 = vmatpush1.bf16.msra.mxu1 %v4191_v35  ;;  %v4248_v35 = vld [vmem:[%s5109_s10 + $0x8e0] ss:$40 sps:$4 sm:$0xff]  }
 0x1cf   : > { %3206 = vmatpush1.bf16.msra.mxu0 %v4194_v3  ;;  %3125 = vmatprep.subr.bf16.mxu1 %v4199_v36  ;;  %v4253_v3 = vld [vmem:[%s5109_s10 + $0x92c] ss:$40 sps:$4 sm:$0xff]  }
 0x1d0   : > { %3207 = vmatprep.subr.bf16.mxu0 %v4202_v37  ;;  %v4256_v36 = vld [vmem:[%s5109_s10 + $0x934] ss:$40 sps:$4 sm:$0xff]   ;;  %v4251_v37 = vld [vmem:[%s5109_s10 + $0x928] ss:$40 sps:$4 sm:$0xff]  }
 0x1d2   : > { %3126 = vmatpush1.bf16.msra.mxu1 %v4197_v39  ;;  %v4254_v39 = vld [vmem:[%s5109_s10 + $0x930] ss:$40 sps:$4 sm:$0xff]  }
 0x1d3   : > { %3208 = vmatpush1.bf16.msra.mxu0 %v4200_v40  ;;  %3127 = vmatprep.subr.bf16.mxu1 %v4205_v43  ;;  %v4259_v40 = vld [vmem:[%s5109_s10 + $0x97c] ss:$40 sps:$4 sm:$0xff]  }
 0x1d4   : > { %3209 = vmatprep.subr.bf16.mxu0 %v4208_v44  ;;  %v2864_v51 = vpop.f32.mrb[0].mxu1  ;;  %v4262_v43 = vld [vmem:[%s5109_s10 + $0x984] ss:$40 sps:$4 sm:$0xff]  }
 0x1d5   : > { %v2905_v52 = vpop.f32.mrb[0].mxu0  ;;  %v2865_v53 = vadd.f32 %v2864_v51, %v1183_v45  ;;  %v2866_v54 = vpop.f32.mrb[1].mxu1  ;;  %v4266_v51 = vld [vmem:[%s5109_s10 + $0x9d0] ss:$40 sps:$4 sm:$0xff]  }
 0x1d6   : > { %v2907_v55 = vpop.f32.mrb[1].mxu0  ;;  %v2867_v56 = vadd.f32 %v2866_v54, %v1187_v46  ;;  %v2868_v57 = vpop.f32.mrb[2].mxu1  ;;  %3128 = vmatpush1.bf16.msra.mxu1 %v4203_v47  ;;  %v4257_v46 = vld [vmem:[%s5109_s10 + $0x978] ss:$40 sps:$4 sm:$0xff]   ;;  %v1194_v54 = vsub.s32 3, %v5408_v34 }
 0x1d7   : > { %v2909_v58 = vpop.f32.mrb[2].mxu0  ;;  %3210 = vmatpush1.bf16.msra.mxu0 %v4206_v48  ;;  %v2906_v61 = vadd.f32 %v2905_v52, %v2865_v53  ;;  %v2869_v62 = vpop.f32.mrb[3].mxu1  ;;  %3129 = vmatprep.subr.bf16.mxu1 %v4211_v49  ;;  %v4260_v47 = vld [vmem:[%s5109_s10 + $0x980] ss:$40 sps:$4 sm:$0xff]   ;;  %v4265_v48 = vld [vmem:[%s5109_s10 + $0x9cc] ss:$40 sps:$4 sm:$0xff]  }
 0x1d8   : > { %v2910_v63 = vpop.f32.mrb[3].mxu0  ;;  %3211 = vmatprep.subr.bf16.mxu0 %v4214_v50  ;;  %v2908_v4 = vadd.f32 %v2907_v55, %v2867_v56  ;;  %v4268_v49 = vld [vmem:[%s5109_s10 + $0x9d4] ss:$40 sps:$4 sm:$0xff]   ;;  %v4263_v50 = vld [vmem:[%s5109_s10 + $0x9c8] ss:$40 sps:$4 sm:$0xff]   ;;  %v1190_v52 = vsub.s32 2, %v5408_v34  ;;  %v1195_v58 = vrot.slane %v5423_v41, %v1194_v54 }
 0x1d9   : > { %v3240_v5 = vsub.f32 0.0, %v2906_v61  ;;  %v1198_v53 = vsub.s32 4, %v5408_v34  ;;  %v1202_v55 = vsub.s32 5, %v5408_v34  ;;  %s4373_s10 = smov [#allocation3]  }
 0x1da   : > { %v3241_v6 = vsub.f32 0.0, %v2908_v4  ;;  %3130 = vmatpush1.bf16.msra.mxu1 %v4209_v59  ;;  %v1191_v56 = vrot.slane %v5423_v41, %v1190_v52  ;;  %s4313_s11 = sshll.u32 %s4373_s10, 4  ;;  %s4314_s11 = int_to_ptr.vmem [resolvable:$false] %s4313_s11 }
 0x1db   : > { %3212 = vmatpush1.bf16.msra.mxu0 %v4212_v60  ;;  %v3250_v9 = vmul.f32 1.442695, %v3240_v5  ;;  %3131 = vmatprep.subr.bf16.mxu1 %v4217_v0  ;;  %v1199_v57 = vrot.slane %v5423_v41, %v1198_v53  ;;  %v1203_v59 = vrot.slane %v5423_v41, %v1202_v55  ;;  %s4315_s17 = scalar_lea.vmem %s4314_s11, 2560  ;;  %p4316_p3 = scmp.lt.s32.totalorder %s5513_s5, %s4314_s11 }
 0x1dc   : > { %3213 = vmatprep.subr.bf16.mxu0 %v4220_v1  ;;  %v3252_v14 = vmul.f32 1.442695, %v3241_v6  ;;  %p4317_p4 = scmp.lt.s32.totalorder %s4315_s17, %s4309_s9 }
 0x1dd   : > { %4269 = vpow2.f32 %v3250_v9 }
 0x1de   : > { %4271 = vpow2.f32 %v3252_v14  ;;  %3132 = vmatpush1.bf16.msra.mxu1 %v4215_v7  ;;  %p4318_p5 = por %p4317_p4, %p4316_p3 }
 0x1df   : > { %3214 = vmatpush1.bf16.msra.mxu0 %v4218_v8  ;;  %3133 = vmatprep.subr.bf16.mxu1 %v4223_v12 }
 0x1e0   : > { %3215 = vmatprep.subr.bf16.mxu0 %v4226_v13  ;;  %p4319_p7 = pnand %p4318_p5, %p4312_p2 }
 0x1e2   : > { %3134 = vmatpush1.bf16.msra.mxu1 %v4221_v15 }
 0x1e3   : > { %3216 = vmatpush1.bf16.msra.mxu0 %v4224_v16  ;;  %3135 = vmatprep.subr.bf16.mxu1 %v4229_v17 }
 0x1e4   : > { %3217 = vmatprep.subr.bf16.mxu0 %v4232_v18 }
 0x1e6   : > { %3136 = vmatpush1.bf16.msra.mxu1 %v4227_v19 }
 0x1e7   : > { %3218 = vmatpush1.bf16.msra.mxu0 %v4230_v20  ;;  %v4270_v25 = vpop.eup %4269  ;;  %3137 = vmatprep.subr.bf16.mxu1 %v4235_v21 }
 0x1e8   : > { %3219 = vmatprep.subr.bf16.mxu0 %v4238_v22  ;;  %v4272_v28 = vpop.eup %4271  ;;  %v3270_v29 = vadd.f32 1.0, %v4270_v25 }
 0x1e9   : > { %v3271_v30 = vadd.f32 1.0, %v4272_v28 }
 0x1ea   : > { %4273 = vrcp.f32 %v3270_v29  ;;  %3138 = vmatpush1.bf16.msra.mxu1 %v4233_v23 }
 0x1eb   : > { %3220 = vmatpush1.bf16.msra.mxu0 %v4236_v24  ;;  %4275 = vrcp.f32 %v3271_v30  ;;  %3139 = vmatprep.subr.bf16.mxu1 %v4241_v26 }
 0x1ec   : > { %3221 = vmatprep.subr.bf16.mxu0 %v4244_v27 }
 0x1ee   : > { %3140 = vmatpush1.bf16.msra.mxu1 %v4239_v31  ;;  %v1206_v31 = vsub.s32 6, %v5408_v34 }
 0x1ef   : > { %3222 = vmatpush1.bf16.msra.mxu0 %v4242_v10  ;;  %3141 = vmatprep.subr.bf16.mxu1 %v4247_v32  ;;  %v1177_v10 = vld [vmem:[%s5417_s27 + $0x8] sm:$0x3]  ;;  %v1210_v32 = vsub.s32 7, %v5408_v34 }
 0x1f0   : > { %3223 = vmatprep.subr.bf16.mxu0 %v4250_v33  ;;  %v1207_v33 = vrot.slane %v5423_v41, %v1206_v31 }
 0x1f2   : > { %3142 = vmatpush1.bf16.msra.mxu1 %v4245_v2  ;;  %v1215_v2 = vrot.slane %v1177_v10, %v1182_v38 }
 0x1f3   : > { %3224 = vmatpush1.bf16.msra.mxu0 %v4248_v35  ;;  %3143 = vmatprep.subr.bf16.mxu1 %v4253_v3  ;;  %v1211_v35 = vrot.slane %v5423_v41, %v1210_v32  ;;  %v1219_v3 = vrot.slane %v1177_v10, %v1186_v42 }
 0x1f4   : > { %3225 = vmatprep.subr.bf16.mxu0 %v4256_v36  ;;  %v4274_v44 = vpop.eup %4273 }
 0x1f5   : > { %v4276_v45 = vpop.eup %4275  ;;  %3290 = vst [vmem:[%s5471_s29] sm:$0xff] %v4274_v44 }
 0x1f6   : > { %3291 = vst [vmem:[%s5471_s29 + $0x8] sm:$0xff] %v4276_v45  ;;  %3144 = vmatpush1.bf16.msra.mxu1 %v4251_v37 }
 0x1f7   : > { %3226 = vmatpush1.bf16.msra.mxu0 %v4254_v39  ;;  %3145 = vmatprep.subr.bf16.mxu1 %v4259_v40 }
 0x1f8   : > { %3227 = vmatprep.subr.bf16.mxu0 %v4262_v43 }
 0x1fa   : > { %3146 = vmatpush1.bf16.msra.mxu1 %v4257_v46 }
 0x1fb   : > { %3228 = vmatpush1.bf16.msra.mxu0 %v4260_v47  ;;  %3147 = vmatprep.subr.bf16.mxu1 %v4265_v48 }
 0x1fc   : > { %3229 = vmatprep.subr.bf16.mxu0 %v4268_v49 }
 0x1fe   : > { %3148 = vmatpush1.bf16.msra.mxu1 %v4263_v50 }
 0x1ff   : > { %3230 = vmatpush1.bf16.msra.mxu0 %v4266_v51 }
 0x201   : > { %3150 = vmatmul.mubr.bf16.vlgmr.msra.gmra.mrb[8].mxu1 %v5185_v11 }
 0x202   : > { %3232 = vmatmul.mubr.bf16.vlgmr.msra.gmra.mrb[8].mxu0 %v5185_v11 }
 0x254   : > { %v2987_v60 = vpop.f32.mrb[4].mxu1 }
 0x255   : > { %v3069_v61 = vpop.f32.mrb[4].mxu0  ;;  %v3723_v62 = vadd.f32 %v2987_v60, %v1191_v56  ;;  %v2989_v63 = vpop.f32.mrb[5].mxu1 }
 0x256   : > { %v3725_v11 = vadd.f32 %v3069_v61, %v1199_v57  ;;  %v3071_v0 = vpop.f32.mrb[5].mxu0  ;;  %v3724_v1 = vadd.f32 %v2989_v63, %v1195_v58  ;;  %v2991_v5 = vpop.f32.mrb[6].mxu1 }
 0x257   : > { %v3726_v4 = vadd.f32 %v3071_v0, %v1203_v59  ;;  %v3073_v6 = vpop.f32.mrb[6].mxu0  ;;  %v3242_v7 = vsub.f32 0.0, %v3723_v62  ;;  %v2992_v9 = vpop.f32.mrb[7].mxu1 }
 0x258   : > { %v3244_v8 = vsub.f32 0.0, %v3725_v11  ;;  %v3074_v12 = vpop.f32.mrb[7].mxu0  ;;  %v3243_v13 = vsub.f32 0.0, %v3724_v1 }
 0x259   : > { %v3245_v14 = vsub.f32 0.0, %v3726_v4  ;;  %v3254_v15 = vmul.f32 1.442695, %v3242_v7 }
 0x25a   : > { %v3258_v16 = vmul.f32 1.442695, %v3244_v8  ;;  %v3256_v17 = vmul.f32 1.442695, %v3243_v13 }
 0x25b   : > { %v3260_v18 = vmul.f32 1.442695, %v3245_v14  ;;  %4277 = vpow2.f32 %v3254_v15 }
 0x25c   : > { %4279 = vpow2.f32 %v3258_v16 }
 0x25d   : > { %4281 = vpow2.f32 %v3256_v17 }
 0x25e   : > { %4283 = vpow2.f32 %v3260_v18 }
 0x265   : > { %v4278_v19 = vpop.eup %4277 }
 0x266   : > { %v4280_v20 = vpop.eup %4279  ;;  %v3272_v21 = vadd.f32 1.0, %v4278_v19 }
 0x267   : > { %v4282_v22 = vpop.eup %4281  ;;  %v3274_v23 = vadd.f32 1.0, %v4280_v20 }
 0x268   : > { %v4284_v24 = vpop.eup %4283  ;;  %4285 = vrcp.f32 %v3272_v21  ;;  %v3273_v25 = vadd.f32 1.0, %v4282_v22 }
 0x269   : > { %4287 = vrcp.f32 %v3274_v23  ;;  %v3275_v26 = vadd.f32 1.0, %v4284_v24 }
 0x26a   : > { %4289 = vrcp.f32 %v3273_v25 }
 0x26b   : > { %4291 = vrcp.f32 %v3275_v26 }
 0x272   : > { %v4286_v27 = vpop.eup %4285 }
 0x273   : > { %v4288_v28 = vpop.eup %4287  ;;  %3292 = vst [vmem:[%s5471_s29 + $0x10] sm:$0xff] %v4286_v27 }
 0x274   : > { %v4290_v29 = vpop.eup %4289  ;;  %3294 = vst [vmem:[%s5471_s29 + $0x20] sm:$0xff] %v4288_v28 }
 0x275   : > { %v4292_v30 = vpop.eup %4291  ;;  %3293 = vst [vmem:[%s5471_s29 + $0x18] sm:$0xff] %v4290_v29 }
 0x276   : > { %3295 = vst [vmem:[%s5471_s29 + $0x28] sm:$0xff] %v4292_v30 }
 0x2d4   : > { %v3151_v36 = vpop.f32.mrb[8].mxu1 }
 0x2d5   : > { %v3233_v37 = vpop.f32.mrb[8].mxu0  ;;  %v3727_v39 = vadd.f32 %v3151_v36, %v1207_v33  ;;  %v3153_v43 = vpop.f32.mrb[9].mxu1 }
 0x2d6   : > { %v3729_v40 = vadd.f32 %v3233_v37, %v1215_v2  ;;  %v3235_v44 = vpop.f32.mrb[9].mxu0  ;;  %v3728_v45 = vadd.f32 %v3153_v43, %v1211_v35  ;;  %v3155_v47 = vpop.f32.mrb[10].mxu1 }
 0x2d7   : > { %v3730_v46 = vadd.f32 %v3235_v44, %v1219_v3  ;;  %v3237_v48 = vpop.f32.mrb[10].mxu0  ;;  %v3246_v49 = vsub.f32 0.0, %v3727_v39  ;;  %v3156_v51 = vpop.f32.mrb[11].mxu1 }
 0x2d8   : > { %v3248_v50 = vsub.f32 0.0, %v3729_v40  ;;  %v3238_v52 = vpop.f32.mrb[11].mxu0  ;;  %v3247_v38 = vsub.f32 0.0, %v3728_v45 }
 0x2d9   : > { %v3249_v53 = vsub.f32 0.0, %v3730_v46  ;;  %v3262_v41 = vmul.f32 1.442695, %v3246_v49 }
 0x2da   : > { %v3266_v54 = vmul.f32 1.442695, %v3248_v50  ;;  %v3264_v34 = vmul.f32 1.442695, %v3247_v38 }
 0x2db   : > { %v3268_v42 = vmul.f32 1.442695, %v3249_v53  ;;  %4293 = vpow2.f32 %v3262_v41 }
 0x2dc   : > { %4295 = vpow2.f32 %v3266_v54 }
 0x2dd   : > { %4297 = vpow2.f32 %v3264_v34 }
 0x2de   : > { %4299 = vpow2.f32 %v3268_v42 }
 0x2e5   : > { %v4294_v55 = vpop.eup %4293 }
 0x2e6   : > { %v4296_v56 = vpop.eup %4295  ;;  %v3276_v57 = vadd.f32 1.0, %v4294_v55 }
 0x2e7   : > { %v4298_v58 = vpop.eup %4297  ;;  %v3278_v59 = vadd.f32 1.0, %v4296_v56 }
 0x2e8   : > { %v4300_v60 = vpop.eup %4299  ;;  %4301 = vrcp.f32 %v3276_v57  ;;  %v3277_v61 = vadd.f32 1.0, %v4298_v58 }
 0x2e9   : > { %4303 = vrcp.f32 %v3278_v59  ;;  %v3279_v62 = vadd.f32 1.0, %v4300_v60 }
 0x2ea   : > { %4305 = vrcp.f32 %v3277_v61 }
 0x2eb   : > { %4307 = vrcp.f32 %v3279_v62 }
 0x2f2   : > { %v4302_v11 = vpop.eup %4301 }
 0x2f3   : > { %v4304_v63 = vpop.eup %4303  ;;  %3296 = vst [vmem:[%s5471_s29 + $0x30] sm:$0xff] %v4302_v11 }
 0x2f4   : > { %v4306_v0 = vpop.eup %4305  ;;  %3298 = vst [vmem:[%s5471_s29 + $0x40] sm:$0xff] %v4304_v63 }
 0x2f5   : > { %v4308_v1 = vpop.eup %4307  ;;  %3297 = vst [vmem:[%s5471_s29 + $0x38] sm:$0xff] %v4306_v0 }
 0x2f6   : > { %3299 = vst [vmem:[%s5471_s29 + $0x48] sm:$0xff] %v4308_v1 }
 0x2f7   : > { %4322 = shalt.err (!%p4319_p7)
}
 0x2f8   : > { %s4323_s4 = scalar_lea.hbm %s5511_s8, 1280  ;;  %s4327_s24 = scalar_lea.hbm %s5559_s3, 5120 }
 0x2f9   : > { %p4324_p9 = scmp.ne.s32.totalorder %s5511_s8, %s4323_s4  ;;  %p4328_p12 = scmp.lt.u32.totalorder %s5511_s8, %s5559_s3 }
 0x2fa   : > { %p4329_p13 = scmp.lt.u32.totalorder %s4327_s24, %s4323_s4  ;;  %p4331_p1 = scmp.lt.u32.totalorder %s4323_s4, %s5511_s8 }
 0x2fb   : > { %p4325_p10 = pnand %p4324_p9, %p4433_p6 }
 0x2fc   : > { %p4330_p0 = por %p4329_p13, %p4328_p12 }
 0x2fd   : > { %p4326_p11 = pneg %p4325_p10 }
 0x2fe   : > { %p4332_p2 = por %p4331_p1, %p4330_p0 }
 0x300   : > { %p4333_p3 = pnand %p4332_p2, %p4326_p11 }
 0x302   : > { %4336 = shalt.err (!%p4333_p3)
}
 0x303   : > { %3750 = dma.vmem_to_hbm [thread:$0]  (%p4433_p6), %s5513_s5, 1280, %s5511_s8, %s3301_s16  }
 0x304 PF: > { %p3756_p4 = scmp.ge.s32.totalorder %s4371_s15, 2  ;;  %s3327_s27 = sand.u32 1, %s4359_s12  }
 0x305   : > { %s3328_s28 = scalar_lea.sflag [#allocation4], %s3327_s27 }
 0x306   : > { %p3753_p5 = pnand %p3756_p4, %p4437_p8 }
 0x308   : > { %4354 = dma.done.wait (!%p3753_p5), %s3328_s28, 1280  }
 0x309   : > { %4356 = vsyncadd (!%p3753_p5), %s3328_s28, 4294966016  ;;  %p13_p7 = scmp.ge.s32.totalorder %s4419_s18, 6   ;;  %s5562_s12 = smov %s4363_s13 }
 0x30a   : > { %s5563_s13 = smov %s4367_s14  ;;  %s5564_s14 = smov %s4431_s21 }
 0x30b   : > { %s5565_s15 = smov %s4419_s18  ;;  %15 = sbr.rel (!%p13_p7) target bundleno = 3 (0x3), region = 98 }
 0x312   :  { %3333 = vsyncpa [#allocation4], 1 }
 0x313   :  { %3335 = vsyncpa [#allocation4 + $0x1], 1 }

// kernel: autoencoder_forward.2
= control target key start
LH: loop header
LB: loop body
LE: loop exit
PB: predicated region body
PF: predicated region fallthrough
CT: control target
= control target key end

     0   :  { %s6420_s0 = inlined_call_operand.vmem [shape: f32[8,5120], index: 0, kind: input, shape index: {}]   ;;  %s6421_s1 = inlined_call_operand.hbm [shape: bf16[5120,512], index: 1, kind: input, shape index: {}]   ;;  %s6422_s2 = inlined_call_operand.hbm [shape: f32[1,512], index: 2, kind: input, shape index: {}]   ;;  %s6423_s3 = inlined_call_operand.hbm [shape: bf16[512,128], index: 3, kind: input, shape index: {}]   ;;  %s6424_s4 = inlined_call_operand.hbm [shape: f32[1,128], index: 4, kind: input, shape index: {}]   ;;  %s6425_s5 = inlined_call_operand.hbm [shape: bf16[128,128], index: 5, kind: input, shape index: {}]   ;;  %s6426_s6 = inlined_call_operand.hbm [shape: f32[1,128], index: 6, kind: input, shape index: {}]   ;;  %s6427_s7 = inlined_call_operand.hbm [shape: bf16[128,128], index: 7, kind: input, shape index: {}]   ;;  %s6428_s8 = inlined_call_operand.hbm [shape: f32[1,128], index: 8, kind: input, shape index: {}]   ;;  %s6429_s9 = inlined_call_operand.hbm [shape: bf16[128,512], index: 9, kind: input, shape index: {}]   ;;  %s6430_s10 = inlined_call_operand.hbm [shape: f32[1,512], index: 10, kind: input, shape index: {}]   ;;  %s6431_s11 = inlined_call_operand.vmem [shape: f32[8,512], index: 11, kind: output, shape index: {}]  }
   0x1   :  { %6435 = sst [smem:[#allocation25_spill]] %s6420_s0 }
   0x2   :  { %6436 = sst [smem:[#allocation26_spill]] %s6422_s2 }
   0x3   :  { %6437 = sst [smem:[#allocation27_spill]] %s6424_s4 }
   0x4   :  { %6438 = sst [smem:[#allocation28_spill]] %s6426_s6 }
   0x5   :  { %6439 = sst [smem:[#allocation29_spill]] %s6431_s11 }
   0x6   :  { %16 = vsyncpa [#allocation4], 0 }
   0x7   :  { %18 = vsyncpa [#allocation4 + $0x1], 0 }
   0x8   :  { %19 = vsyncpa [#allocation6], 0 }
   0x9   :  { %20 = vsyncpa [#allocation9], 0 }
   0xa   :  { %21 = vsyncpa [#allocation12], 0 }
   0xb   :  { %22 = vsyncpa [#allocation15], 0 }
   0xc   :  { %23 = vsyncpa [#allocation18], 0  ;;  %s5631_s17 = smov 0   ;;  %s5633_s18 = smov 0  }
   0xd   :  { %s5635_s19 = smov 0   ;;  %s5637_s20 = smov 0  }
   0xe LB: > { %s5553_s21 = smov [#allocation5]   ;;  %s5652_s23 = sadd.s32 4294967295, %s5551_s20   ;;  %s5551_s20 = sphi %s5637_s20, %s6467_s20   ;;  %s5547_s19 = sphi %s5635_s19, %s6466_s19   ;;  %s5543_s18 = sphi %s5633_s18, %s6465_s18   ;;  %s5539_s17 = sphi %s5631_s17, %s6464_s17  }
   0xf   : > { %s309_s22 = sshll.u32 %s5553_s21, 4  ;;  %p3963_p0 = scmp.ge.s32.totalorder %s5551_s20, 1  ;;  %s5658_s22 = int_to_ptr.vmem [resolvable:$true] %s309_s22 }
  0x10   : > { %p6433_p1 = scmp.eq.s32.totalorder %s5652_s23, 0  ;;  %p296_p2 = scmp.lt.s32.totalorder %s5551_s20, 5 }
  0x11   : > { %s5554_s25 = smov [#allocation8]   ;;  %s5555_s27 = smov [#allocation11]  }
  0x12   : > { %p5660_p4 = pnand %p3963_p0, %p296_p2  ;;  %s333_s26 = sshll.u32 %s5554_s25, 4  ;;  %s5666_s26 = int_to_ptr.vmem [resolvable:$true] %s333_s26 }
  0x13   : > { %s357_s28 = sshll.u32 %s5555_s27, 4  ;;  %s5556_s30 = smov [#allocation14]   ;;  %s5674_s28 = int_to_ptr.vmem [resolvable:$true] %s357_s28 }
  0x14   : > { %s6440_s24 = scalar_select %p5660_p4, 1, 0 }
  0x15   : > { %p4539_p5 = pneg %p5660_p4  ;;  %s5676_s12 = sshll.u32 %s5556_s30, 4  ;;  %s382_s12 = int_to_ptr.vmem [resolvable:$true] %s5676_s12 }
  0x16   : > { %s6442_s2 = sld [smem:[#allocation26_spill]] }
  0x17   : > { %p5670_p6 = pnand %p4539_p5, %p6433_p1 }
  0x19   : > { %p5686_p8 = pneg %p5670_p6 }
  0x1c   : > { %s5215_s15 = scalar_lea.hbm %s6442_s2, 64 }
  0x1d   : > { %p5216_p7 = scmp.ne.s32.totalorder %s6442_s2, %s5215_s15  ;;  %p5222_p11 = scmp.lt.u32.totalorder %s5215_s15, %s6442_s2 }
  0x1f   : > { %p5218_p9 = pnand %p5686_p8, %p5216_p7 }
  0x21   : > { %p5219_p10 = pneg %p5218_p9 }
  0x23   : > { %p5224_p12 = pnand %p5222_p11, %p5219_p10 }
  0x25   : > { %5227 = shalt.err (!%p5224_p12)
}
  0x26   : > { %s5228_s13 = scalar_lea.vmem %s5658_s22, 64  ;;  %p5236_p5 = scmp.lt.s32.totalorder %s5658_s22, %s5658_s22 }
  0x27   : > { %p5229_p13 = scmp.ne.s32.totalorder %s5658_s22, %s5228_s13  ;;  %p5237_p3 = scmp.lt.s32.totalorder %s5228_s13, %s5228_s13 }
  0x29   : > { %p5231_p0 = pnand %p5229_p13, %p5686_p8  ;;  %p5238_p7 = por %p5237_p3, %p5236_p5 }
  0x2b   : > { %p5232_p2 = pneg %p5231_p0 }
  0x2d   : > { %p5239_p9 = pnand %p5238_p7, %p5232_p2 }
  0x2f   : > { %5242 = shalt.err (!%p5239_p9)
}
  0x30   : > { %4542 = dma.hbm_to_vmem [thread:$0]  (!%p5670_p6), %s6442_s2, 64, %s5658_s22, [#allocation6]  }
  0x31   : > { %s6444_s4 = sld [smem:[#allocation27_spill]] }
  0x37   : > { %s5243_s27 = scalar_lea.hbm %s6444_s4, 16 }
  0x38   : > { %p5244_p10 = scmp.ne.s32.totalorder %s6444_s4, %s5243_s27  ;;  %p5250_p12 = scmp.lt.u32.totalorder %s5243_s27, %s6444_s4 }
  0x3a   : > { %p5246_p3 = pnand %p5244_p10, %p5686_p8 }
  0x3c   : > { %p5247_p11 = pneg %p5246_p3 }
  0x3e   : > { %p5252_p13 = pnand %p5250_p12, %p5247_p11 }
  0x40   : > { %5255 = shalt.err (!%p5252_p13)
}
  0x41   : > { %s5256_s22 = scalar_lea.vmem %s5666_s26, 16  ;;  %s5263_s11 = scalar_lea.vmem %s5666_s26, 32 }
  0x42   : > { %p5257_p0 = scmp.ne.s32.totalorder %s5666_s26, %s5256_s22  ;;  %p5264_p7 = scmp.lt.s32.totalorder %s5666_s26, %s5666_s26 }
  0x43   : > { %p5265_p9 = scmp.lt.s32.totalorder %s5263_s11, %s5256_s22 }
  0x44   : > { %p5259_p2 = pnand %p5257_p0, %p5686_p8 }
  0x45   : > { %p5266_p10 = por %p5265_p9, %p5264_p7 }
  0x46   : > { %p5260_p5 = pneg %p5259_p2 }
  0x48   : > { %p5267_p3 = pnand %p5266_p10, %p5260_p5 }
  0x4a   : > { %5270 = shalt.err (!%p5267_p3)
}
  0x4b   : > { %4548 = dma.hbm_to_vmem [thread:$0]  (!%p5670_p6), %s6444_s4, 16, %s5666_s26, [#allocation9]  }
  0x4c   : > { %s6445_s6 = sld [smem:[#allocation28_spill]] }
  0x52   : > { %s5271_s21 = scalar_lea.hbm %s6445_s6, 16 }
  0x53   : > { %p5272_p11 = scmp.ne.s32.totalorder %s6445_s6, %s5271_s21  ;;  %p5278_p0 = scmp.lt.u32.totalorder %s5271_s21, %s6445_s6 }
  0x55   : > { %p5274_p12 = pnand %p5272_p11, %p5686_p8 }
  0x57   : > { %p5275_p13 = pneg %p5274_p12 }
  0x59   : > { %p5280_p2 = pnand %p5278_p0, %p5275_p13 }
  0x5b   : > { %5283 = shalt.err (!%p5280_p2)
}
  0x5c   : > { %s5284_s26 = scalar_lea.vmem %s5674_s28, 16  ;;  %s5291_s11 = scalar_lea.vmem %s5674_s28, 32 }
  0x5d   : > { %p5285_p5 = scmp.ne.s32.totalorder %s5674_s28, %s5284_s26  ;;  %p5292_p10 = scmp.lt.s32.totalorder %s5674_s28, %s5674_s28 }
  0x5e   : > { %p5293_p3 = scmp.lt.s32.totalorder %s5291_s11, %s5284_s26 }
  0x5f   : > { %p5287_p7 = pnand %p5285_p5, %p5686_p8 }
  0x60   : > { %p5294_p11 = por %p5293_p3, %p5292_p10 }
  0x61   : > { %p5288_p9 = pneg %p5287_p7 }
  0x63   : > { %p5295_p12 = pnand %p5294_p11, %p5288_p9 }
  0x65   : > { %5298 = shalt.err (!%p5295_p12)
}
  0x66   : > { %4554 = dma.hbm_to_vmem [thread:$0]  (!%p5670_p6), %s6445_s6, 16, %s5674_s28, [#allocation12]  }
  0x67   : > { %s5557_s15 = smov [#allocation7]   ;;  %s5299_s30 = scalar_lea.hbm %s6428_s8, 16 }
  0x68   : > { %s319_s16 = sshll.u32 %s5557_s15, 4  ;;  %p5300_p13 = scmp.ne.s32.totalorder %s6428_s8, %s5299_s30  ;;  %s320_s16 = int_to_ptr.vmem [resolvable:$true] %s319_s16 }
  0x69   : > { %p5306_p5 = scmp.lt.u32.totalorder %s5299_s30, %s6428_s8 }
  0x6a   : > { %p5302_p0 = pnand %p5300_p13, %p5686_p8 }
  0x6c   : > { %p5303_p2 = pneg %p5302_p0 }
  0x6e   : > { %p5308_p7 = pnand %p5306_p5, %p5303_p2 }
  0x70   : > { %5311 = shalt.err (!%p5308_p7)
}
  0x71   : > { %s5312_s28 = scalar_lea.vmem %s382_s12, 16  ;;  %s5319_s0 = scalar_lea.vmem %s382_s12, 32 }
  0x72   : > { %p5313_p9 = scmp.ne.s32.totalorder %s382_s12, %s5312_s28  ;;  %p5320_p11 = scmp.lt.s32.totalorder %s382_s12, %s382_s12 }
  0x73   : > { %p5321_p12 = scmp.lt.s32.totalorder %s5319_s0, %s5312_s28 }
  0x74   : > { %p5315_p10 = pnand %p5313_p9, %p5686_p8 }
  0x75   : > { %p5322_p1 = por %p5321_p12, %p5320_p11 }
  0x76   : > { %p5316_p3 = pneg %p5315_p10 }
  0x78   : > { %p5323_p4 = pnand %p5322_p1, %p5316_p3 }
  0x7a   : > { %5326 = shalt.err (!%p5323_p4)
}
  0x7b   : > { %4560 = dma.hbm_to_vmem [thread:$0]  (!%p5670_p6), %s6428_s8, 16, %s382_s12, [#allocation15]  }
  0x7c   : > { %s5327_s30 = scalar_lea.hbm %s6423_s3, 4096 }
  0x7d   : > { %p5328_p13 = scmp.ne.s32.totalorder %s6423_s3, %s5327_s30  ;;  %p5334_p4 = scmp.lt.u32.totalorder %s5327_s30, %s6423_s3 }
  0x7f   : > { %p5330_p0 = pnand %p5328_p13, %p5686_p8 }
  0x81   : > { %p5331_p1 = pneg %p5330_p0 }
  0x83   : > { %p5336_p2 = pnand %p5334_p4, %p5331_p1 }
  0x85   : > { %5339 = shalt.err (!%p5336_p2)
}
  0x86   : > { %s5340_s28 = scalar_lea.vmem %s320_s16, 4096  ;;  %p5348_p10 = scmp.lt.s32.totalorder %s320_s16, %s320_s16 }
  0x87   : > { %p5341_p5 = scmp.ne.s32.totalorder %s320_s16, %s5340_s28  ;;  %p5349_p3 = scmp.lt.s32.totalorder %s5340_s28, %s5340_s28 }
  0x89   : > { %p5343_p7 = pnand %p5341_p5, %p5686_p8  ;;  %p5350_p11 = por %p5349_p3, %p5348_p10 }
  0x8b   : > { %p5344_p9 = pneg %p5343_p7 }
  0x8d   : > { %p5351_p12 = pnand %p5350_p11, %p5344_p9 }
  0x8f   : > { %5354 = shalt.err (!%p5351_p12)
}
  0x90   : > { %s5558_s12 = smov 64   ;;  %s5559_s0 = smov 4  }
  0x91   : > { %4545 = dma.hbm_to_vmem [thread:$0]  (!%p5670_p6), %s6423_s3, 4096, %s320_s16, [#allocation6], %s5558_s12, %s5558_s12, %s5559_s0  }
  0x92   : > { %s5560_s21 = smov [#allocation10]   ;;  %s5561_s30 = smov [#allocation13]  }
  0x93   : > { %s343_s27 = sshll.u32 %s5560_s21, 4  ;;  %s367_s13 = sshll.u32 %s5561_s30, 4  ;;  %s344_s27 = int_to_ptr.vmem [resolvable:$true] %s343_s27  ;;  %s368_s13 = int_to_ptr.vmem [resolvable:$true] %s367_s13 }
  0x94   : > { %s5355_s11 = scalar_lea.hbm %s6425_s5, 1024 }
  0x95   : > { %p5356_p13 = scmp.ne.s32.totalorder %s6425_s5, %s5355_s11  ;;  %p5362_p4 = scmp.lt.u32.totalorder %s5355_s11, %s6425_s5 }
  0x97   : > { %p5358_p0 = pnand %p5356_p13, %p5686_p8 }
  0x99   : > { %p5359_p1 = pneg %p5358_p0 }
  0x9b   : > { %p5364_p2 = pnand %p5362_p4, %p5359_p1 }
  0x9d   : > { %5367 = shalt.err (!%p5364_p2)
}
  0x9e   : > { %s5368_s16 = scalar_lea.vmem %s344_s27, 1024  ;;  %p5376_p10 = scmp.lt.s32.totalorder %s344_s27, %s344_s27 }
  0x9f   : > { %p5369_p5 = scmp.ne.s32.totalorder %s344_s27, %s5368_s16  ;;  %p5377_p3 = scmp.lt.s32.totalorder %s5368_s16, %s5368_s16 }
  0xa1   : > { %p5371_p7 = pnand %p5369_p5, %p5686_p8  ;;  %p5378_p11 = por %p5377_p3, %p5376_p10 }
  0xa3   : > { %p5372_p9 = pneg %p5371_p7 }
  0xa5   : > { %p5379_p12 = pnand %p5378_p11, %p5372_p9 }
  0xa7   : > { %5382 = shalt.err (!%p5379_p12)
}
  0xa8   : > { %4551 = dma.hbm_to_vmem [thread:$0]  (!%p5670_p6), %s6425_s5, 1024, %s344_s27, [#allocation9], %s5558_s12, %s5558_s12, %s5559_s0  }
  0xa9   : > { %s5383_s15 = scalar_lea.hbm %s6427_s7, 1024 }
  0xaa   : > { %p5384_p13 = scmp.ne.s32.totalorder %s6427_s7, %s5383_s15  ;;  %p5390_p4 = scmp.lt.u32.totalorder %s5383_s15, %s6427_s7 }
  0xac   : > { %p5386_p0 = pnand %p5384_p13, %p5686_p8 }
  0xae   : > { %p5387_p1 = pneg %p5386_p0 }
  0xb0   : > { %p5392_p2 = pnand %p5390_p4, %p5387_p1 }
  0xb2   : > { %5395 = shalt.err (!%p5392_p2)
}
  0xb3   : > { %s5396_s11 = scalar_lea.vmem %s368_s13, 1024  ;;  %p5404_p10 = scmp.lt.s32.totalorder %s368_s13, %s368_s13 }
  0xb4   : > { %p5397_p5 = scmp.ne.s32.totalorder %s368_s13, %s5396_s11  ;;  %p5405_p3 = scmp.lt.s32.totalorder %s5396_s11, %s5396_s11 }
  0xb6   : > { %p5399_p7 = pnand %p5397_p5, %p5686_p8  ;;  %p5406_p11 = por %p5405_p3, %p5404_p10 }
  0xb8   : > { %p5400_p9 = pneg %p5399_p7 }
  0xba   : > { %p5407_p12 = pnand %p5406_p11, %p5400_p9 }
  0xbc   : > { %5410 = shalt.err (!%p5407_p12)
}
  0xbd   : > { %4557 = dma.hbm_to_vmem [thread:$0]  (!%p5670_p6), %s6427_s7, 1024, %s368_s13, [#allocation12], %s5558_s12, %s5558_s12, %s5559_s0  }
  0xbe   : > { %s5562_s16 = smov [#allocation16]   ;;  %s5411_s14 = scalar_lea.hbm %s6429_s9, 4096 }
  0xbf   : > { %s391_s2 = sshll.u32 %s5562_s16, 4  ;;  %p5412_p13 = scmp.ne.s32.totalorder %s6429_s9, %s5411_s14  ;;  %s392_s2 = int_to_ptr.vmem [resolvable:$true] %s391_s2 }
  0xc0   : > { %p5418_p4 = scmp.lt.u32.totalorder %s5411_s14, %s6429_s9 }
  0xc1   : > { %p5414_p0 = pnand %p5412_p13, %p5686_p8 }
  0xc3   : > { %p5415_p1 = pneg %p5414_p0 }
  0xc5   : > { %p5420_p2 = pnand %p5418_p4, %p5415_p1 }
  0xc7   : > { %5423 = shalt.err (!%p5420_p2)
}
  0xc8   : > { %s5424_s12 = scalar_lea.vmem %s392_s2, 4096  ;;  %p5432_p10 = scmp.lt.s32.totalorder %s392_s2, %s392_s2 }
  0xc9   : > { %p5425_p5 = scmp.ne.s32.totalorder %s392_s2, %s5424_s12  ;;  %p5433_p3 = scmp.lt.s32.totalorder %s5424_s12, %s5424_s12 }
  0xcb   : > { %p5427_p7 = pnand %p5425_p5, %p5686_p8  ;;  %p5434_p11 = por %p5433_p3, %p5432_p10 }
  0xcd   : > { %p5428_p9 = pneg %p5427_p7 }
  0xcf   : > { %p5435_p12 = pnand %p5434_p11, %p5428_p9 }
  0xd1   : > { %5438 = shalt.err (!%p5435_p12)
}
  0xd2   : > { %s5563_s0 = smov 256   ;;  %s5564_s13 = smov 16  }
  0xd3   : > { %4563 = dma.hbm_to_vmem [thread:$0]  (!%p5670_p6), %s6429_s9, 4096, %s392_s2, [#allocation15], %s5563_s0, %s5563_s0, %s5564_s13  }
  0xd4   : > { %s5565_s27 = smov [#allocation17]   ;;  %s5439_s6 = scalar_lea.hbm %s6430_s10, 64 }
  0xd5   : > { %s405_s28 = sshll.u32 %s5565_s27, 4  ;;  %p5440_p13 = scmp.ne.s32.totalorder %s6430_s10, %s5439_s6  ;;  %s406_s28 = int_to_ptr.vmem [resolvable:$true] %s405_s28 }
  0xd6   : > { %p5446_p4 = scmp.lt.u32.totalorder %s5439_s6, %s6430_s10 }
  0xd7   : > { %p5442_p0 = pnand %p5440_p13, %p5686_p8 }
  0xd9   : > { %p5443_p1 = pneg %p5442_p0 }
  0xdb   : > { %p5448_p2 = pnand %p5446_p4, %p5443_p1 }
  0xdd   : > { %5451 = shalt.err (!%p5448_p2)
}
  0xde   : > { %s5452_s2 = scalar_lea.vmem %s406_s28, 64  ;;  %p5460_p10 = scmp.lt.s32.totalorder %s406_s28, %s406_s28 }
  0xdf   : > { %p5453_p5 = scmp.ne.s32.totalorder %s406_s28, %s5452_s2  ;;  %p5461_p3 = scmp.lt.s32.totalorder %s5452_s2, %s5452_s2 }
  0xe1   : > { %p5455_p7 = pnand %p5453_p5, %p5686_p8  ;;  %p5462_p11 = por %p5461_p3, %p5460_p10 }
  0xe3   : > { %p5456_p9 = pneg %p5455_p7 }
  0xe5   : > { %p5463_p12 = pnand %p5462_p11, %p5456_p9 }
  0xe7   : > { %5466 = shalt.err (!%p5463_p12)
}
  0xe8   : > { %4566 = dma.hbm_to_vmem [thread:$0]  (!%p5670_p6), %s6430_s10, 64, %s406_s28, [#allocation18]  }
  0xe9   : > { %s5877_s25 = sadd.s32 1, %s5551_s20   ;;  %s62_s26 = sadd.s32 1, %s5547_s19 }
  0xea   : > { %s59_s29 = ssub.s32 %s5551_s20, %s5877_s25  ;;  %p69_p13 = scmp.ne.s32.totalorder %s5547_s19, %s5543_s18 }
  0xeb   : > { %p60_p8 = scmp.eq.s32.totalorder %s59_s29, 0  ;;  %p70_p0 = scmp.eq.s32.totalorder %s5551_s20, 0 }
  0xec   : > { %p75_p1 = scmp.ne.s32.totalorder %s5543_s18, %s5539_s17  ;;  %p6446_p2 = scmp.eq.s32.totalorder %s5652_s23, 0 }
  0xed   : > { %s5888_s11 = scalar_select %p60_p8, %s5547_s19, %s62_s26  }
  0xee   : > { %p71_p4 = por %p70_p0, %p69_p13  ;;  %p5892_p5 = por %p6446_p2, %p75_p1 }
  0xef   : > { %p4580_p7 = scmp.lt.s32.totalorder %s5551_s20, 4  ;;  %s425_s16 = sand.u32 1, %s5547_s19  }
  0xf0   : > { %s4499_s28 = smul.u32 2560, %s425_s16  ;;  %s5472_s29 = scalar_lea.hbm %s6421_s1, 163840 }
  0xf1   : > { %s4396_s4 = smul.u32 40960, %s5551_s20  ;;  %p5899_p6 = pnand %p4580_p7, %p71_p4 }
  0xf2   : > { %s429_s21 = scalar_lea.vmem [#allocation3], %s4499_s28  ;;  %s5910_s20 = scalar_lea.sflag [#allocation4], %s425_s16 }
  0xf3   : > { %s5906_s17 = scalar_lea.hbm %s6421_s1, %s4396_s4  ;;  %s437_s30 = sshll.u32 %s429_s21, 4  ;;  %s5908_s30 = int_to_ptr.vmem [resolvable:$true] %s437_s30 }
  0xf4   : > { %s5467_s2 = scalar_lea.hbm %s5906_s17, 40960  ;;  %p5469_p10 = pneg %p5899_p6 }
  0xf5   : > { %p5468_p9 = scmp.ne.s32.totalorder %s5906_s17, %s5467_s2  ;;  %p5473_p12 = scmp.lt.u32.totalorder %s5906_s17, %s6421_s1 }
  0xf6   : > { %p5474_p8 = scmp.lt.u32.totalorder %s5472_s29, %s5467_s2  ;;  %p5476_p0 = scmp.lt.u32.totalorder %s5467_s2, %s5906_s17 }
  0xf7   : > { %p5470_p3 = pnand %p5469_p10, %p5468_p9 }
  0xf8   : > { %p5475_p13 = por %p5474_p8, %p5473_p12 }
  0xf9   : > { %p5471_p11 = pneg %p5470_p3 }
  0xfa   : > { %p5477_p1 = por %p5476_p0, %p5475_p13 }
  0xfc   : > { %p5478_p4 = pnand %p5477_p1, %p5471_p11 }
  0xfe   : > { %5481 = shalt.err (!%p5478_p4)
}
  0xff   : > { %s5482_s16 = scalar_lea.vmem %s5908_s30, 40960  ;;  %s5566_s28 = smov [#allocation3]  }
 0x100   : > { %p5483_p2 = scmp.ne.s32.totalorder %s5908_s30, %s5482_s16  ;;  %s5487_s14 = sshll.u32 %s5566_s28, 4  ;;  %s5488_s14 = int_to_ptr.vmem [resolvable:$false] %s5487_s14 }
 0x101   : > { %s5489_s15 = scalar_lea.vmem %s5488_s14, 81920  ;;  %p5490_p3 = scmp.lt.s32.totalorder %s5908_s30, %s5488_s14 }
 0x102   : > { %p5485_p7 = pnand %p5483_p2, %p5469_p10  ;;  %p5491_p12 = scmp.lt.s32.totalorder %s5489_s15, %s5482_s16 }
 0x104   : > { %p5486_p9 = pneg %p5485_p7  ;;  %p5492_p8 = por %p5491_p12, %p5490_p3 }
 0x106   : > { %p5493_p13 = pnand %p5492_p8, %p5486_p9 }
 0x108   : > { %5496 = shalt.err (!%p5493_p13)
}
 0x109   : > { %4570 = dma.hbm_to_vmem [thread:$0]  (!%p5899_p6), %s5906_s17, 40960, %s5908_s30, %s5910_s20, %s5563_s0, %s5563_s0, %s5564_s13  }
 0x10a   : > { %p6449_p10 = scmp.ne.s32.totalorder %s6440_s24, 0 }
 0x10b   : > { %s451_s21 = sand.u32 (!%p6449_p10), 1, %s5543_s18  }
 0x10c   : > { %449 = sbr.rel (%p6449_p10) target bundleno = 1733 (0x6c5), region = 64  ;;  %s452_s22 = scalar_lea.sflag (!%p6449_p10), [#allocation4], %s451_s21 }
 0x10d   : > { %s4500_s2 = smul.u32 (!%p6449_p10), 2560, %s451_s21 }
 0x10f   : > { %s5944_s12 = scalar_lea.vmem (!%p6449_p10), [#allocation3], %s4500_s2 }
 0x113   : > { %5514 = dma.done.wait (%p5892_p5), %s452_s22, 40960  }
 0x114   : > { %5516 = vsyncadd (%p5892_p5), %s452_s22, 4294926336  ;;  %p6450_p11 = scmp.eq.s32.totalorder %s5652_s23, 0 }
 0x116   : > { %5518 = dma.done.wait (%p6450_p11), [#allocation6], 4160   ;;  %p6451_p6 = pmov %p6450_p11 }
 0x118   : > { %5520 = vsyncadd (%p6451_p6), [#allocation6], 4294963136  ;;  %p6452_p0 = pmov %p6451_p6 }
 0x11a   : > { %5522 = dma.done.wait (%p6452_p0), [#allocation9], 1040   ;;  %p6453_p1 = pmov %p6452_p0 }
 0x11b   : > { %p6454_p4 = pmov %p6452_p0 }
 0x11c   : > { %5524 = vsyncadd (%p6453_p1), [#allocation9], 4294966256 }
 0x11d   : > { %5526 = dma.done.wait (%p6454_p4), [#allocation12], 1040   ;;  %p6455_p2 = pmov %p6452_p0 }
 0x11e   : > { %p6456_p5 = pmov %p6452_p0 }
 0x11f   : > { %5528 = vsyncadd (%p6455_p2), [#allocation12], 4294966256 }
 0x120   : > { %5530 = dma.done.wait (%p6456_p5), [#allocation15], 4112   ;;  %p6457_p7 = pmov %p6452_p0 }
 0x121   : > { %p6458_p9 = pmov %p6452_p0 }
 0x122   : > { %5532 = vsyncadd (%p6457_p7), [#allocation15], 4294963184 }
 0x123   : > { %5534 = dma.done.wait (%p6458_p9), [#allocation18], 64   ;;  %p6459_p3 = pmov %p6452_p0 }
 0x124   : > { %s530_s24 = smul.u32 10, %s5652_s23  ;;  %s6460_s6 = sld [smem:[#allocation25_spill]] }
 0x125   : > { %5536 = vsyncadd (%p6459_p3), [#allocation18], 4294967232  ;;  %p6461_p8 = scmp.ne.s32.totalorder %s5652_s23, 0 }
 0x126   : > { %p531_p12 = scmp.lt.s32.totalorder %s530_s24, 39  ;;  %v5567_v0 = vmov (!%p6461_p8), 0.0  }
 0x127   : > { %541 = sbr.rel (%p6461_p8) target bundleno = 302 (0x12e), region = 108  ;;  %542 = vst [vmem:[#allocation2] sm:$0xff] (!%p6461_p8), %v5567_v0  ;;  %543 = vst [vmem:[#allocation2 + $0x8] sm:$0xff] (!%p6461_p8), %v5567_v0 }
 0x128   : > { %s6469_s24 = smov (!%p531_p12, %s530_s24), 39  ;;  %544 = vst [vmem:[#allocation2 + $0x10] sm:$0xff] (!%p6461_p8), %v5567_v0  ;;  %545 = vst [vmem:[#allocation2 + $0x18] sm:$0xff] (!%p6461_p8), %v5567_v0 }
 0x129   : > { %s3986_s0 = sshll.u32 %s6469_s24, 3 }
 0x12a   : > { %s5974_s17 = scalar_lea.vmem %s6460_s6, %s3986_s0 }
 0x12e PF: > { %v4639_v1 = vld [vmem:[%s5944_s12 + $0x4] ss:$16 sps:$4 sm:$0xff]   ;;  %v4643_v3 = vld [vmem:[%s5944_s12] ss:$16 sps:$4 sm:$0xff]   ;;  %v551_v47 = vld [vmem:[%s5974_s17 + $0x8] sm:$0xff]  ;;  %p4308_p13 = scmp.ne.s32.totalorder %s5652_s23, 3 }
 0x12f   : > { %v4641_v2 = vld [vmem:[%s5944_s12 + $0x204] ss:$16 sps:$4 sm:$0xff]   ;;  %2490 = vmatprep.subr.bf16.mxu0 %v4639_v1  ;;  %v4644_v4 = vld [vmem:[%s5944_s12 + $0x200] ss:$16 sps:$4 sm:$0xff]   ;;  %v6027_v50 = vpack.c.bf16 %v551_v47, %v551_v47  ;;  %v553_v51 = vld [vmem:[%s5974_s17 + $0x18] sm:$0xff]  ;;  %vm5569_vm0 = vmmov (!%p4308_p13), 0  }
 0x130   : > { %2531 = vmatprep.subr.bf16.mxu1 %v4641_v2  ;;  %v4645_v5 = vld [vmem:[%s5944_s12 + $0x24] ss:$16 sps:$4 sm:$0xff]   ;;  %2491 = vmatpush1.bf16.msra.mxu0 %v4643_v3  ;;  %v4649_v7 = vld [vmem:[%s5944_s12 + $0x20] ss:$16 sps:$4 sm:$0xff]   ;;  %v6031_v53 = vpack.c.bf16 %v553_v51, %v553_v51  ;;  %s6462_s20 = sld [smem:[#allocation29_spill]] (!%p4308_p13) }
 0x131   : > { %2532 = vmatpush1.bf16.msra.mxu1 %v4644_v4  ;;  %v4647_v6 = vld [vmem:[%s5944_s12 + $0x224] ss:$16 sps:$4 sm:$0xff]   ;;  %2492 = vmatprep.subr.bf16.mxu0 %v4645_v5  ;;  %v4650_v8 = vld [vmem:[%s5944_s12 + $0x220] ss:$16 sps:$4 sm:$0xff]  }
 0x132   : > { %2533 = vmatprep.subr.bf16.mxu1 %v4647_v6  ;;  %v4651_v9 = vld [vmem:[%s5944_s12 + $0x44] ss:$16 sps:$4 sm:$0xff]   ;;  %v4655_v11 = vld [vmem:[%s5944_s12 + $0x40] ss:$16 sps:$4 sm:$0xff]   ;;  %2522 = vmatprep.mubr.bf16.mxu0 %v6027_v50 }
 0x133   : > { %v4653_v10 = vld [vmem:[%s5944_s12 + $0x244] ss:$16 sps:$4 sm:$0xff]   ;;  %v4656_v12 = vld [vmem:[%s5944_s12 + $0x240] ss:$16 sps:$4 sm:$0xff]   ;;  %2563 = vmatprep.mubr.bf16.mxu1 %v6031_v53 }
 0x134   : > { %2493 = vmatpush1.bf16.msra.mxu0 %v4649_v7  ;;  %v4657_v13 = vld [vmem:[%s5944_s12 + $0x64] ss:$16 sps:$4 sm:$0xff]   ;;  %v4661_v15 = vld [vmem:[%s5944_s12 + $0x60] ss:$16 sps:$4 sm:$0xff]  }
 0x135   : > { %2534 = vmatpush1.bf16.msra.mxu1 %v4650_v8  ;;  %2494 = vmatprep.subr.bf16.mxu0 %v4651_v9  ;;  %v4659_v14 = vld [vmem:[%s5944_s12 + $0x264] ss:$16 sps:$4 sm:$0xff]   ;;  %v4662_v16 = vld [vmem:[%s5944_s12 + $0x260] ss:$16 sps:$4 sm:$0xff]  }
 0x136   : > { %2535 = vmatprep.subr.bf16.mxu1 %v4653_v10  ;;  %v4663_v17 = vld [vmem:[%s5944_s12 + $0x84] ss:$16 sps:$4 sm:$0xff]   ;;  %v4667_v19 = vld [vmem:[%s5944_s12 + $0x80] ss:$16 sps:$4 sm:$0xff]   ;;  %s6463_s29 = smov (!%p4308_p13), %s6462_s20 }
 0x137   : > { %v4665_v18 = vld [vmem:[%s5944_s12 + $0x284] ss:$16 sps:$4 sm:$0xff]   ;;  %v4668_v20 = vld [vmem:[%s5944_s12 + $0x280] ss:$16 sps:$4 sm:$0xff]  }
 0x138   : > { %2495 = vmatpush1.bf16.msra.mxu0 %v4655_v11  ;;  %v4669_v21 = vld [vmem:[%s5944_s12 + $0xa4] ss:$16 sps:$4 sm:$0xff]   ;;  %v4673_v23 = vld [vmem:[%s5944_s12 + $0xa0] ss:$16 sps:$4 sm:$0xff]  }
 0x139   : > { %2536 = vmatpush1.bf16.msra.mxu1 %v4656_v12  ;;  %2496 = vmatprep.subr.bf16.mxu0 %v4657_v13  ;;  %v4671_v22 = vld [vmem:[%s5944_s12 + $0x2a4] ss:$16 sps:$4 sm:$0xff]   ;;  %v4674_v24 = vld [vmem:[%s5944_s12 + $0x2a0] ss:$16 sps:$4 sm:$0xff]  }
 0x13a   : > { %2537 = vmatprep.subr.bf16.mxu1 %v4659_v14  ;;  %v4675_v25 = vld [vmem:[%s5944_s12 + $0xc4] ss:$16 sps:$4 sm:$0xff]   ;;  %v4679_v27 = vld [vmem:[%s5944_s12 + $0xc0] ss:$16 sps:$4 sm:$0xff]  }
 0x13b   : > { %v4677_v26 = vld [vmem:[%s5944_s12 + $0x2c4] ss:$16 sps:$4 sm:$0xff]   ;;  %v4680_v28 = vld [vmem:[%s5944_s12 + $0x2c0] ss:$16 sps:$4 sm:$0xff]  }
 0x13c   : > { %2497 = vmatpush1.bf16.msra.mxu0 %v4661_v15  ;;  %v4681_v29 = vld [vmem:[%s5944_s12 + $0xe4] ss:$16 sps:$4 sm:$0xff]   ;;  %v4685_v31 = vld [vmem:[%s5944_s12 + $0xe0] ss:$16 sps:$4 sm:$0xff]  }
 0x13d   : > { %2538 = vmatpush1.bf16.msra.mxu1 %v4662_v16  ;;  %2498 = vmatprep.subr.bf16.mxu0 %v4663_v17  ;;  %v4683_v30 = vld [vmem:[%s5944_s12 + $0x2e4] ss:$16 sps:$4 sm:$0xff]   ;;  %v4686_v32 = vld [vmem:[%s5944_s12 + $0x2e0] ss:$16 sps:$4 sm:$0xff]  }
 0x13e   : > { %2539 = vmatprep.subr.bf16.mxu1 %v4665_v18  ;;  %v4687_v33 = vld [vmem:[%s5944_s12 + $0x104] ss:$16 sps:$4 sm:$0xff]   ;;  %v4691_v35 = vld [vmem:[%s5944_s12 + $0x100] ss:$16 sps:$4 sm:$0xff]  }
 0x13f   : > { %v4689_v34 = vld [vmem:[%s5944_s12 + $0x304] ss:$16 sps:$4 sm:$0xff]   ;;  %v4692_v36 = vld [vmem:[%s5944_s12 + $0x300] ss:$16 sps:$4 sm:$0xff]  }
 0x140   : > { %2499 = vmatpush1.bf16.msra.mxu0 %v4667_v19  ;;  %v4693_v37 = vld [vmem:[%s5944_s12 + $0x124] ss:$16 sps:$4 sm:$0xff]   ;;  %v4697_v39 = vld [vmem:[%s5944_s12 + $0x120] ss:$16 sps:$4 sm:$0xff]  }
 0x141   : > { %2540 = vmatpush1.bf16.msra.mxu1 %v4668_v20  ;;  %2500 = vmatprep.subr.bf16.mxu0 %v4669_v21  ;;  %v4695_v38 = vld [vmem:[%s5944_s12 + $0x324] ss:$16 sps:$4 sm:$0xff]   ;;  %v4698_v40 = vld [vmem:[%s5944_s12 + $0x320] ss:$16 sps:$4 sm:$0xff]  }
 0x142   : > { %2541 = vmatprep.subr.bf16.mxu1 %v4671_v22  ;;  %v4699_v41 = vld [vmem:[%s5944_s12 + $0x144] ss:$16 sps:$4 sm:$0xff]   ;;  %v4703_v43 = vld [vmem:[%s5944_s12 + $0x140] ss:$16 sps:$4 sm:$0xff]  }
 0x143   : > { %v4701_v42 = vld [vmem:[%s5944_s12 + $0x344] ss:$16 sps:$4 sm:$0xff]   ;;  %v4704_v44 = vld [vmem:[%s5944_s12 + $0x340] ss:$16 sps:$4 sm:$0xff]  }
 0x144   : > { %2501 = vmatpush1.bf16.msra.mxu0 %v4673_v23  ;;  %v4705_v45 = vld [vmem:[%s5944_s12 + $0x164] ss:$16 sps:$4 sm:$0xff]   ;;  %v4709_v48 = vld [vmem:[%s5944_s12 + $0x160] ss:$16 sps:$4 sm:$0xff]  }
 0x145   : > { %2542 = vmatpush1.bf16.msra.mxu1 %v4674_v24  ;;  %2502 = vmatprep.subr.bf16.mxu0 %v4675_v25  ;;  %v4707_v46 = vld [vmem:[%s5944_s12 + $0x364] ss:$16 sps:$4 sm:$0xff]   ;;  %v4710_v49 = vld [vmem:[%s5944_s12 + $0x360] ss:$16 sps:$4 sm:$0xff]  }
 0x146   : > { %2543 = vmatprep.subr.bf16.mxu1 %v4677_v26  ;;  %v4711_v52 = vld [vmem:[%s5944_s12 + $0x184] ss:$16 sps:$4 sm:$0xff]   ;;  %v4715_v55 = vld [vmem:[%s5944_s12 + $0x180] ss:$16 sps:$4 sm:$0xff]  }
 0x147   : > { %v4713_v54 = vld [vmem:[%s5944_s12 + $0x384] ss:$16 sps:$4 sm:$0xff]   ;;  %v4716_v56 = vld [vmem:[%s5944_s12 + $0x380] ss:$16 sps:$4 sm:$0xff]  }
 0x148   : > { %2503 = vmatpush1.bf16.msra.mxu0 %v4679_v27  ;;  %v4717_v57 = vld [vmem:[%s5944_s12 + $0x1a4] ss:$16 sps:$4 sm:$0xff]   ;;  %v4721_v59 = vld [vmem:[%s5944_s12 + $0x1a0] ss:$16 sps:$4 sm:$0xff]  }
 0x149   : > { %2544 = vmatpush1.bf16.msra.mxu1 %v4680_v28  ;;  %2504 = vmatprep.subr.bf16.mxu0 %v4681_v29  ;;  %v4719_v58 = vld [vmem:[%s5944_s12 + $0x3a4] ss:$16 sps:$4 sm:$0xff]   ;;  %v4722_v60 = vld [vmem:[%s5944_s12 + $0x3a0] ss:$16 sps:$4 sm:$0xff]  }
 0x14a   : > { %2545 = vmatprep.subr.bf16.mxu1 %v4683_v30  ;;  %v4723_v61 = vld [vmem:[%s5944_s12 + $0x1c4] ss:$16 sps:$4 sm:$0xff]   ;;  %v4727_v63 = vld [vmem:[%s5944_s12 + $0x1c0] ss:$16 sps:$4 sm:$0xff]  }
 0x14b   : > { %v4725_v62 = vld [vmem:[%s5944_s12 + $0x3c4] ss:$16 sps:$4 sm:$0xff]   ;;  %v4728_v0 = vld [vmem:[%s5944_s12 + $0x3c0] ss:$16 sps:$4 sm:$0xff]  }
 0x14c   : > { %2505 = vmatpush1.bf16.msra.mxu0 %v4685_v31  ;;  %v4729_v1 = vld [vmem:[%s5944_s12 + $0x1e4] ss:$16 sps:$4 sm:$0xff]   ;;  %v4733_v3 = vld [vmem:[%s5944_s12 + $0x1e0] ss:$16 sps:$4 sm:$0xff]  }
 0x14d   : > { %2546 = vmatpush1.bf16.msra.mxu1 %v4686_v32  ;;  %2506 = vmatprep.subr.bf16.mxu0 %v4687_v33  ;;  %v4731_v2 = vld [vmem:[%s5944_s12 + $0x3e4] ss:$16 sps:$4 sm:$0xff]   ;;  %v4734_v4 = vld [vmem:[%s5944_s12 + $0x3e0] ss:$16 sps:$4 sm:$0xff]  }
 0x14e   : > { %2547 = vmatprep.subr.bf16.mxu1 %v4689_v34  ;;  %v550_v5 = vld [vmem:[%s5974_s17] sm:$0xff]  ;;  %v552_v6 = vld [vmem:[%s5974_s17 + $0x10] sm:$0xff] }
 0x14f   : > { %v4737_v7 = vld [vmem:[%s5944_s12 + $0x404] ss:$16 sps:$4 sm:$0xff]   ;;  %v6054_v9 = vpack.c.bf16 %v550_v5, %v550_v5  ;;  %v6056_v10 = vpack.c.bf16 %v552_v6, %v552_v6  ;;  %v4735_v11 = vld [vmem:[%s5944_s12 + $0x400] ss:$16 sps:$4 sm:$0xff]  }
 0x150   : > { %2507 = vmatpush1.bf16.msra.mxu0 %v4691_v35  ;;  %v4740_v8 = vld [vmem:[%s5944_s12 + $0x604] ss:$16 sps:$4 sm:$0xff]   ;;  %v4738_v12 = vld [vmem:[%s5944_s12 + $0x600] ss:$16 sps:$4 sm:$0xff]   ;;  %v555_v35 = vld [vmem:[%s5974_s17 + $0x28] sm:$0xff] }
 0x151   : > { %2548 = vmatpush1.bf16.msra.mxu1 %v4692_v36  ;;  %2508 = vmatprep.subr.bf16.mxu0 %v4693_v37  ;;  %v4743_v13 = vld [vmem:[%s5944_s12 + $0x424] ss:$16 sps:$4 sm:$0xff]   ;;  %v4741_v15 = vld [vmem:[%s5944_s12 + $0x420] ss:$16 sps:$4 sm:$0xff]  }
 0x152   : > { %2549 = vmatprep.subr.bf16.mxu1 %v4695_v38  ;;  %v4746_v14 = vld [vmem:[%s5944_s12 + $0x624] ss:$16 sps:$4 sm:$0xff]   ;;  %v4744_v16 = vld [vmem:[%s5944_s12 + $0x620] ss:$16 sps:$4 sm:$0xff]   ;;  %v6087_v38 = vpack.c.bf16 %v555_v35, %v555_v35 }
 0x153   : > { %v4749_v17 = vld [vmem:[%s5944_s12 + $0x444] ss:$16 sps:$4 sm:$0xff]   ;;  %v4747_v19 = vld [vmem:[%s5944_s12 + $0x440] ss:$16 sps:$4 sm:$0xff]  }
 0x154   : > { %2509 = vmatpush1.bf16.msra.mxu0 %v4697_v39  ;;  %v4752_v18 = vld [vmem:[%s5944_s12 + $0x644] ss:$16 sps:$4 sm:$0xff]   ;;  %v4750_v20 = vld [vmem:[%s5944_s12 + $0x640] ss:$16 sps:$4 sm:$0xff]   ;;  %v557_v39 = vld [vmem:[%s5974_s17 + $0x38] sm:$0xff] }
 0x155   : > { %2550 = vmatpush1.bf16.msra.mxu1 %v4698_v40  ;;  %2510 = vmatprep.subr.bf16.mxu0 %v4699_v41  ;;  %v4755_v21 = vld [vmem:[%s5944_s12 + $0x464] ss:$16 sps:$4 sm:$0xff]   ;;  %v4753_v23 = vld [vmem:[%s5944_s12 + $0x460] ss:$16 sps:$4 sm:$0xff]   ;;  %v6091_v41 = vpack.c.bf16 %v557_v39, %v557_v39  ;;  %v4852_v39 = vld [vmem:[%s5944_s12 + $0x68] ss:$16 sps:$4 sm:$0xff]  }
 0x156   : > { %2551 = vmatprep.subr.bf16.mxu1 %v4701_v42  ;;  %v4758_v22 = vld [vmem:[%s5944_s12 + $0x664] ss:$16 sps:$4 sm:$0xff]   ;;  %v4756_v24 = vld [vmem:[%s5944_s12 + $0x660] ss:$16 sps:$4 sm:$0xff]  }
 0x157   : > { %v4761_v25 = vld [vmem:[%s5944_s12 + $0x484] ss:$16 sps:$4 sm:$0xff]   ;;  %v4759_v27 = vld [vmem:[%s5944_s12 + $0x480] ss:$16 sps:$4 sm:$0xff]  }
 0x158   : > { %2511 = vmatpush1.bf16.msra.mxu0 %v4703_v43  ;;  %v4764_v26 = vld [vmem:[%s5944_s12 + $0x684] ss:$16 sps:$4 sm:$0xff]   ;;  %v4762_v28 = vld [vmem:[%s5944_s12 + $0x680] ss:$16 sps:$4 sm:$0xff]  }
 0x159   : > { %2552 = vmatpush1.bf16.msra.mxu1 %v4704_v44  ;;  %2512 = vmatprep.subr.bf16.mxu0 %v4705_v45  ;;  %v4767_v29 = vld [vmem:[%s5944_s12 + $0x4a4] ss:$16 sps:$4 sm:$0xff]   ;;  %v4765_v31 = vld [vmem:[%s5944_s12 + $0x4a0] ss:$16 sps:$4 sm:$0xff]  }
 0x15a   : > { %2553 = vmatprep.subr.bf16.mxu1 %v4707_v46  ;;  %v4770_v30 = vld [vmem:[%s5944_s12 + $0x6a4] ss:$16 sps:$4 sm:$0xff]   ;;  %v4768_v32 = vld [vmem:[%s5944_s12 + $0x6a0] ss:$16 sps:$4 sm:$0xff]  }
 0x15b   : > { %v4773_v33 = vld [vmem:[%s5944_s12 + $0x4c4] ss:$16 sps:$4 sm:$0xff]   ;;  %v4771_v36 = vld [vmem:[%s5944_s12 + $0x4c0] ss:$16 sps:$4 sm:$0xff]  }
 0x15c   : > { %2513 = vmatpush1.bf16.msra.mxu0 %v4709_v48  ;;  %v4776_v34 = vld [vmem:[%s5944_s12 + $0x6c4] ss:$16 sps:$4 sm:$0xff]   ;;  %v4774_v37 = vld [vmem:[%s5944_s12 + $0x6c0] ss:$16 sps:$4 sm:$0xff]  }
 0x15d   : > { %2554 = vmatpush1.bf16.msra.mxu1 %v4710_v49  ;;  %2514 = vmatprep.subr.bf16.mxu0 %v4711_v52  ;;  %v4779_v40 = vld [vmem:[%s5944_s12 + $0x4e4] ss:$16 sps:$4 sm:$0xff]   ;;  %v4777_v43 = vld [vmem:[%s5944_s12 + $0x4e0] ss:$16 sps:$4 sm:$0xff]  }
 0x15e   : > { %2555 = vmatprep.subr.bf16.mxu1 %v4713_v54  ;;  %v4782_v42 = vld [vmem:[%s5944_s12 + $0x6e4] ss:$16 sps:$4 sm:$0xff]   ;;  %v4780_v44 = vld [vmem:[%s5944_s12 + $0x6e0] ss:$16 sps:$4 sm:$0xff]  }
 0x15f   : > { %v4785_v45 = vld [vmem:[%s5944_s12 + $0x504] ss:$16 sps:$4 sm:$0xff]   ;;  %v4783_v47 = vld [vmem:[%s5944_s12 + $0x500] ss:$16 sps:$4 sm:$0xff]  }
 0x160   : > { %2515 = vmatpush1.bf16.msra.mxu0 %v4715_v55  ;;  %v4788_v46 = vld [vmem:[%s5944_s12 + $0x704] ss:$16 sps:$4 sm:$0xff]   ;;  %v4786_v48 = vld [vmem:[%s5944_s12 + $0x700] ss:$16 sps:$4 sm:$0xff]  }
 0x161   : > { %2556 = vmatpush1.bf16.msra.mxu1 %v4716_v56  ;;  %2516 = vmatprep.subr.bf16.mxu0 %v4717_v57  ;;  %v4791_v49 = vld [vmem:[%s5944_s12 + $0x524] ss:$16 sps:$4 sm:$0xff]   ;;  %v4789_v52 = vld [vmem:[%s5944_s12 + $0x520] ss:$16 sps:$4 sm:$0xff]  }
 0x162   : > { %2557 = vmatprep.subr.bf16.mxu1 %v4719_v58  ;;  %v4794_v51 = vld [vmem:[%s5944_s12 + $0x724] ss:$16 sps:$4 sm:$0xff]   ;;  %v4792_v54 = vld [vmem:[%s5944_s12 + $0x720] ss:$16 sps:$4 sm:$0xff]  }
 0x163   : > { %v4797_v55 = vld [vmem:[%s5944_s12 + $0x544] ss:$16 sps:$4 sm:$0xff]   ;;  %v4795_v57 = vld [vmem:[%s5944_s12 + $0x540] ss:$16 sps:$4 sm:$0xff]  }
 0x164   : > { %2517 = vmatpush1.bf16.msra.mxu0 %v4721_v59  ;;  %v4800_v56 = vld [vmem:[%s5944_s12 + $0x744] ss:$16 sps:$4 sm:$0xff]   ;;  %v4798_v58 = vld [vmem:[%s5944_s12 + $0x740] ss:$16 sps:$4 sm:$0xff]  }
 0x165   : > { %2558 = vmatpush1.bf16.msra.mxu1 %v4722_v60  ;;  %2518 = vmatprep.subr.bf16.mxu0 %v4723_v61  ;;  %v4803_v59 = vld [vmem:[%s5944_s12 + $0x564] ss:$16 sps:$4 sm:$0xff]   ;;  %v4801_v61 = vld [vmem:[%s5944_s12 + $0x560] ss:$16 sps:$4 sm:$0xff]  }
 0x166   : > { %2559 = vmatprep.subr.bf16.mxu1 %v4725_v62  ;;  %v4806_v60 = vld [vmem:[%s5944_s12 + $0x764] ss:$16 sps:$4 sm:$0xff]   ;;  %v4804_v62 = vld [vmem:[%s5944_s12 + $0x760] ss:$16 sps:$4 sm:$0xff]  }
 0x167   : > { %v4813_v5 = vld [vmem:[%s5944_s12 + $0x5a0] ss:$16 sps:$4 sm:$0xff]   ;;  %v4851_v35 = vld [vmem:[%s5944_s12 + $0x864] ss:$16 sps:$4 sm:$0xff]  }
 0x168   : > { %2519 = vmatpush1.bf16.msra.mxu0 %v4727_v63  ;;  %v4809_v63 = vld [vmem:[%s5944_s12 + $0x584] ss:$16 sps:$4 sm:$0xff]   ;;  %v4816_v6 = vld [vmem:[%s5944_s12 + $0x7a0] ss:$16 sps:$4 sm:$0xff]  }
 0x169   : > { %2560 = vmatpush1.bf16.msra.mxu1 %v4728_v0  ;;  %2520 = vmatprep.subr.bf16.mxu0 %v4729_v1  ;;  %v4812_v0 = vld [vmem:[%s5944_s12 + $0x784] ss:$16 sps:$4 sm:$0xff]   ;;  %v4807_v1 = vld [vmem:[%s5944_s12 + $0x580] ss:$16 sps:$4 sm:$0xff]  }
 0x16a   : > { %2561 = vmatprep.subr.bf16.mxu1 %v4731_v2  ;;  %v4810_v2 = vld [vmem:[%s5944_s12 + $0x780] ss:$16 sps:$4 sm:$0xff]  }
 0x16c   : > { %2521 = vmatpush1.bf16.msra.mxu0 %v4733_v3  ;;  %v4815_v3 = vld [vmem:[%s5944_s12 + $0x5a4] ss:$16 sps:$4 sm:$0xff]  }
 0x16d   : > { %2562 = vmatpush1.bf16.msra.mxu1 %v4734_v4  ;;  %2572 = vmatprep.subr.bf16.mxu0 %v4737_v7  ;;  %v4818_v4 = vld [vmem:[%s5944_s12 + $0x7a4] ss:$16 sps:$4 sm:$0xff]  }
 0x16e   : > { %2613 = vmatprep.subr.bf16.mxu1 %v4740_v8  ;;  %v4821_v7 = vld [vmem:[%s5944_s12 + $0x5c4] ss:$16 sps:$4 sm:$0xff]  }
 0x16f   : > { %2523 = vmatmul.mubr.bf16.vlgmr.msra.gmra.mrb[0].mxu0 %v6054_v9  ;;  %v4824_v8 = vld [vmem:[%s5944_s12 + $0x7c4] ss:$16 sps:$4 sm:$0xff]  }
 0x170   : > { %2564 = vmatmul.mubr.bf16.vlgmr.msra.gmra.mrb[0].mxu1 %v6056_v10  ;;  %2573 = vmatpush1.bf16.msra.mxu0 %v4735_v11  ;;  %v4819_v11 = vld [vmem:[%s5944_s12 + $0x5c0] ss:$16 sps:$4 sm:$0xff]  }
 0x171   : > { %2614 = vmatpush1.bf16.msra.mxu1 %v4738_v12  ;;  %2574 = vmatprep.subr.bf16.mxu0 %v4743_v13  ;;  %v4822_v12 = vld [vmem:[%s5944_s12 + $0x7c0] ss:$16 sps:$4 sm:$0xff]   ;;  %v4827_v13 = vld [vmem:[%s5944_s12 + $0x5e4] ss:$16 sps:$4 sm:$0xff]  }
 0x172   : > { %2615 = vmatprep.subr.bf16.mxu1 %v4746_v14  ;;  %2604 = vmatprep.mubr.bf16.mxu0 %v6087_v38  ;;  %v4830_v14 = vld [vmem:[%s5944_s12 + $0x7e4] ss:$16 sps:$4 sm:$0xff]  }
 0x173   : > { %2645 = vmatprep.mubr.bf16.mxu1 %v6091_v41 }
 0x174   : > { %2575 = vmatpush1.bf16.msra.mxu0 %v4741_v15  ;;  %v4825_v15 = vld [vmem:[%s5944_s12 + $0x5e0] ss:$16 sps:$4 sm:$0xff]  }
 0x175   : > { %2616 = vmatpush1.bf16.msra.mxu1 %v4744_v16  ;;  %2576 = vmatprep.subr.bf16.mxu0 %v4749_v17  ;;  %v4828_v16 = vld [vmem:[%s5944_s12 + $0x7e0] ss:$16 sps:$4 sm:$0xff]  }
 0x176   : > { %2617 = vmatprep.subr.bf16.mxu1 %v4752_v18  ;;  %v554_v17 = vld [vmem:[%s5974_s17 + $0x20] sm:$0xff]  ;;  %v556_v18 = vld [vmem:[%s5974_s17 + $0x30] sm:$0xff] }
 0x178   : > { %2577 = vmatpush1.bf16.msra.mxu0 %v4747_v19  ;;  %v4833_v19 = vld [vmem:[%s5944_s12 + $0x804] ss:$16 sps:$4 sm:$0xff]  }
 0x179   : > { %2618 = vmatpush1.bf16.msra.mxu1 %v4750_v20  ;;  %2578 = vmatprep.subr.bf16.mxu0 %v4755_v21  ;;  %v4836_v20 = vld [vmem:[%s5944_s12 + $0xc] ss:$16 sps:$4 sm:$0xff]   ;;  %v6134_v21 = vpack.c.bf16 %v554_v17, %v554_v17 }
 0x17a   : > { %2619 = vmatprep.subr.bf16.mxu1 %v4758_v22  ;;  %v6136_v22 = vpack.c.bf16 %v556_v18, %v556_v18  ;;  %v4914_v17 = vld [vmem:[%s5944_s12 + $0x1ac] ss:$16 sps:$4 sm:$0xff]   ;;  %v4909_v18 = vld [vmem:[%s5944_s12 + $0x9a0] ss:$16 sps:$4 sm:$0xff]  }
 0x17c   : > { %2579 = vmatpush1.bf16.msra.mxu0 %v4753_v23  ;;  %v4831_v23 = vld [vmem:[%s5944_s12 + $0x800] ss:$16 sps:$4 sm:$0xff]  }
 0x17d   : > { %2620 = vmatpush1.bf16.msra.mxu1 %v4756_v24  ;;  %2580 = vmatprep.subr.bf16.mxu0 %v4761_v25  ;;  %v4834_v24 = vld [vmem:[%s5944_s12 + $0x8] ss:$16 sps:$4 sm:$0xff]   ;;  %v4839_v25 = vld [vmem:[%s5944_s12 + $0x824] ss:$16 sps:$4 sm:$0xff]  }
 0x17e   : > { %2621 = vmatprep.subr.bf16.mxu1 %v4764_v26  ;;  %v4842_v26 = vld [vmem:[%s5944_s12 + $0x2c] ss:$16 sps:$4 sm:$0xff]  }
 0x180   : > { %2581 = vmatpush1.bf16.msra.mxu0 %v4759_v27  ;;  %v559_v27 = vld [vmem:[%s5974_s17 + $0x48] sm:$0xff] }
 0x181   : > { %2622 = vmatpush1.bf16.msra.mxu1 %v4762_v28  ;;  %2582 = vmatprep.subr.bf16.mxu0 %v4767_v29  ;;  %v6145_v28 = vpack.c.bf16 %v559_v27, %v559_v27  ;;  %v4837_v29 = vld [vmem:[%s5944_s12 + $0x820] ss:$16 sps:$4 sm:$0xff]   ;;  %v4926_v27 = vld [vmem:[%s5944_s12 + $0x1ec] ss:$16 sps:$4 sm:$0xff]  }
 0x182   : > { %2623 = vmatprep.subr.bf16.mxu1 %v4770_v30  ;;  %v4840_v30 = vld [vmem:[%s5944_s12 + $0x28] ss:$16 sps:$4 sm:$0xff]  }
 0x184   : > { %2583 = vmatpush1.bf16.msra.mxu0 %v4765_v31  ;;  %v4845_v31 = vld [vmem:[%s5944_s12 + $0x844] ss:$16 sps:$4 sm:$0xff]  }
 0x185   : > { %2624 = vmatpush1.bf16.msra.mxu1 %v4768_v32  ;;  %2584 = vmatprep.subr.bf16.mxu0 %v4773_v33  ;;  %v4848_v32 = vld [vmem:[%s5944_s12 + $0x4c] ss:$16 sps:$4 sm:$0xff]   ;;  %v4843_v33 = vld [vmem:[%s5944_s12 + $0x840] ss:$16 sps:$4 sm:$0xff]  }
 0x186   : > { %2625 = vmatprep.subr.bf16.mxu1 %v4776_v34  ;;  %v4846_v34 = vld [vmem:[%s5944_s12 + $0x48] ss:$16 sps:$4 sm:$0xff]  }
 0x188   : > { %2585 = vmatpush1.bf16.msra.mxu0 %v4771_v36  ;;  %v4854_v36 = vld [vmem:[%s5944_s12 + $0x6c] ss:$16 sps:$4 sm:$0xff]  }
 0x189   : > { %2626 = vmatpush1.bf16.msra.mxu1 %v4774_v37  ;;  %2586 = vmatprep.subr.bf16.mxu0 %v4779_v40  ;;  %v4849_v37 = vld [vmem:[%s5944_s12 + $0x860] ss:$16 sps:$4 sm:$0xff]   ;;  %v4860_v40 = vld [vmem:[%s5944_s12 + $0x8c] ss:$16 sps:$4 sm:$0xff]  }
 0x18a   : > { %2627 = vmatprep.subr.bf16.mxu1 %v4782_v42  ;;  %v4855_v42 = vld [vmem:[%s5944_s12 + $0x880] ss:$16 sps:$4 sm:$0xff]  }
 0x18c   : > { %2587 = vmatpush1.bf16.msra.mxu0 %v4777_v43  ;;  %v4858_v43 = vld [vmem:[%s5944_s12 + $0x88] ss:$16 sps:$4 sm:$0xff]  }
 0x18d   : > { %2628 = vmatpush1.bf16.msra.mxu1 %v4780_v44  ;;  %2588 = vmatprep.subr.bf16.mxu0 %v4785_v45  ;;  %v4863_v44 = vld [vmem:[%s5944_s12 + $0x8a4] ss:$16 sps:$4 sm:$0xff]   ;;  %v4866_v45 = vld [vmem:[%s5944_s12 + $0xac] ss:$16 sps:$4 sm:$0xff]  }
 0x18e   : > { %2629 = vmatprep.subr.bf16.mxu1 %v4788_v46  ;;  %v4861_v46 = vld [vmem:[%s5944_s12 + $0x8a0] ss:$16 sps:$4 sm:$0xff]  }
 0x190   : > { %2589 = vmatpush1.bf16.msra.mxu0 %v4783_v47  ;;  %v4864_v47 = vld [vmem:[%s5944_s12 + $0xa8] ss:$16 sps:$4 sm:$0xff]  }
 0x191   : > { %2630 = vmatpush1.bf16.msra.mxu1 %v4786_v48  ;;  %2590 = vmatprep.subr.bf16.mxu0 %v4791_v49  ;;  %v4869_v48 = vld [vmem:[%s5944_s12 + $0x8c4] ss:$16 sps:$4 sm:$0xff]   ;;  %v4872_v49 = vld [vmem:[%s5944_s12 + $0xcc] ss:$16 sps:$4 sm:$0xff]  }
 0x192   : > { %2631 = vmatprep.subr.bf16.mxu1 %v4794_v51  ;;  %v4867_v51 = vld [vmem:[%s5944_s12 + $0x8c0] ss:$16 sps:$4 sm:$0xff]  }
 0x194   : > { %2591 = vmatpush1.bf16.msra.mxu0 %v4789_v52  ;;  %v4870_v52 = vld [vmem:[%s5944_s12 + $0xc8] ss:$16 sps:$4 sm:$0xff]  }
 0x195   : > { %2632 = vmatpush1.bf16.msra.mxu1 %v4792_v54  ;;  %2592 = vmatprep.subr.bf16.mxu0 %v4797_v55  ;;  %v4875_v54 = vld [vmem:[%s5944_s12 + $0x8e4] ss:$16 sps:$4 sm:$0xff]   ;;  %v4878_v55 = vld [vmem:[%s5944_s12 + $0xec] ss:$16 sps:$4 sm:$0xff]  }
 0x196   : > { %2633 = vmatprep.subr.bf16.mxu1 %v4800_v56  ;;  %v4873_v56 = vld [vmem:[%s5944_s12 + $0x8e0] ss:$16 sps:$4 sm:$0xff]  }
 0x198   : > { %2593 = vmatpush1.bf16.msra.mxu0 %v4795_v57  ;;  %v4876_v57 = vld [vmem:[%s5944_s12 + $0xe8] ss:$16 sps:$4 sm:$0xff]  }
 0x199   : > { %2634 = vmatpush1.bf16.msra.mxu1 %v4798_v58  ;;  %2594 = vmatprep.subr.bf16.mxu0 %v4803_v59  ;;  %v4881_v58 = vld [vmem:[%s5944_s12 + $0x904] ss:$16 sps:$4 sm:$0xff]   ;;  %v4884_v59 = vld [vmem:[%s5944_s12 + $0x10c] ss:$16 sps:$4 sm:$0xff]  }
 0x19a   : > { %2635 = vmatprep.subr.bf16.mxu1 %v4806_v60  ;;  %v4879_v60 = vld [vmem:[%s5944_s12 + $0x900] ss:$16 sps:$4 sm:$0xff]  }
 0x19c   : > { %2595 = vmatpush1.bf16.msra.mxu0 %v4801_v61  ;;  %v4882_v61 = vld [vmem:[%s5944_s12 + $0x108] ss:$16 sps:$4 sm:$0xff]  }
 0x19d   : > { %2636 = vmatpush1.bf16.msra.mxu1 %v4804_v62  ;;  %2596 = vmatprep.subr.bf16.mxu0 %v4809_v63  ;;  %v4887_v62 = vld [vmem:[%s5944_s12 + $0x924] ss:$16 sps:$4 sm:$0xff]   ;;  %v4890_v63 = vld [vmem:[%s5944_s12 + $0x12c] ss:$16 sps:$4 sm:$0xff]  }
 0x19e   : > { %2637 = vmatprep.subr.bf16.mxu1 %v4812_v0  ;;  %v4885_v0 = vld [vmem:[%s5944_s12 + $0x920] ss:$16 sps:$4 sm:$0xff]  }
 0x1a0   : > { %2597 = vmatpush1.bf16.msra.mxu0 %v4807_v1  ;;  %v4888_v1 = vld [vmem:[%s5944_s12 + $0x128] ss:$16 sps:$4 sm:$0xff]  }
 0x1a1   : > { %2638 = vmatpush1.bf16.msra.mxu1 %v4810_v2  ;;  %2598 = vmatprep.subr.bf16.mxu0 %v4815_v3  ;;  %v4893_v2 = vld [vmem:[%s5944_s12 + $0x944] ss:$16 sps:$4 sm:$0xff]   ;;  %v4896_v3 = vld [vmem:[%s5944_s12 + $0x14c] ss:$16 sps:$4 sm:$0xff]  }
 0x1a2   : > { %2639 = vmatprep.subr.bf16.mxu1 %v4818_v4  ;;  %v4891_v4 = vld [vmem:[%s5944_s12 + $0x940] ss:$16 sps:$4 sm:$0xff]  }
 0x1a4   : > { %2599 = vmatpush1.bf16.msra.mxu0 %v4813_v5  ;;  %v4894_v5 = vld [vmem:[%s5944_s12 + $0x148] ss:$16 sps:$4 sm:$0xff]  }
 0x1a5   : > { %2640 = vmatpush1.bf16.msra.mxu1 %v4816_v6  ;;  %2600 = vmatprep.subr.bf16.mxu0 %v4821_v7  ;;  %v4899_v6 = vld [vmem:[%s5944_s12 + $0x964] ss:$16 sps:$4 sm:$0xff]   ;;  %v4902_v7 = vld [vmem:[%s5944_s12 + $0x16c] ss:$16 sps:$4 sm:$0xff]  }
 0x1a6   : > { %2641 = vmatprep.subr.bf16.mxu1 %v4824_v8  ;;  %v4897_v8 = vld [vmem:[%s5944_s12 + $0x960] ss:$16 sps:$4 sm:$0xff]  }
 0x1a8   : > { %2601 = vmatpush1.bf16.msra.mxu0 %v4819_v11  ;;  %v4900_v11 = vld [vmem:[%s5944_s12 + $0x168] ss:$16 sps:$4 sm:$0xff]  }
 0x1a9   : > { %2642 = vmatpush1.bf16.msra.mxu1 %v4822_v12  ;;  %2602 = vmatprep.subr.bf16.mxu0 %v4827_v13  ;;  %v4905_v12 = vld [vmem:[%s5944_s12 + $0x984] ss:$16 sps:$4 sm:$0xff]   ;;  %v4908_v13 = vld [vmem:[%s5944_s12 + $0x18c] ss:$16 sps:$4 sm:$0xff]  }
 0x1aa   : > { %2643 = vmatprep.subr.bf16.mxu1 %v4830_v14  ;;  %v4903_v14 = vld [vmem:[%s5944_s12 + $0x980] ss:$16 sps:$4 sm:$0xff]  }
 0x1ac   : > { %2603 = vmatpush1.bf16.msra.mxu0 %v4825_v15  ;;  %v4906_v15 = vld [vmem:[%s5944_s12 + $0x188] ss:$16 sps:$4 sm:$0xff]  }
 0x1ad   : > { %2644 = vmatpush1.bf16.msra.mxu1 %v4828_v16  ;;  %2654 = vmatprep.subr.bf16.mxu0 %v4833_v19  ;;  %v4911_v16 = vld [vmem:[%s5944_s12 + $0x9a4] ss:$16 sps:$4 sm:$0xff]   ;;  %v4912_v19 = vld [vmem:[%s5944_s12 + $0x1a8] ss:$16 sps:$4 sm:$0xff]  }
 0x1ae   : > { %2695 = vmatprep.subr.bf16.mxu1 %v4836_v20  ;;  %v4917_v20 = vld [vmem:[%s5944_s12 + $0x9c4] ss:$16 sps:$4 sm:$0xff]  }
 0x1af   : > { %2605 = vmatmul.mubr.bf16.vlgmr.msra.gmra.mrb[4].mxu0 %v6134_v21 }
 0x1b0   : > { %2646 = vmatmul.mubr.bf16.vlgmr.msra.gmra.mrb[4].mxu1 %v6136_v22  ;;  %2655 = vmatpush1.bf16.msra.mxu0 %v4831_v23  ;;  %v4920_v23 = vld [vmem:[%s5944_s12 + $0x1cc] ss:$16 sps:$4 sm:$0xff]  }
 0x1b1   : > { %2696 = vmatpush1.bf16.msra.mxu1 %v4834_v24  ;;  %2656 = vmatprep.subr.bf16.mxu0 %v4839_v25  ;;  %v4915_v24 = vld [vmem:[%s5944_s12 + $0x9c0] ss:$16 sps:$4 sm:$0xff]   ;;  %v4918_v25 = vld [vmem:[%s5944_s12 + $0x1c8] ss:$16 sps:$4 sm:$0xff]  }
 0x1b2   : > { %2697 = vmatprep.subr.bf16.mxu1 %v4842_v26  ;;  %2686 = vmatprep.mubr.bf16.mxu0 %v6145_v28  ;;  %v4923_v26 = vld [vmem:[%s5944_s12 + $0x9e4] ss:$16 sps:$4 sm:$0xff]  }
 0x1b3   : > { %2727 = vmatprep.mubr.bf16.mxu1 %v6027_v50  ;;  %v4857_v50 = vld [vmem:[%s5944_s12 + $0x884] ss:$16 sps:$4 sm:$0xff]  }
 0x1b4   : > { %2657 = vmatpush1.bf16.msra.mxu0 %v4837_v29  ;;  %v4921_v29 = vld [vmem:[%s5944_s12 + $0x9e0] ss:$16 sps:$4 sm:$0xff]  }
 0x1b5   : > { %2698 = vmatpush1.bf16.msra.mxu1 %v4840_v30  ;;  %2658 = vmatprep.subr.bf16.mxu0 %v4845_v31  ;;  %v4924_v30 = vld [vmem:[%s5944_s12 + $0x1e8] ss:$16 sps:$4 sm:$0xff]   ;;  %v558_v31 = vld [vmem:[%s5974_s17 + $0x40] sm:$0xff] }
 0x1b6   : > { %2699 = vmatprep.subr.bf16.mxu1 %v4848_v32  ;;  %v4929_v32 = vld [vmem:[%s5944_s12 + $0x20c] ss:$16 sps:$4 sm:$0xff]  }
 0x1b8   : > { %2659 = vmatpush1.bf16.msra.mxu0 %v4843_v33  ;;  %v4932_v33 = vld [vmem:[%s5944_s12 + $0x40c] ss:$16 sps:$4 sm:$0xff]  }
 0x1b9   : > { %2700 = vmatpush1.bf16.msra.mxu1 %v4846_v34  ;;  %2660 = vmatprep.subr.bf16.mxu0 %v4851_v35  ;;  %v6210_v34 = vpack.c.bf16 %v558_v31, %v558_v31  ;;  %v4927_v35 = vld [vmem:[%s5944_s12 + $0x208] ss:$16 sps:$4 sm:$0xff]   ;;  %v5016_v31 = vld [vmem:[%s5944_s12 + $0x5cc] ss:$16 sps:$4 sm:$0xff]  }
 0x1ba   : > { %2701 = vmatprep.subr.bf16.mxu1 %v4854_v36  ;;  %v4930_v36 = vld [vmem:[%s5944_s12 + $0x408] ss:$16 sps:$4 sm:$0xff]  }
 0x1bc   : > { %2661 = vmatpush1.bf16.msra.mxu0 %v4849_v37  ;;  %v4935_v37 = vld [vmem:[%s5944_s12 + $0x22c] ss:$16 sps:$4 sm:$0xff]  }
 0x1bd   : > { %2702 = vmatpush1.bf16.msra.mxu1 %v4852_v39  ;;  %2662 = vmatprep.subr.bf16.mxu0 %v4857_v50  ;;  %v4938_v39 = vld [vmem:[%s5944_s12 + $0x42c] ss:$16 sps:$4 sm:$0xff]   ;;  %v4933_v50 = vld [vmem:[%s5944_s12 + $0x228] ss:$16 sps:$4 sm:$0xff]  }
 0x1be   : > { %2703 = vmatprep.subr.bf16.mxu1 %v4860_v40  ;;  %v4936_v40 = vld [vmem:[%s5944_s12 + $0x428] ss:$16 sps:$4 sm:$0xff]  }
 0x1c0   : > { %2663 = vmatpush1.bf16.msra.mxu0 %v4855_v42  ;;  %v4941_v42 = vld [vmem:[%s5944_s12 + $0x24c] ss:$16 sps:$4 sm:$0xff]  }
 0x1c1   : > { %2704 = vmatpush1.bf16.msra.mxu1 %v4858_v43  ;;  %2664 = vmatprep.subr.bf16.mxu0 %v4863_v44  ;;  %v4944_v43 = vld [vmem:[%s5944_s12 + $0x44c] ss:$16 sps:$4 sm:$0xff]   ;;  %v4942_v44 = vld [vmem:[%s5944_s12 + $0x448] ss:$16 sps:$4 sm:$0xff]  }
 0x1c2   : > { %2705 = vmatprep.subr.bf16.mxu1 %v4866_v45  ;;  %v4947_v45 = vld [vmem:[%s5944_s12 + $0x26c] ss:$16 sps:$4 sm:$0xff]  }
 0x1c4   : > { %2665 = vmatpush1.bf16.msra.mxu0 %v4861_v46  ;;  %v4950_v46 = vld [vmem:[%s5944_s12 + $0x46c] ss:$16 sps:$4 sm:$0xff]  }
 0x1c5   : > { %2706 = vmatpush1.bf16.msra.mxu1 %v4864_v47  ;;  %2666 = vmatprep.subr.bf16.mxu0 %v4869_v48  ;;  %v4945_v47 = vld [vmem:[%s5944_s12 + $0x268] ss:$16 sps:$4 sm:$0xff]   ;;  %v4956_v48 = vld [vmem:[%s5944_s12 + $0x48c] ss:$16 sps:$4 sm:$0xff]  }
 0x1c6   : > { %2707 = vmatprep.subr.bf16.mxu1 %v4872_v49  ;;  %v4951_v49 = vld [vmem:[%s5944_s12 + $0x288] ss:$16 sps:$4 sm:$0xff]  }
 0x1c8   : > { %2667 = vmatpush1.bf16.msra.mxu0 %v4867_v51  ;;  %v4954_v51 = vld [vmem:[%s5944_s12 + $0x488] ss:$16 sps:$4 sm:$0xff]  }
 0x1c9   : > { %2708 = vmatpush1.bf16.msra.mxu1 %v4870_v52  ;;  %2668 = vmatprep.subr.bf16.mxu0 %v4875_v54  ;;  %v4959_v52 = vld [vmem:[%s5944_s12 + $0x2ac] ss:$16 sps:$4 sm:$0xff]  }
 0x1ca   : > { %2709 = vmatprep.subr.bf16.mxu1 %v4878_v55  ;;  %v4962_v54 = vld [vmem:[%s5944_s12 + $0x4ac] ss:$16 sps:$4 sm:$0xff]   ;;  %v4957_v55 = vld [vmem:[%s5944_s12 + $0x2a8] ss:$16 sps:$4 sm:$0xff]  }
 0x1cc   : > { %2669 = vmatpush1.bf16.msra.mxu0 %v4873_v56  ;;  %v4960_v56 = vld [vmem:[%s5944_s12 + $0x4a8] ss:$16 sps:$4 sm:$0xff]  }
 0x1cd   : > { %2710 = vmatpush1.bf16.msra.mxu1 %v4876_v57  ;;  %2670 = vmatprep.subr.bf16.mxu0 %v4881_v58  ;;  %v4965_v57 = vld [vmem:[%s5944_s12 + $0x2cc] ss:$16 sps:$4 sm:$0xff]  }
 0x1ce   : > { %2711 = vmatprep.subr.bf16.mxu1 %v4884_v59  ;;  %v4968_v58 = vld [vmem:[%s5944_s12 + $0x4cc] ss:$16 sps:$4 sm:$0xff]   ;;  %v4963_v59 = vld [vmem:[%s5944_s12 + $0x2c8] ss:$16 sps:$4 sm:$0xff]  }
 0x1d0   : > { %2671 = vmatpush1.bf16.msra.mxu0 %v4879_v60  ;;  %v4966_v60 = vld [vmem:[%s5944_s12 + $0x4c8] ss:$16 sps:$4 sm:$0xff]  }
 0x1d1   : > { %2712 = vmatpush1.bf16.msra.mxu1 %v4882_v61  ;;  %2672 = vmatprep.subr.bf16.mxu0 %v4887_v62  ;;  %v4971_v61 = vld [vmem:[%s5944_s12 + $0x2ec] ss:$16 sps:$4 sm:$0xff]  }
 0x1d2   : > { %2713 = vmatprep.subr.bf16.mxu1 %v4890_v63  ;;  %v4974_v62 = vld [vmem:[%s5944_s12 + $0x4ec] ss:$16 sps:$4 sm:$0xff]   ;;  %v4969_v63 = vld [vmem:[%s5944_s12 + $0x2e8] ss:$16 sps:$4 sm:$0xff]  }
 0x1d4   : > { %2673 = vmatpush1.bf16.msra.mxu0 %v4885_v0  ;;  %v4972_v0 = vld [vmem:[%s5944_s12 + $0x4e8] ss:$16 sps:$4 sm:$0xff]  }
 0x1d5   : > { %2714 = vmatpush1.bf16.msra.mxu1 %v4888_v1  ;;  %2674 = vmatprep.subr.bf16.mxu0 %v4893_v2  ;;  %v4977_v1 = vld [vmem:[%s5944_s12 + $0x30c] ss:$16 sps:$4 sm:$0xff]  }
 0x1d6   : > { %2715 = vmatprep.subr.bf16.mxu1 %v4896_v3  ;;  %v4980_v2 = vld [vmem:[%s5944_s12 + $0x50c] ss:$16 sps:$4 sm:$0xff]   ;;  %v4975_v3 = vld [vmem:[%s5944_s12 + $0x308] ss:$16 sps:$4 sm:$0xff]  }
 0x1d8   : > { %2675 = vmatpush1.bf16.msra.mxu0 %v4891_v4  ;;  %v4978_v4 = vld [vmem:[%s5944_s12 + $0x508] ss:$16 sps:$4 sm:$0xff]  }
 0x1d9   : > { %2716 = vmatpush1.bf16.msra.mxu1 %v4894_v5  ;;  %2676 = vmatprep.subr.bf16.mxu0 %v4899_v6  ;;  %v4983_v5 = vld [vmem:[%s5944_s12 + $0x32c] ss:$16 sps:$4 sm:$0xff]  }
 0x1da   : > { %2717 = vmatprep.subr.bf16.mxu1 %v4902_v7  ;;  %v4986_v6 = vld [vmem:[%s5944_s12 + $0x52c] ss:$16 sps:$4 sm:$0xff]   ;;  %v4981_v7 = vld [vmem:[%s5944_s12 + $0x328] ss:$16 sps:$4 sm:$0xff]  }
 0x1dc   : > { %2677 = vmatpush1.bf16.msra.mxu0 %v4897_v8  ;;  %v4984_v8 = vld [vmem:[%s5944_s12 + $0x528] ss:$16 sps:$4 sm:$0xff]  }
 0x1dd   : > { %2718 = vmatpush1.bf16.msra.mxu1 %v4900_v11  ;;  %2678 = vmatprep.subr.bf16.mxu0 %v4905_v12  ;;  %v4989_v11 = vld [vmem:[%s5944_s12 + $0x34c] ss:$16 sps:$4 sm:$0xff]  }
 0x1de   : > { %2719 = vmatprep.subr.bf16.mxu1 %v4908_v13  ;;  %v4992_v12 = vld [vmem:[%s5944_s12 + $0x54c] ss:$16 sps:$4 sm:$0xff]   ;;  %v4987_v13 = vld [vmem:[%s5944_s12 + $0x348] ss:$16 sps:$4 sm:$0xff]  }
 0x1e0   : > { %2679 = vmatpush1.bf16.msra.mxu0 %v4903_v14  ;;  %v4990_v14 = vld [vmem:[%s5944_s12 + $0x548] ss:$16 sps:$4 sm:$0xff]  }
 0x1e1   : > { %2720 = vmatpush1.bf16.msra.mxu1 %v4906_v15  ;;  %2680 = vmatprep.subr.bf16.mxu0 %v4911_v16  ;;  %v4995_v15 = vld [vmem:[%s5944_s12 + $0x36c] ss:$16 sps:$4 sm:$0xff]  }
 0x1e2   : > { %2721 = vmatprep.subr.bf16.mxu1 %v4914_v17  ;;  %v4998_v16 = vld [vmem:[%s5944_s12 + $0x56c] ss:$16 sps:$4 sm:$0xff]   ;;  %v4993_v17 = vld [vmem:[%s5944_s12 + $0x368] ss:$16 sps:$4 sm:$0xff]  }
 0x1e4   : > { %2681 = vmatpush1.bf16.msra.mxu0 %v4909_v18  ;;  %v4996_v18 = vld [vmem:[%s5944_s12 + $0x568] ss:$16 sps:$4 sm:$0xff]  }
 0x1e5   : > { %2722 = vmatpush1.bf16.msra.mxu1 %v4912_v19  ;;  %2682 = vmatprep.subr.bf16.mxu0 %v4917_v20  ;;  %v5001_v19 = vld [vmem:[%s5944_s12 + $0x38c] ss:$16 sps:$4 sm:$0xff]  }
 0x1e6   : > { %2723 = vmatprep.subr.bf16.mxu1 %v4920_v23  ;;  %v5004_v20 = vld [vmem:[%s5944_s12 + $0x58c] ss:$16 sps:$4 sm:$0xff]   ;;  %v4999_v23 = vld [vmem:[%s5944_s12 + $0x388] ss:$16 sps:$4 sm:$0xff]  }
 0x1e8   : > { %2683 = vmatpush1.bf16.msra.mxu0 %v4915_v24  ;;  %v5002_v24 = vld [vmem:[%s5944_s12 + $0x588] ss:$16 sps:$4 sm:$0xff]  }
 0x1e9   : > { %2724 = vmatpush1.bf16.msra.mxu1 %v4918_v25  ;;  %2684 = vmatprep.subr.bf16.mxu0 %v4923_v26  ;;  %v5007_v25 = vld [vmem:[%s5944_s12 + $0x3ac] ss:$16 sps:$4 sm:$0xff]  }
 0x1ea   : > { %2725 = vmatprep.subr.bf16.mxu1 %v4926_v27  ;;  %v5010_v26 = vld [vmem:[%s5944_s12 + $0x5ac] ss:$16 sps:$4 sm:$0xff]   ;;  %v5005_v27 = vld [vmem:[%s5944_s12 + $0x3a8] ss:$16 sps:$4 sm:$0xff]  }
 0x1ec   : > { %2685 = vmatpush1.bf16.msra.mxu0 %v4921_v29  ;;  %v5008_v29 = vld [vmem:[%s5944_s12 + $0x5a8] ss:$16 sps:$4 sm:$0xff]  }
 0x1ed   : > { %2726 = vmatpush1.bf16.msra.mxu1 %v4924_v30  ;;  %2736 = vmatprep.subr.bf16.mxu0 %v4929_v32  ;;  %v5013_v30 = vld [vmem:[%s5944_s12 + $0x3cc] ss:$16 sps:$4 sm:$0xff]   ;;  %v5011_v32 = vld [vmem:[%s5944_s12 + $0x3c8] ss:$16 sps:$4 sm:$0xff]  }
 0x1ee   : > { %2777 = vmatprep.subr.bf16.mxu1 %v4932_v33  ;;  %v5014_v33 = vld [vmem:[%s5944_s12 + $0x5c8] ss:$16 sps:$4 sm:$0xff]  }
 0x1ef   : > { %2687 = vmatmul.mubr.bf16.vlgmr.msra.gmra.mrb[8].mxu0 %v6210_v34 }
 0x1f0   : > { %2728 = vmatmul.mubr.bf16.vlgmr.msra.gmra.mrb[8].mxu1 %v6054_v9  ;;  %2737 = vmatpush1.bf16.msra.mxu0 %v4927_v35  ;;  %v4939_v9 = vld [vmem:[%s5944_s12 + $0x248] ss:$16 sps:$4 sm:$0xff]   ;;  %v5019_v35 = vld [vmem:[%s5944_s12 + $0x3ec] ss:$16 sps:$4 sm:$0xff]  }
 0x1f1   : > { %2778 = vmatpush1.bf16.msra.mxu1 %v4930_v36  ;;  %2738 = vmatprep.subr.bf16.mxu0 %v4935_v37  ;;  %v5022_v36 = vld [vmem:[%s5944_s12 + $0x5ec] ss:$16 sps:$4 sm:$0xff]   ;;  %v5017_v37 = vld [vmem:[%s5944_s12 + $0x3e8] ss:$16 sps:$4 sm:$0xff]  }
 0x1f2   : > { %2779 = vmatprep.subr.bf16.mxu1 %v4938_v39  ;;  %2768 = vmatprep.mubr.bf16.mxu0 %v6031_v53  ;;  %v4948_v53 = vld [vmem:[%s5944_s12 + $0x468] ss:$16 sps:$4 sm:$0xff]  }
 0x1f3   : > { %2809 = vmatprep.mubr.bf16.mxu1 %v6087_v38  ;;  %v4953_v38 = vld [vmem:[%s5944_s12 + $0x28c] ss:$16 sps:$4 sm:$0xff]   ;;  %v5020_v39 = vld [vmem:[%s5944_s12 + $0x5e8] ss:$16 sps:$4 sm:$0xff]  }
 0x1f4   : > { %2739 = vmatpush1.bf16.msra.mxu0 %v4933_v50  ;;  %v5025_v50 = vld [vmem:[%s5944_s12 + $0x60c] ss:$16 sps:$4 sm:$0xff]  }
 0x1f5   : > { %2780 = vmatpush1.bf16.msra.mxu1 %v4936_v40  ;;  %2740 = vmatprep.subr.bf16.mxu0 %v4941_v42  ;;  %v5028_v40 = vld [vmem:[%s5944_s12 + $0x80c] ss:$16 sps:$4 sm:$0xff]   ;;  %v5023_v42 = vld [vmem:[%s5944_s12 + $0x608] ss:$16 sps:$4 sm:$0xff]  }
 0x1f6   : > { %2781 = vmatprep.subr.bf16.mxu1 %v4944_v43  ;;  %v5026_v43 = vld [vmem:[%s5944_s12 + $0x808] ss:$16 sps:$4 sm:$0xff]  }
 0x1f8   : > { %2741 = vmatpush1.bf16.msra.mxu0 %v4939_v9  ;;  %v5031_v9 = vld [vmem:[%s5944_s12 + $0x62c] ss:$16 sps:$4 sm:$0xff]  }
 0x1f9   : > { %2782 = vmatpush1.bf16.msra.mxu1 %v4942_v44  ;;  %2742 = vmatprep.subr.bf16.mxu0 %v4947_v45  ;;  %v5034_v44 = vld [vmem:[%s5944_s12 + $0x82c] ss:$16 sps:$4 sm:$0xff]   ;;  %v5029_v45 = vld [vmem:[%s5944_s12 + $0x628] ss:$16 sps:$4 sm:$0xff]  }
 0x1fa   : > { %2783 = vmatprep.subr.bf16.mxu1 %v4950_v46  ;;  %v5032_v46 = vld [vmem:[%s5944_s12 + $0x828] ss:$16 sps:$4 sm:$0xff]  }
 0x1fc   : > { %2743 = vmatpush1.bf16.msra.mxu0 %v4945_v47  ;;  %v5037_v47 = vld [vmem:[%s5944_s12 + $0x64c] ss:$16 sps:$4 sm:$0xff]  }
 0x1fd   : > { %2784 = vmatpush1.bf16.msra.mxu1 %v4948_v53  ;;  %2744 = vmatprep.subr.bf16.mxu0 %v4953_v38  ;;  %v5040_v53 = vld [vmem:[%s5944_s12 + $0x84c] ss:$16 sps:$4 sm:$0xff]  }
 0x1fe   : > { %2785 = vmatprep.subr.bf16.mxu1 %v4956_v48  ;;  %v5043_v38 = vld [vmem:[%s5944_s12 + $0x66c] ss:$16 sps:$4 sm:$0xff]  }
 0x1ff   : > { %v5046_v48 = vld [vmem:[%s5944_s12 + $0x86c] ss:$16 sps:$4 sm:$0xff]  }
 0x200   : > { %2745 = vmatpush1.bf16.msra.mxu0 %v4951_v49  ;;  %v5041_v49 = vld [vmem:[%s5944_s12 + $0x668] ss:$16 sps:$4 sm:$0xff]  }
 0x201   : > { %2786 = vmatpush1.bf16.msra.mxu1 %v4954_v51  ;;  %2746 = vmatprep.subr.bf16.mxu0 %v4959_v52  ;;  %v5052_v51 = vld [vmem:[%s5944_s12 + $0x88c] ss:$16 sps:$4 sm:$0xff]   ;;  %v5047_v52 = vld [vmem:[%s5944_s12 + $0x688] ss:$16 sps:$4 sm:$0xff]  }
 0x202   : > { %2787 = vmatprep.subr.bf16.mxu1 %v4962_v54  ;;  %v5050_v54 = vld [vmem:[%s5944_s12 + $0x888] ss:$16 sps:$4 sm:$0xff]  }
 0x204   : > { %2747 = vmatpush1.bf16.msra.mxu0 %v4957_v55  ;;  %v5055_v55 = vld [vmem:[%s5944_s12 + $0x6ac] ss:$16 sps:$4 sm:$0xff]  }
 0x205   : > { %2788 = vmatpush1.bf16.msra.mxu1 %v4960_v56  ;;  %2748 = vmatprep.subr.bf16.mxu0 %v4965_v57  ;;  %v5058_v56 = vld [vmem:[%s5944_s12 + $0x8ac] ss:$16 sps:$4 sm:$0xff]   ;;  %v5053_v57 = vld [vmem:[%s5944_s12 + $0x6a8] ss:$16 sps:$4 sm:$0xff]  }
 0x206   : > { %2789 = vmatprep.subr.bf16.mxu1 %v4968_v58  ;;  %v5056_v58 = vld [vmem:[%s5944_s12 + $0x8a8] ss:$16 sps:$4 sm:$0xff]  }
 0x208   : > { %2749 = vmatpush1.bf16.msra.mxu0 %v4963_v59  ;;  %v5061_v59 = vld [vmem:[%s5944_s12 + $0x6cc] ss:$16 sps:$4 sm:$0xff]  }
 0x209   : > { %2790 = vmatpush1.bf16.msra.mxu1 %v4966_v60  ;;  %2750 = vmatprep.subr.bf16.mxu0 %v4971_v61  ;;  %v5064_v60 = vld [vmem:[%s5944_s12 + $0x8cc] ss:$16 sps:$4 sm:$0xff]  }
 0x20a   : > { %2791 = vmatprep.subr.bf16.mxu1 %v4974_v62 }
 0x20c   : > { %2751 = vmatpush1.bf16.msra.mxu0 %v4969_v63 }
 0x20d   : > { %2792 = vmatpush1.bf16.msra.mxu1 %v4972_v0  ;;  %2752 = vmatprep.subr.bf16.mxu0 %v4977_v1 }
 0x20e   : > { %2793 = vmatprep.subr.bf16.mxu1 %v4980_v2 }
 0x210   : > { %2753 = vmatpush1.bf16.msra.mxu0 %v4975_v3 }
 0x211   : > { %2794 = vmatpush1.bf16.msra.mxu1 %v4978_v4  ;;  %2754 = vmatprep.subr.bf16.mxu0 %v4983_v5  ;;  %v5059_v5 = vld [vmem:[%s5944_s12 + $0x6c8] ss:$16 sps:$4 sm:$0xff]  }
 0x212   : > { %2795 = vmatprep.subr.bf16.mxu1 %v4986_v6  ;;  %v5062_v6 = vld [vmem:[%s5944_s12 + $0x8c8] ss:$16 sps:$4 sm:$0xff]  }
 0x214   : > { %2755 = vmatpush1.bf16.msra.mxu0 %v4981_v7 }
 0x215   : > { %2796 = vmatpush1.bf16.msra.mxu1 %v4984_v8  ;;  %2756 = vmatprep.subr.bf16.mxu0 %v4989_v11  ;;  %v5067_v11 = vld [vmem:[%s5944_s12 + $0x6ec] ss:$16 sps:$4 sm:$0xff]  }
 0x216   : > { %2797 = vmatprep.subr.bf16.mxu1 %v4992_v12  ;;  %v5070_v12 = vld [vmem:[%s5944_s12 + $0x8ec] ss:$16 sps:$4 sm:$0xff]  }
 0x218   : > { %2757 = vmatpush1.bf16.msra.mxu0 %v4987_v13  ;;  %v5065_v13 = vld [vmem:[%s5944_s12 + $0x6e8] ss:$16 sps:$4 sm:$0xff]  }
 0x219   : > { %2798 = vmatpush1.bf16.msra.mxu1 %v4990_v14  ;;  %2758 = vmatprep.subr.bf16.mxu0 %v4995_v15  ;;  %v5068_v14 = vld [vmem:[%s5944_s12 + $0x8e8] ss:$16 sps:$4 sm:$0xff]   ;;  %v5073_v15 = vld [vmem:[%s5944_s12 + $0x70c] ss:$16 sps:$4 sm:$0xff]  }
 0x21a   : > { %2799 = vmatprep.subr.bf16.mxu1 %v4998_v16  ;;  %v5076_v16 = vld [vmem:[%s5944_s12 + $0x90c] ss:$16 sps:$4 sm:$0xff]  }
 0x21c   : > { %2759 = vmatpush1.bf16.msra.mxu0 %v4993_v17  ;;  %v5071_v17 = vld [vmem:[%s5944_s12 + $0x708] ss:$16 sps:$4 sm:$0xff]  }
 0x21d   : > { %2800 = vmatpush1.bf16.msra.mxu1 %v4996_v18  ;;  %2760 = vmatprep.subr.bf16.mxu0 %v5001_v19  ;;  %v5074_v18 = vld [vmem:[%s5944_s12 + $0x908] ss:$16 sps:$4 sm:$0xff]   ;;  %v5079_v19 = vld [vmem:[%s5944_s12 + $0x72c] ss:$16 sps:$4 sm:$0xff]  }
 0x21e   : > { %2801 = vmatprep.subr.bf16.mxu1 %v5004_v20  ;;  %v5082_v20 = vld [vmem:[%s5944_s12 + $0x92c] ss:$16 sps:$4 sm:$0xff]  }
 0x220   : > { %2761 = vmatpush1.bf16.msra.mxu0 %v4999_v23  ;;  %v5077_v23 = vld [vmem:[%s5944_s12 + $0x728] ss:$16 sps:$4 sm:$0xff]  }
 0x221   : > { %2802 = vmatpush1.bf16.msra.mxu1 %v5002_v24  ;;  %2762 = vmatprep.subr.bf16.mxu0 %v5007_v25  ;;  %v5080_v24 = vld [vmem:[%s5944_s12 + $0x928] ss:$16 sps:$4 sm:$0xff]   ;;  %v5085_v25 = vld [vmem:[%s5944_s12 + $0x74c] ss:$16 sps:$4 sm:$0xff]  }
 0x222   : > { %2803 = vmatprep.subr.bf16.mxu1 %v5010_v26  ;;  %v5088_v26 = vld [vmem:[%s5944_s12 + $0x94c] ss:$16 sps:$4 sm:$0xff]  }
 0x224   : > { %2763 = vmatpush1.bf16.msra.mxu0 %v5005_v27  ;;  %v5083_v27 = vld [vmem:[%s5944_s12 + $0x748] ss:$16 sps:$4 sm:$0xff]  }
 0x225   : > { %2804 = vmatpush1.bf16.msra.mxu1 %v5008_v29  ;;  %2764 = vmatprep.subr.bf16.mxu0 %v5013_v30  ;;  %v5086_v29 = vld [vmem:[%s5944_s12 + $0x948] ss:$16 sps:$4 sm:$0xff]   ;;  %v5091_v30 = vld [vmem:[%s5944_s12 + $0x76c] ss:$16 sps:$4 sm:$0xff]  }
 0x226   : > { %2805 = vmatprep.subr.bf16.mxu1 %v5016_v31  ;;  %v5094_v31 = vld [vmem:[%s5944_s12 + $0x96c] ss:$16 sps:$4 sm:$0xff]  }
 0x228   : > { %2765 = vmatpush1.bf16.msra.mxu0 %v5011_v32  ;;  %v5089_v32 = vld [vmem:[%s5944_s12 + $0x768] ss:$16 sps:$4 sm:$0xff]  }
 0x229   : > { %2806 = vmatpush1.bf16.msra.mxu1 %v5014_v33  ;;  %2766 = vmatprep.subr.bf16.mxu0 %v5019_v35  ;;  %v5092_v33 = vld [vmem:[%s5944_s12 + $0x968] ss:$16 sps:$4 sm:$0xff]   ;;  %v5097_v35 = vld [vmem:[%s5944_s12 + $0x78c] ss:$16 sps:$4 sm:$0xff]  }
 0x22a   : > { %2807 = vmatprep.subr.bf16.mxu1 %v5022_v36  ;;  %v5100_v36 = vld [vmem:[%s5944_s12 + $0x98c] ss:$16 sps:$4 sm:$0xff]  }
 0x22c   : > { %2767 = vmatpush1.bf16.msra.mxu0 %v5017_v37  ;;  %v5095_v37 = vld [vmem:[%s5944_s12 + $0x788] ss:$16 sps:$4 sm:$0xff]  }
 0x22d   : > { %2808 = vmatpush1.bf16.msra.mxu1 %v5020_v39  ;;  %2818 = vmatprep.subr.bf16.mxu0 %v5025_v50  ;;  %v5098_v39 = vld [vmem:[%s5944_s12 + $0x988] ss:$16 sps:$4 sm:$0xff]   ;;  %v5103_v50 = vld [vmem:[%s5944_s12 + $0x7ac] ss:$16 sps:$4 sm:$0xff]  }
 0x22e   : > { %2859 = vmatprep.subr.bf16.mxu1 %v5028_v40  ;;  %v5106_v40 = vld [vmem:[%s5944_s12 + $0x9ac] ss:$16 sps:$4 sm:$0xff]  }
 0x22f   : > { %2769 = vmatmul.mubr.bf16.vlgmr.msra.gmra.mrb[12].mxu0 %v6056_v10  ;;  %v5035_v10 = vld [vmem:[%s5944_s12 + $0x648] ss:$16 sps:$4 sm:$0xff]  }
 0x230   : > { %2810 = vmatmul.mubr.bf16.vlgmr.msra.gmra.mrb[12].mxu1 %v6134_v21  ;;  %2819 = vmatpush1.bf16.msra.mxu0 %v5023_v42  ;;  %v5038_v21 = vld [vmem:[%s5944_s12 + $0x848] ss:$16 sps:$4 sm:$0xff]  }
 0x231   : > { %2860 = vmatpush1.bf16.msra.mxu1 %v5026_v43  ;;  %2820 = vmatprep.subr.bf16.mxu0 %v5031_v9  ;;  %v5101_v42 = vld [vmem:[%s5944_s12 + $0x7a8] ss:$16 sps:$4 sm:$0xff]   ;;  %v5109_v9 = vld [vmem:[%s5944_s12 + $0x7cc] ss:$16 sps:$4 sm:$0xff]  }
 0x232   : > { %2861 = vmatprep.subr.bf16.mxu1 %v5034_v44  ;;  %2850 = vmatprep.mubr.bf16.mxu0 %v6091_v41  ;;  %v5044_v41 = vld [vmem:[%s5944_s12 + $0x868] ss:$16 sps:$4 sm:$0xff]   ;;  %v5112_v44 = vld [vmem:[%s5944_s12 + $0x9cc] ss:$16 sps:$4 sm:$0xff]  }
 0x233   : > { %2891 = vmatprep.mubr.bf16.mxu1 %v6145_v28  ;;  %v5049_v28 = vld [vmem:[%s5944_s12 + $0x68c] ss:$16 sps:$4 sm:$0xff]   ;;  %v5104_v43 = vld [vmem:[%s5944_s12 + $0x9a8] ss:$16 sps:$4 sm:$0xff]  }
 0x234   : > { %2821 = vmatpush1.bf16.msra.mxu0 %v5029_v45  ;;  %v5107_v45 = vld [vmem:[%s5944_s12 + $0x7c8] ss:$16 sps:$4 sm:$0xff]  }
 0x235   : > { %2862 = vmatpush1.bf16.msra.mxu1 %v5032_v46  ;;  %2822 = vmatprep.subr.bf16.mxu0 %v5037_v47  ;;  %v5110_v46 = vld [vmem:[%s5944_s12 + $0x9c8] ss:$16 sps:$4 sm:$0xff]   ;;  %v5115_v47 = vld [vmem:[%s5944_s12 + $0x7ec] ss:$16 sps:$4 sm:$0xff]  }
 0x236   : > { %2863 = vmatprep.subr.bf16.mxu1 %v5040_v53  ;;  %v5118_v53 = vld [vmem:[%s5944_s12 + $0x9ec] ss:$16 sps:$4 sm:$0xff]  }
 0x238   : > { %2823 = vmatpush1.bf16.msra.mxu0 %v5035_v10  ;;  %v5113_v10 = vld [vmem:[%s5944_s12 + $0x7e8] ss:$16 sps:$4 sm:$0xff]  }
 0x239   : > { %2864 = vmatpush1.bf16.msra.mxu1 %v5038_v21  ;;  %2824 = vmatprep.subr.bf16.mxu0 %v5043_v38  ;;  %v5116_v21 = vld [vmem:[%s5944_s12 + $0x9e8] ss:$16 sps:$4 sm:$0xff]  }
 0x23a   : > { %2865 = vmatprep.subr.bf16.mxu1 %v5046_v48 }
 0x23c   : > { %2825 = vmatpush1.bf16.msra.mxu0 %v5041_v49 }
 0x23d   : > { %2866 = vmatpush1.bf16.msra.mxu1 %v5044_v41  ;;  %2826 = vmatprep.subr.bf16.mxu0 %v5049_v28 }
 0x23e   : > { %2867 = vmatprep.subr.bf16.mxu1 %v5052_v51 }
 0x240   : > { %2827 = vmatpush1.bf16.msra.mxu0 %v5047_v52 }
 0x241   : > { %2868 = vmatpush1.bf16.msra.mxu1 %v5050_v54  ;;  %2828 = vmatprep.subr.bf16.mxu0 %v5055_v55 }
 0x242   : > { %2869 = vmatprep.subr.bf16.mxu1 %v5058_v56  ;;  %v2524_v61 = vpop.f32.mrb[0].mxu0 }
 0x243   : > { %v2565_v62 = vpop.f32.mrb[0].mxu1  ;;  %v2526_v0 = vpop.f32.mrb[1].mxu0 }
 0x244   : > { %v6308_v63 = vadd.f32 %v2565_v62, %v2524_v61  ;;  %v2567_v1 = vpop.f32.mrb[1].mxu1  ;;  %v2528_v3 = vpop.f32.mrb[2].mxu0  ;;  %2829 = vmatpush1.bf16.msra.mxu0 %v5053_v57  ;;  %v547_v62 = vld [vmem:[#allocation2 + $0x8] sm:$0xff] }
 0x245   : > { %v6310_v2 = vadd.f32 %v2567_v1, %v2526_v0  ;;  %v2569_v4 = vpop.f32.mrb[2].mxu1  ;;  %2870 = vmatpush1.bf16.msra.mxu1 %v5056_v58  ;;  %v2529_v7 = vpop.f32.mrb[3].mxu0  ;;  %2830 = vmatprep.subr.bf16.mxu0 %v5061_v59  ;;  %v546_v59 = vld [vmem:[#allocation2] sm:$0xff] }
 0x246   : > { %v2570_v8 = vpop.f32.mrb[3].mxu1  ;;  %2871 = vmatprep.subr.bf16.mxu1 %v5064_v60 }
 0x248   : > { %2831 = vmatpush1.bf16.msra.mxu0 %v5059_v5 }
 0x249   : > { %2872 = vmatpush1.bf16.msra.mxu1 %v5062_v6  ;;  %2832 = vmatprep.subr.bf16.mxu0 %v5067_v11 }
 0x24a   : > { %2873 = vmatprep.subr.bf16.mxu1 %v5070_v12 }
 0x24c   : > { %2833 = vmatpush1.bf16.msra.mxu0 %v5065_v13 }
 0x24d   : > { %2874 = vmatpush1.bf16.msra.mxu1 %v5068_v14  ;;  %2834 = vmatprep.subr.bf16.mxu0 %v5073_v15 }
 0x24e   : > { %2875 = vmatprep.subr.bf16.mxu1 %v5076_v16 }
 0x250   : > { %2835 = vmatpush1.bf16.msra.mxu0 %v5071_v17 }
 0x251   : > { %2876 = vmatpush1.bf16.msra.mxu1 %v5074_v18  ;;  %2836 = vmatprep.subr.bf16.mxu0 %v5079_v19 }
 0x252   : > { %2877 = vmatprep.subr.bf16.mxu1 %v5082_v20 }
 0x254   : > { %2837 = vmatpush1.bf16.msra.mxu0 %v5077_v23 }
 0x255   : > { %2878 = vmatpush1.bf16.msra.mxu1 %v5080_v24  ;;  %2838 = vmatprep.subr.bf16.mxu0 %v5085_v25 }
 0x256   : > { %2879 = vmatprep.subr.bf16.mxu1 %v5088_v26 }
 0x258   : > { %2839 = vmatpush1.bf16.msra.mxu0 %v5083_v27 }
 0x259   : > { %2880 = vmatpush1.bf16.msra.mxu1 %v5086_v29  ;;  %2840 = vmatprep.subr.bf16.mxu0 %v5091_v30  ;;  %v548_v29 = vld [vmem:[#allocation2 + $0x10] sm:$0xff] }
 0x25a   : > { %2881 = vmatprep.subr.bf16.mxu1 %v5094_v31 }
 0x25c   : > { %2841 = vmatpush1.bf16.msra.mxu0 %v5089_v32 }
 0x25d   : > { %2882 = vmatpush1.bf16.msra.mxu1 %v5092_v33  ;;  %2842 = vmatprep.subr.bf16.mxu0 %v5097_v35  ;;  %v549_v35 = vld [vmem:[#allocation2 + $0x18] sm:$0xff] }
 0x25e   : > { %2883 = vmatprep.subr.bf16.mxu1 %v5100_v36 }
 0x260   : > { %2843 = vmatpush1.bf16.msra.mxu0 %v5095_v37 }
 0x261   : > { %2884 = vmatpush1.bf16.msra.mxu1 %v5098_v39  ;;  %2844 = vmatprep.subr.bf16.mxu0 %v5103_v50 }
 0x262   : > { %2885 = vmatprep.subr.bf16.mxu1 %v5106_v40 }
 0x264   : > { %2845 = vmatpush1.bf16.msra.mxu0 %v5101_v42  ;;  %v5119_v42 = vld [vmem:[#allocation7 + $0x40] sm:$0xff] (!%p4308_p13)  }
 0x265   : > { %2886 = vmatpush1.bf16.msra.mxu1 %v5104_v43  ;;  %2846 = vmatprep.subr.bf16.mxu0 %v5109_v9  ;;  %v5120_v43 = vld [vmem:[#allocation7 + $0xc0] sm:$0xff] (!%p4308_p13)  }
 0x266   : > { %2887 = vmatprep.subr.bf16.mxu1 %v5112_v44  ;;  %v5121_v9 = vld [vmem:[#allocation7] sm:$0xff] (!%p4308_p13)  }
 0x267   : > { %v5122_v44 = vld [vmem:[#allocation7 + $0x80] sm:$0xff] (!%p4308_p13)  }
 0x268   : > { %2847 = vmatpush1.bf16.msra.mxu0 %v5107_v45  ;;  %v5123_v45 = vld [vmem:[#allocation7 + $0x48] sm:$0xff] (!%p4308_p13)  }
 0x269   : > { %2888 = vmatpush1.bf16.msra.mxu1 %v5110_v46  ;;  %2848 = vmatprep.subr.bf16.mxu0 %v5115_v47  ;;  %v5124_v46 = vld [vmem:[#allocation7 + $0xc8] sm:$0xff] (!%p4308_p13)  }
 0x26a   : > { %2889 = vmatprep.subr.bf16.mxu1 %v5118_v53  ;;  %v5125_v47 = vld [vmem:[#allocation7 + $0x8] sm:$0xff] (!%p4308_p13)  }
 0x26b   : > { %v5126_v53 = vld [vmem:[#allocation7 + $0x88] sm:$0xff] (!%p4308_p13)  }
 0x26c   : > { %2849 = vmatpush1.bf16.msra.mxu0 %v5113_v10  ;;  %v5127_v10 = vld [vmem:[#allocation7 + $0x50] sm:$0xff] (!%p4308_p13)  }
 0x26d   : > { %2890 = vmatpush1.bf16.msra.mxu1 %v5116_v21  ;;  %4397 = vmatprep.subr.bf16.mxu0 (!%p4308_p13), %v5119_v42  ;;  %v5128_v21 = vld [vmem:[#allocation7 + $0xd0] sm:$0xff] (!%p4308_p13)   ;;  %v5155_v42 = vld [vmem:[#allocation10 + $0x20] sm:$0xff] (!%p4308_p13)  }
 0x26e   : > { %4419 = vmatprep.subr.bf16.mxu1 (!%p4308_p13), %v5120_v43  ;;  %v5156_v43 = vld [vmem:[#allocation10 + $0x28] sm:$0xff] (!%p4308_p13)  }
 0x26f   : > { %2851 = vmatmul.mubr.bf16.vlgmr.msra.gmra.mrb[16].mxu0 %v6136_v22 }
 0x270   : > { %2892 = vmatmul.mubr.bf16.vlgmr.msra.gmra.mrb[16].mxu1 %v6210_v34  ;;  %4398 = vmatpush3.bf16.msra.mxu0 (!%p4308_p13), %v5121_v9  ;;  %v5157_v9 = vld [vmem:[#allocation10 + $0x30] sm:$0xff] (!%p4308_p13)  }
 0x271   : > { %4420 = vmatpush3.bf16.msra.mxu1 (!%p4308_p13), %v5122_v44  ;;  %4399 = vmatprep.subr.bf16.mxu0 (!%p4308_p13), %v5123_v45  ;;  %v5158_v44 = vld [vmem:[#allocation10 + $0x38] sm:$0xff] (!%p4308_p13)   ;;  %v5159_v45 = vld [vmem:[#allocation13] sm:$0xff] (!%p4308_p13)  }
 0x272   : > { %4421 = vmatprep.subr.bf16.mxu1 (!%p4308_p13), %v5124_v46  ;;  %v5160_v46 = vld [vmem:[#allocation13 + $0x8] sm:$0xff] (!%p4308_p13)  }
 0x274   : > { %4400 = vmatpush3.bf16.msra.mxu0 (!%p4308_p13), %v5125_v47  ;;  %v5161_v47 = vld [vmem:[#allocation13 + $0x10] sm:$0xff] (!%p4308_p13)  }
 0x275   : > { %4422 = vmatpush3.bf16.msra.mxu1 (!%p4308_p13), %v5126_v53  ;;  %4401 = vmatprep.subr.bf16.mxu0 (!%p4308_p13), %v5127_v10  ;;  %v5162_v53 = vld [vmem:[#allocation13 + $0x18] sm:$0xff] (!%p4308_p13)   ;;  %v5163_v10 = vld [vmem:[#allocation13 + $0x20] sm:$0xff] (!%p4308_p13)  }
 0x276   : > { %4423 = vmatprep.subr.bf16.mxu1 (!%p4308_p13), %v5128_v21  ;;  %v5164_v21 = vld [vmem:[#allocation13 + $0x28] sm:$0xff] (!%p4308_p13)  }
 0x282   : > { %v2606_v38 = vpop.f32.mrb[4].mxu0 }
 0x283   : > { %v2647_v48 = vpop.f32.mrb[4].mxu1  ;;  %v2607_v49 = vadd.f32 %v2606_v38, %v6308_v63  ;;  %v2608_v41 = vpop.f32.mrb[5].mxu0  ;;  %v5129_v38 = vld [vmem:[#allocation7 + $0x10] sm:$0xff] (!%p4308_p13)  }
 0x284   : > { %v2649_v28 = vpop.f32.mrb[5].mxu1  ;;  %v2609_v51 = vadd.f32 %v2608_v41, %v6310_v2  ;;  %v2610_v52 = vpop.f32.mrb[6].mxu0  ;;  %4402 = vmatpush3.bf16.msra.mxu0 (!%p4308_p13), %v5129_v38  ;;  %v5132_v41 = vld [vmem:[#allocation7 + $0xd8] sm:$0xff] (!%p4308_p13)  }
 0x285   : > { %v2651_v54 = vpop.f32.mrb[6].mxu1  ;;  %v2648_v55 = vadd.f32 %v2647_v48, %v2607_v49  ;;  %v2611_v56 = vpop.f32.mrb[7].mxu0  ;;  %v5130_v48 = vld [vmem:[#allocation7 + $0x90] sm:$0xff] (!%p4308_p13)   ;;  %v5131_v49 = vld [vmem:[#allocation7 + $0x58] sm:$0xff] (!%p4308_p13)   ;;  %v5135_v52 = vld [vmem:[#allocation7 + $0x60] sm:$0xff] (!%p4308_p13)  }
 0x286   : > { %v2652_v57 = vpop.f32.mrb[7].mxu1  ;;  %v2650_v58 = vadd.f32 %v2649_v28, %v2609_v51  ;;  %4424 = vmatpush3.bf16.msra.mxu1 (!%p4308_p13), %v5130_v48  ;;  %4403 = vmatprep.subr.bf16.mxu0 (!%p4308_p13), %v5131_v49  ;;  %v5133_v28 = vld [vmem:[#allocation7 + $0x18] sm:$0xff] (!%p4308_p13)   ;;  %v5136_v54 = vld [vmem:[#allocation7 + $0xe0] sm:$0xff] (!%p4308_p13)   ;;  %v2918_v56 = vlaneseq (!%p4308_p13) }
 0x287   : > { %4425 = vmatprep.subr.bf16.mxu1 (!%p4308_p13), %v5132_v41  ;;  %v5134_v51 = vld [vmem:[#allocation7 + $0x98] sm:$0xff] (!%p4308_p13)   ;;  %v5138_v57 = vld [vmem:[#allocation7 + $0xa0] sm:$0xff] (!%p4308_p13)  }
 0x288   : > { %4404 = vmatpush3.bf16.msra.mxu0 (!%p4308_p13), %v5133_v28  ;;  %v4309_v49 = vld [vmem:[#allocation8] ss:$0 sm:$0xff] (!%p4308_p13) }
 0x289   : > { %4405 = vmatprep.subr.bf16.mxu0 (!%p4308_p13), %v5135_v52 }
 0x28a   : > { %4426 = vmatpush3.bf16.msra.mxu1 (!%p4308_p13), %v5134_v51 }
 0x28b   : > { %4427 = vmatprep.subr.bf16.mxu1 (!%p4308_p13), %v5136_v54 }
 0x28e   : > { %4428 = vmatpush3.bf16.msra.mxu1 (!%p4308_p13), %v5138_v57 }
 0x2c2   : > { %v2688_v60 = vpop.f32.mrb[8].mxu0 }
 0x2c3   : > { %v2729_v61 = vpop.f32.mrb[8].mxu1  ;;  %v2689_v22 = vadd.f32 %v2688_v60, %v2648_v55  ;;  %v2690_v34 = vpop.f32.mrb[9].mxu0  ;;  %v5137_v55 = vld [vmem:[#allocation7 + $0x20] sm:$0xff] (!%p4308_p13)   ;;  %v5141_v60 = vld [vmem:[#allocation7 + $0x28] sm:$0xff] (!%p4308_p13)  }
 0x2c4   : > { %v2731_v0 = vpop.f32.mrb[9].mxu1  ;;  %v2691_v1 = vadd.f32 %v2690_v34, %v2650_v58  ;;  %v2692_v3 = vpop.f32.mrb[10].mxu0  ;;  %4406 = vmatpush3.bf16.msra.mxu0 (!%p4308_p13), %v5137_v55  ;;  %v5139_v58 = vld [vmem:[#allocation7 + $0x68] sm:$0xff] (!%p4308_p13)   ;;  %v5144_v34 = vld [vmem:[#allocation7 + $0xf0] sm:$0xff] (!%p4308_p13)  }
 0x2c5   : > { %v2733_v63 = vpop.f32.mrb[10].mxu1  ;;  %v2900_v4 = vadd.f32 %v2689_v22, %v546_v59  ;;  %v2693_v5 = vpop.f32.mrb[11].mxu0  ;;  %v5140_v59 = vld [vmem:[#allocation7 + $0xe8] sm:$0xff] (!%p4308_p13)   ;;  %4407 = vmatprep.subr.bf16.mxu0 (!%p4308_p13), %v5139_v58  ;;  %v5146_v3 = vld [vmem:[#allocation7 + $0xb0] sm:$0xff] (!%p4308_p13)  }
 0x2c6   : > { %v2734_v6 = vpop.f32.mrb[11].mxu1  ;;  %v2901_v2 = vadd.f32 %v2691_v1, %v547_v62  ;;  %4429 = vmatprep.subr.bf16.mxu1 (!%p4308_p13), %v5140_v59  ;;  %v5142_v22 = vld [vmem:[#allocation7 + $0xa8] sm:$0xff] (!%p4308_p13)   ;;  %v5143_v62 = vld [vmem:[#allocation7 + $0x70] sm:$0xff] (!%p4308_p13)  }
 0x2c7   : > { %2904 = vst [vmem:[#allocation2] sm:$0xff] %v2900_v4  ;;  %4430 = vmatpush3.bf16.msra.mxu1 (!%p4308_p13), %v5142_v22  ;;  %v5147_v4 = vld [vmem:[#allocation7 + $0x78] sm:$0xff] (!%p4308_p13)  }
 0x2c8   : > { %2905 = vst [vmem:[#allocation2 + $0x8] sm:$0xff] %v2901_v2  ;;  %4408 = vmatpush3.bf16.msra.mxu0 (!%p4308_p13), %v5141_v60  ;;  %4431 = vmatprep.subr.bf16.mxu1 (!%p4308_p13), %v5144_v34  ;;  %v5148_v6 = vld [vmem:[#allocation7 + $0xf8] sm:$0xff] (!%p4308_p13)  }
 0x2c9   : > { %4409 = vmatprep.subr.bf16.mxu0 (!%p4308_p13), %v5143_v62  ;;  %v5165_v62 = vld [vmem:[#allocation13 + $0x30] sm:$0xff] (!%p4308_p13)   ;;  %v5166_v34 = vld [vmem:[#allocation13 + $0x38] sm:$0xff] (!%p4308_p13)  }
 0x2cb   : > { %4432 = vmatpush3.bf16.msra.mxu1 (!%p4308_p13), %v5146_v3  ;;  %v5169_v3 = vld [vmem:[#allocation16 + $0x4] ss:$16 sps:$4 sm:$0xff] (!%p4308_p13)  }
 0x2cc   : > { %4433 = vmatprep.subr.bf16.mxu1 (!%p4308_p13), %v5148_v6  ;;  %v5175_v6 = vld [vmem:[#allocation16 + $0x24] ss:$16 sps:$4 sm:$0xff] (!%p4308_p13)  }
 0x302   : > { %v2770_v7 = vpop.f32.mrb[12].mxu0 }
 0x303   : > { %v2811_v8 = vpop.f32.mrb[12].mxu1  ;;  %v2771_v11 = vadd.f32 %v2770_v7, %v2729_v61  ;;  %v2772_v12 = vpop.f32.mrb[13].mxu0  ;;  %v6355_v61 = vshrl.u32 (!%p4308_p13), %v2918_v56, 7  ;;  %v5149_v7 = vld [vmem:[#allocation7 + $0x38] sm:$0xff] (!%p4308_p13)  }
 0x304   : > { %v2813_v13 = vpop.f32.mrb[13].mxu1  ;;  %v2773_v14 = vadd.f32 %v2772_v12, %v2731_v0  ;;  %v2774_v15 = vpop.f32.mrb[14].mxu0  ;;  %v5145_v0 = vld [vmem:[#allocation7 + $0x30] sm:$0xff] (!%p4308_p13)   ;;  %v2916_v12 = vld [vmem:[#allocation5] sm:$0xf] (!%p4308_p13) }
 0x305   : > { %v2815_v16 = vpop.f32.mrb[14].mxu1  ;;  %v2812_v17 = vadd.f32 %v2811_v8, %v2771_v11  ;;  %v2775_v18 = vpop.f32.mrb[15].mxu0  ;;  %v2924_v1 = vsub.s32 (!%p4308_p13), 1, %v6355_v61  ;;  %v2932_v63 = vsub.s32 (!%p4308_p13), 3, %v6355_v61  ;;  %4410 = vmatpush3.bf16.msra.mxu0 (!%p4308_p13), %v5145_v0  ;;  %v2920_v5 = vsub.s32 (!%p4308_p13), 0, %v6355_v61  ;;  %v5150_v8 = vld [vmem:[#allocation7 + $0xb8] sm:$0xff] (!%p4308_p13)  }
 0x306   : > { %v2816_v19 = vpop.f32.mrb[15].mxu1  ;;  %v2814_v20 = vadd.f32 %v2813_v13, %v2773_v14  ;;  %v2928_v2 = vsub.s32 (!%p4308_p13), 2, %v6355_v61  ;;  %4411 = vmatprep.subr.bf16.mxu0 (!%p4308_p13), %v5147_v4  ;;  %v2913_v11 = vld [vmem:[#allocation2 + $0x8] sm:$0xff] (!%p4308_p13)  ;;  %4434 = vmatpush3.bf16.msra.mxu1 (!%p4308_p13), %v5150_v8  ;;  %v2912_v16 = vld [vmem:[#allocation2] sm:$0xff] (!%p4308_p13) }
 0x307   : > { %v2925_v14 = vrot.slane (!%p4308_p13), %v2916_v12, %v2924_v1  ;;  %v2933_v15 = vrot.slane (!%p4308_p13), %v2916_v12, %v2932_v63  ;;  %v5167_v0 = vld [vmem:[#allocation16] ss:$16 sps:$4 sm:$0xff] (!%p4308_p13)   ;;  %v5172_v4 = vld [vmem:[#allocation16 + $0xc] ss:$16 sps:$4 sm:$0xff] (!%p4308_p13)   ;;  %v5181_v8 = vld [vmem:[#allocation16 + $0x44] ss:$16 sps:$4 sm:$0xff] (!%p4308_p13)  }
 0x308   : > { %v2929_v19 = vrot.slane (!%p4308_p13), %v2916_v12, %v2928_v2 }
 0x309   : > { %4412 = vmatpush3.bf16.msra.mxu0 (!%p4308_p13), %v5149_v7  ;;  %v5173_v7 = vld [vmem:[#allocation16 + $0x20] ss:$16 sps:$4 sm:$0xff] (!%p4308_p13)  }
 0x342   : > { %v2852_v23 = vpop.f32.mrb[16].mxu0 }
 0x343   : > { %v2893_v24 = vpop.f32.mrb[16].mxu1  ;;  %v2853_v25 = vadd.f32 %v2852_v23, %v2812_v17  ;;  %v2854_v26 = vpop.f32.mrb[17].mxu0  ;;  %v2921_v17 = vrot.slane (!%p4308_p13), %v2916_v12, %v2920_v5  ;;  %v2939_v23 = vadd.f32 (!%p4308_p13), %v2925_v14, %v2913_v11  ;;  %v5179_v11 = vld [vmem:[#allocation16 + $0x40] ss:$16 sps:$4 sm:$0xff] (!%p4308_p13)   ;;  %v5187_v12 = vld [vmem:[#allocation16 + $0x64] ss:$16 sps:$4 sm:$0xff] (!%p4308_p13)  }
 0x344   : > { %v2895_v27 = vpop.f32.mrb[17].mxu1  ;;  %v2855_v30 = vadd.f32 %v2854_v26, %v2814_v20  ;;  %v2856_v31 = vpop.f32.mrb[18].mxu0  ;;  %2911 = sbr.rel (%p4308_p13) target bundleno = 1733 (0x6c5), region = 112  ;;  %v5568_v20 = vmov (!%p4308_p13), 0.0   ;;  %v5193_v14 = vld [vmem:[#allocation16 + $0x84] ss:$16 sps:$4 sm:$0xff] (!%p4308_p13)  }
 0x345   : > { %v2897_v32 = vpop.f32.mrb[18].mxu1  ;;  %v2894_v33 = vadd.f32 %v2893_v24, %v2853_v25  ;;  %v2857_v36 = vpop.f32.mrb[19].mxu0  ;;  %4459 = vmatprep.subr.bf16.mxu0 (!%p4308_p13), %v5568_v20  ;;  %4479 = vmatprep.subr.bf16.mxu1 (!%p4308_p13), %v5568_v20  ;;  %v2938_v25 = vadd.f32 (!%p4308_p13), %v2921_v17, %v2912_v16  ;;  %v5199_v16 = vld [vmem:[#allocation16 + $0xa4] ss:$16 sps:$4 sm:$0xff] (!%p4308_p13)   ;;  %v5197_v17 = vld [vmem:[#allocation16 + $0xa0] ss:$16 sps:$4 sm:$0xff] (!%p4308_p13)  }
 0x346   : > { %v2898_v37 = vpop.f32.mrb[19].mxu1  ;;  %v2896_v39 = vadd.f32 %v2895_v27, %v2855_v30  ;;  %v2943_v27 = vmax.f32 (!%p4308_p13), %v2939_v23, 0.0 }
 0x347   : > { %v2902_v50 = vadd.f32 %v2894_v33, %v548_v29  ;;  %v2942_v30 = vmax.f32 (!%p4308_p13), %v2938_v25, 0.0  ;;  %v5151_v37 = vld [vmem:[#allocation10] sm:$0xff] (!%p4308_p13)  }
 0x348   : > { %v2903_v40 = vadd.f32 %v2896_v39, %v549_v35  ;;  %v2947_v32 = vpack.c.bf16 (!%p4308_p13), %v2943_v27, %v2943_v27  ;;  %v5152_v39 = vld [vmem:[#allocation10 + $0x8] sm:$0xff] (!%p4308_p13)  }
 0x349   : > { %2906 = vst [vmem:[#allocation2 + $0x10] sm:$0xff] %v2902_v50  ;;  %v2946_v35 = vpack.c.bf16 (!%p4308_p13), %v2942_v30, %v2942_v30  ;;  %v5153_v50 = vld [vmem:[#allocation10 + $0x10] sm:$0xff] (!%p4308_p13)   ;;  %v5170_v30 = vld [vmem:[#allocation16 + $0x8] ss:$16 sps:$4 sm:$0xff] (!%p4308_p13)  }
 0x34a   : > { %2907 = vst [vmem:[#allocation2 + $0x18] sm:$0xff] %v2903_v40  ;;  %3245 = vmatprep.mubr.bf16.mxu0 (!%p4308_p13), %v2947_v32  ;;  %v5154_v40 = vld [vmem:[#allocation10 + $0x18] sm:$0xff] (!%p4308_p13)   ;;  %v5178_v32 = vld [vmem:[#allocation16 + $0x2c] ss:$16 sps:$4 sm:$0xff] (!%p4308_p13)  }
 0x34b   : > { %3246 = vmatmul.mubr.bf16.vlgmr.msra.gmra.mrb[0].mxu0 %v2946_v35  ;;  %v5184_v35 = vld [vmem:[#allocation16 + $0x4c] ss:$16 sps:$4 sm:$0xff]  }
 0x34c   : > { %4460 = vmatpush3.bf16.msra.mxu0 %v5151_v37  ;;  %4475 = vmatprep.mubr.msk.bf16.mxu0 %vm5569_vm0, %v5568_v20  ;;  %v5190_v37 = vld [vmem:[#allocation16 + $0x6c] ss:$16 sps:$4 sm:$0xff]  }
 0x34d   : > { %4461 = vmatprep.subr.bf16.mxu0 %v5568_v20 }
 0x350   : > { %v2914_v18 = vld [vmem:[#allocation2 + $0x10] sm:$0xff]  ;;  %4462 = vmatpush3.bf16.msra.mxu0 %v5152_v39 }
 0x351   : > { %v2915_v13 = vld [vmem:[#allocation2 + $0x18] sm:$0xff]  ;;  %v2940_v26 = vadd.f32 %v2929_v19, %v2914_v18  ;;  %4463 = vmatprep.subr.bf16.mxu0 %v5568_v20  ;;  %v5188_v39 = vld [vmem:[#allocation16 + $0x68] ss:$16 sps:$4 sm:$0xff]  }
 0x352   : > { %v2941_v24 = vadd.f32 %v2933_v15, %v2915_v13  ;;  %v5185_v13 = vld [vmem:[#allocation16 + $0x60] ss:$16 sps:$4 sm:$0xff]   ;;  %v5205_v18 = vld [vmem:[#allocation16 + $0xc4] ss:$16 sps:$4 sm:$0xff]  }
 0x353   : > { %v2944_v31 = vmax.f32 %v2940_v26, 0.0  ;;  %v5191_v15 = vld [vmem:[#allocation16 + $0x80] ss:$16 sps:$4 sm:$0xff]  }
 0x354   : > { %v2945_v29 = vmax.f32 %v2941_v24, 0.0  ;;  %4464 = vmatpush3.bf16.msra.mxu0 %v5153_v50  ;;  %v5203_v19 = vld [vmem:[#allocation16 + $0xc0] ss:$16 sps:$4 sm:$0xff]   ;;  %v5196_v50 = vld [vmem:[#allocation16 + $0x8c] ss:$16 sps:$4 sm:$0xff]  }
 0x355   : > { %v2948_v36 = vpack.c.bf16 %v2944_v31, %v2944_v31  ;;  %4465 = vmatprep.subr.bf16.mxu0 %v5568_v20 }
 0x356   : > { %v2949_v33 = vpack.c.bf16 %v2945_v29, %v2945_v29 }
 0x358   : > { %3285 = vmatprep.mubr.bf16.mxu1 %v2949_v33  ;;  %4466 = vmatpush3.bf16.msra.mxu0 %v5154_v40  ;;  %v5176_v33 = vld [vmem:[#allocation16 + $0x28] ss:$16 sps:$4 sm:$0xff]  }
 0x359   : > { %3286 = vmatmul.mubr.bf16.vlgmr.msra.gmra.mrb[0].mxu1 %v2948_v36  ;;  %4467 = vmatprep.subr.bf16.mxu0 %v5568_v20  ;;  %v5182_v36 = vld [vmem:[#allocation16 + $0x48] ss:$16 sps:$4 sm:$0xff]  }
 0x35a   : > { %4495 = vmatprep.mubr.msk.bf16.mxu1 %vm5569_vm0, %v5568_v20  ;;  %4480 = vmatpush3.bf16.msra.mxu1 %v5159_v45  ;;  %v5194_v40 = vld [vmem:[#allocation16 + $0x88] ss:$16 sps:$4 sm:$0xff]   ;;  %v5211_v45 = vld [vmem:[#allocation16 + $0xe4] ss:$16 sps:$4 sm:$0xff]  }
 0x35b   : > { %4481 = vmatprep.subr.bf16.mxu1 %v5568_v20 }
 0x35c   : > { %4468 = vmatpush3.bf16.msra.mxu0 %v5155_v42  ;;  %v5202_v42 = vld [vmem:[#allocation16 + $0xac] ss:$16 sps:$4 sm:$0xff]  }
 0x35d   : > { %4469 = vmatprep.subr.bf16.mxu0 %v5568_v20 }
 0x35e   : > { %4482 = vmatpush3.bf16.msra.mxu1 %v5160_v46  ;;  %v5214_v46 = vld [vmem:[#allocation16 + $0xec] ss:$16 sps:$4 sm:$0xff]  }
 0x35f   : > { %4483 = vmatprep.subr.bf16.mxu1 %v5568_v20 }
 0x360   : > { %4470 = vmatpush3.bf16.msra.mxu0 %v5156_v43  ;;  %v5200_v43 = vld [vmem:[#allocation16 + $0xa8] ss:$16 sps:$4 sm:$0xff]  }
 0x361   : > { %4471 = vmatprep.subr.bf16.mxu0 %v5568_v20 }
 0x362   : > { %4484 = vmatpush3.bf16.msra.mxu1 %v5161_v47  ;;  %v5209_v47 = vld [vmem:[#allocation16 + $0xe0] ss:$16 sps:$4 sm:$0xff]  }
 0x363   : > { %4485 = vmatprep.subr.bf16.mxu1 %v5568_v20 }
 0x364   : > { %4472 = vmatpush3.bf16.msra.mxu0 %v5157_v9  ;;  %v5208_v9 = vld [vmem:[#allocation16 + $0xcc] ss:$16 sps:$4 sm:$0xff]  }
 0x365   : > { %4473 = vmatprep.subr.bf16.mxu0 %v5568_v20 }
 0x366   : > { %4486 = vmatpush3.bf16.msra.mxu1 %v5162_v53  ;;  %v5212_v53 = vld [vmem:[#allocation16 + $0xe8] ss:$16 sps:$4 sm:$0xff]  }
 0x367   : > { %4487 = vmatprep.subr.bf16.mxu1 %v5568_v20 }
 0x368   : > { %4474 = vmatpush3.bf16.msra.mxu0 %v5158_v44  ;;  %v5206_v44 = vld [vmem:[#allocation16 + $0xc8] ss:$16 sps:$4 sm:$0xff]  }
 0x369   : > { %3735 = vmatprep.subr.bf16.mxu0 %v5169_v3 }
 0x36a   : > { %4488 = vmatpush3.bf16.msra.mxu1 %v5163_v10  ;;  %v5570_v10 = vmov 0  }
 0x36b   : > { %4489 = vmatprep.subr.bf16.mxu1 %v5568_v20 }
 0x36e   : > { %4490 = vmatpush3.bf16.msra.mxu1 %v5164_v21  ;;  %v4351_v21 = vld [vmem:[#allocation14] ss:$0 sm:$0xff] }
 0x36f   : > { %4491 = vmatprep.subr.bf16.mxu1 %v5568_v20 }
 0x372   : > { %4492 = vmatpush3.bf16.msra.mxu1 %v5165_v62 }
 0x373   : > { %4493 = vmatprep.subr.bf16.mxu1 %v5568_v20  ;;  %v4342_v20 = vld [vmem:[#allocation11] ss:$0 sm:$0xff] }
 0x376   : > { %4494 = vmatpush3.bf16.msra.mxu1 %v5166_v34 }
 0x377   : > { %3776 = vmatprep.subr.bf16.mxu1 %v5172_v4 }
 0x41e   : > { %v4413_v38 = vpop.f32.mrb[0].mxu0 }
 0x41f   : > { %v4414_v41 = vpop.f32.mrb[1].mxu0 }
 0x420   : > { %v4415_v51 = vadd.f32 %v4414_v41, %v4413_v38  ;;  %v4416_v54 = vpop.f32.mrb[2].mxu0 }
 0x421   : > { %v4417_v56 = vpop.f32.mrb[3].mxu0  ;;  %v3553_v54 = vld [vmem:[#allocation17] sm:$0xf] }
 0x422   : > { %v3248_v58 = vadd.f32 %v4415_v51, %v4309_v49  ;;  %v3566_v56 = vrot.slane %v3553_v54, %v2928_v2 }
 0x42c   : > { %v4435_v48 = vpop.f32.mrb[0].mxu1 }
 0x42d   : > { %v4436_v28 = vpop.f32.mrb[1].mxu1 }
 0x42e   : > { %v4437_v52 = vadd.f32 %v4436_v28, %v4435_v48  ;;  %v4438_v55 = vpop.f32.mrb[2].mxu1 }
 0x42f   : > { %v4439_v57 = vpop.f32.mrb[3].mxu1  ;;  %v3558_v55 = vrot.slane %v3553_v54, %v2920_v5 }
 0x430   : > { %v3288_v59 = vadd.f32 %v4437_v52, %v3248_v58  ;;  %v3562_v57 = vrot.slane %v3553_v54, %v2924_v1  ;;  %v3570_v58 = vrot.slane %v3553_v54, %v2932_v63 }
 0x432   : > { %v3293_v60 = vmax.f32 %v3288_v59, 0.0 }
 0x434   : > { %v3294_v22 = vpack.c.bf16 %v3293_v60, %v3293_v60 }
 0x436   : > { %4476 = vmatmul.mubr.bf16.vlgmr.msra.gmra.mrb[4].mxu0 %v3294_v22 }
 0x437   : > { %3736 = vmatpush1.bf16.msra.mxu0 %v5167_v0  ;;  %3767 = vmatprep.mubr.bf16.mxu0 %v5570_v10 }
 0x438   : > { %3737 = vmatprep.subr.bf16.mxu0 %v5175_v6 }
 0x43b   : > { %3738 = vmatpush1.bf16.msra.mxu0 %v5173_v7 }
 0x43c   : > { %3739 = vmatprep.subr.bf16.mxu0 %v5181_v8 }
 0x43f   : > { %3740 = vmatpush1.bf16.msra.mxu0 %v5179_v11 }
 0x440   : > { %3741 = vmatprep.subr.bf16.mxu0 %v5187_v12 }
 0x443   : > { %3742 = vmatpush1.bf16.msra.mxu0 %v5185_v13 }
 0x444   : > { %3743 = vmatprep.subr.bf16.mxu0 %v5193_v14 }
 0x447   : > { %3744 = vmatpush1.bf16.msra.mxu0 %v5191_v15 }
 0x448   : > { %3745 = vmatprep.subr.bf16.mxu0 %v5199_v16 }
 0x44b   : > { %3746 = vmatpush1.bf16.msra.mxu0 %v5197_v17 }
 0x44c   : > { %3747 = vmatprep.subr.bf16.mxu0 %v5205_v18 }
 0x44f   : > { %3748 = vmatpush1.bf16.msra.mxu0 %v5203_v19 }
 0x450   : > { %3749 = vmatprep.subr.bf16.mxu0 %v5211_v45 }
 0x453   : > { %3750 = vmatpush1.bf16.msra.mxu0 %v5209_v47 }
 0x509   : > { %v3400_v23 = vpop.f32.mrb[4].mxu0 }
 0x50a   : > { %v3401_v24 = vadd.f32 %v4342_v20, %v3400_v23  ;;  %v4477_v25 = vpop.f32.mrb[5].mxu0 }
 0x50b   : > { %v3403_v26 = vpop.f32.mrb[6].mxu0 }
 0x50c   : > { %v3406_v27 = vmax.f32 %v3401_v24, 0.0  ;;  %v4478_v29 = vpop.f32.mrb[7].mxu0 }
 0x50e   : > { %v3407_v31 = vpack.c.bf16 %v3406_v27, %v3406_v27 }
 0x510   : > { %4496 = vmatmul.mubr.bf16.vlgmr.msra.gmra.mrb[4].mxu1 %v3407_v31 }
 0x511   : > { %3777 = vmatpush1.bf16.msra.mxu1 %v5170_v30  ;;  %3808 = vmatprep.mubr.bf16.mxu1 %v5570_v10 }
 0x512   : > { %3778 = vmatprep.subr.bf16.mxu1 %v5178_v32 }
 0x515   : > { %3779 = vmatpush1.bf16.msra.mxu1 %v5176_v33 }
 0x516   : > { %3780 = vmatprep.subr.bf16.mxu1 %v5184_v35 }
 0x519   : > { %3781 = vmatpush1.bf16.msra.mxu1 %v5182_v36 }
 0x51a   : > { %3782 = vmatprep.subr.bf16.mxu1 %v5190_v37 }
 0x51d   : > { %3783 = vmatpush1.bf16.msra.mxu1 %v5188_v39 }
 0x51e   : > { %3784 = vmatprep.subr.bf16.mxu1 %v5196_v50 }
 0x521   : > { %3785 = vmatpush1.bf16.msra.mxu1 %v5194_v40 }
 0x522   : > { %3786 = vmatprep.subr.bf16.mxu1 %v5202_v42 }
 0x525   : > { %3787 = vmatpush1.bf16.msra.mxu1 %v5200_v43 }
 0x526   : > { %3788 = vmatprep.subr.bf16.mxu1 %v5208_v9 }
 0x529   : > { %3789 = vmatpush1.bf16.msra.mxu1 %v5206_v44 }
 0x52a   : > { %3790 = vmatprep.subr.bf16.mxu1 %v5214_v46 }
 0x52d   : > { %3791 = vmatpush1.bf16.msra.mxu1 %v5212_v53 }
 0x5e3   : > { %v3513_v38 = vpop.f32.mrb[4].mxu1 }
 0x5e4   : > { %v3514_v48 = vadd.f32 %v4351_v21, %v3513_v38  ;;  %v4497_v49 = vpop.f32.mrb[5].mxu1 }
 0x5e5   : > { %v3516_v41 = vpop.f32.mrb[6].mxu1 }
 0x5e6   : > { %v3519_v28 = vmax.f32 %v3514_v48, 0.0  ;;  %v4498_v51 = vpop.f32.mrb[7].mxu1 }
 0x5e8   : > { %v3520_v52 = vpack.c.bf16 %v3519_v28, %v3519_v28 }
 0x5ea   : > { %3768 = vmatmul.mubr.bf16.vlgmr.msra.gmra.mrb[8].mxu0 %v3520_v52  ;;  %3809 = vmatmul.mubr.bf16.vlgmr.msra.gmra.mrb[8].mxu1 %v3520_v52 }
 0x6bd   : > { %v3769_v59 = vpop.f32.mrb[8].mxu0  ;;  %v3810_v60 = vpop.f32.mrb[8].mxu1 }
 0x6be   : > { %v3770_v22 = vadd.f32 %v3769_v59, %v3558_v55  ;;  %v3811_v62 = vadd.f32 %v3810_v60, %v3566_v56  ;;  %v3771_v34 = vpop.f32.mrb[9].mxu0  ;;  %v3812_v0 = vpop.f32.mrb[9].mxu1 }
 0x6bf   : > { %v3772_v3 = vadd.f32 %v3771_v34, %v3562_v57  ;;  %v3813_v4 = vadd.f32 %v3812_v0, %v3570_v58  ;;  %v3773_v6 = vpop.f32.mrb[10].mxu0  ;;  %v3814_v7 = vpop.f32.mrb[10].mxu1 }
 0x6c0   : > { %v3817_v5 = vmax.f32 %v3770_v22, 0.0  ;;  %v3819_v8 = vmax.f32 %v3811_v62, 0.0  ;;  %v3774_v11 = vpop.f32.mrb[11].mxu0  ;;  %v3815_v2 = vpop.f32.mrb[11].mxu1 }
 0x6c1   : > { %v3818_v12 = vmax.f32 %v3772_v3, 0.0  ;;  %v3820_v13 = vmax.f32 %v3813_v4, 0.0 }
 0x6c2   : > { %3821 = vst [vmem:[%s6462_s20] sm:$0xff] %v3817_v5 }
 0x6c3   : > { %3823 = vst [vmem:[%s6463_s29 + $0x10] sm:$0xff] %v3819_v8  ;;  %3822 = vst [vmem:[%s6463_s29 + $0x8] sm:$0xff] %v3818_v12 }
 0x6c4   : > { %3824 = vst [vmem:[%s6463_s29 + $0x18] sm:$0xff] %v3820_v13 }
 0x6c5 PF: > { %p26_p10 = scmp.ge.s32.totalorder %s5877_s25, 6   ;;  %s6464_s17 = smov %s5543_s18 }
 0x6c6   : > { %s6465_s18 = smov %s5547_s19  ;;  %s6466_s19 = smov %s5888_s11 }
 0x6c7   : > { %s6467_s20 = smov %s5877_s25  ;;  %28 = sbr.rel (!%p26_p10) target bundleno = 14 (0xe), region = 147 }
 0x6ce   :  { %3836 = vsyncpa [#allocation4], 1 }
 0x6cf   :  { %3838 = vsyncpa [#allocation4 + $0x1], 1 }
 0x6d0   :  { %3839 = vsyncpa [#allocation6], 1 }
 0x6d1   :  { %3840 = vsyncpa [#allocation9], 1 }
 0x6d2   :  { %3841 = vsyncpa [#allocation12], 1 }
 0x6d3   :  { %3842 = vsyncpa [#allocation15], 1 }
 0x6d4   :  { %3843 = vsyncpa [#allocation18], 1 }

</bundles_post_ra>
